<compile_context>
chip_gen: v7x
topology: tpu7x:2x2x1
jax: 0.10.0
libtpu: 0.0.40
codegen_flags: <defaults>
</compile_context>

<pallas_src>
import functools

import jax
import jax.numpy as jnp
from jax.experimental import pallas as pl
from jax.experimental.pallas import tpu as pltpu


H_IN = 8          # board height (implied by Flatten -> Linear(128))
W_IN = 8          # board width
C_IN = 6          # input channels
C_IN_PAD = 8      # pad Cin 6 -> 8 so the first conv's K dim is sublane-aligned
TB_MIN = 8        # minimum batch tile (sublane multiple)
TB_MAX = 64       # maximum batch tile (keeps scratch well inside VMEM)


# ----------------------------------------------------------------------------
# In-kernel building blocks
# ----------------------------------------------------------------------------
def _leaky_relu(x, slope=0.1):
    return jnp.where(x > 0, x, slope * x)


def _conv3x3(pad_ref, w_ref, b_ref, h, w, tb, cin, cout):
    """3x3 'same' conv on a zero-padded (h+2, w+2, tb, cin) VMEM scratch.

    In-kernel im2col: 9 accumulating MXU dots over statically shifted views.
    Returns float32 of shape (h, w, tb, cout).
    """
    rows = h * w * tb
    acc = jnp.zeros((rows, cout), dtype=jnp.float32)
    for k in range(9):
        dy, dx = divmod(k, 3)
        v = pad_ref[dy:dy + h, dx:dx + w, :, :].reshape(rows, cin)
        acc = acc + jnp.dot(v, w_ref[k], preferred_element_type=jnp.float32)
    acc = acc + b_ref[...]
    return acc.reshape(h, w, tb, cout)


def _maxpool2x2(y):
    """2x2 / stride-2 max pool; pooled dims are leading dims (no lane shuffles)."""
    h, w, tb, c = y.shape
    r = y.reshape(h // 2, 2, w, tb, c)
    y = jnp.maximum(r[:, 0], r[:, 1])              # pool height
    r = y.reshape(h // 2, w // 2, 2, tb, c)
    return jnp.maximum(r[:, :, 0], r[:, :, 1])     # pool width


def _fused_kernel(x_ref,
                  w1, b1, w2, b2, w3, b3,
                  f1w, f1b, f2w, f2b, f3w, f3b, f4w, f4b,
                  o_ref,
                  pad1, pad2, pad3,
                  *, tb):
    # ---- conv1 (6->32 on 8x8) + pool -> (4,4,tb,32) -------------------------
    pad1[...] = jnp.zeros_like(pad1)
    pad1[1:1 + H_IN, 1:1 + W_IN, :, :] = x_ref[...]
    y = _conv3x3(pad1, w1, b1, H_IN, W_IN, tb, C_IN_PAD, 32)
    p = _maxpool2x2(y)

    # ---- conv2 (32->64 on 4x4) + pool -> (2,2,tb,64) ------------------------
    pad2[...] = jnp.zeros_like(pad2)
    pad2[1:5, 1:5, :, :] = p
    y = _conv3x3(pad2, w2, b2, 4, 4, tb, 32, 64)
    p = _maxpool2x2(y)

    # ---- conv3 (64->128 on 2x2) + tanh + pool + flatten -> (tb,128) ---------
    pad3[...] = jnp.zeros_like(pad3)
    pad3[1:3, 1:3, :, :] = p
    y = jnp.tanh(_conv3x3(pad3, w3, b3, 2, 2, tb, 64, 128))
    f = _maxpool2x2(y).reshape(tb, 128)

    # ---- fused FC stack (all weights lane-dense 128 wide) --------------------
    h = _leaky_relu(
        jnp.dot(f, f1w[...], preferred_element_type=jnp.float32) + f1b[...])
    # TODO(synk): Dropout(p=0.2) is stochastic only in train mode; identity in eval mode.
    h = _leaky_relu(
        jnp.dot(h, f2w[...], preferred_element_type=jnp.float32) + f2b[...])
    # TODO(synk): Dropout(p=0.2) treated as identity (eval mode).
    h = jnp.maximum(
        jnp.dot(h, f3w[...], preferred_element_type=jnp.float32) + f3b[...], 0.0)
    out = jnp.dot(h, f4w[...], preferred_element_type=jnp.float32) + f4b[...]
    o_ref[...] = out          # lane-dense (tb, 128) slab; column 0 is the result


# ----------------------------------------------------------------------------
# Parameters: deterministic synthetic init + one-time kernel-layout repack
# ----------------------------------------------------------------------------
def init_params(key):
    def nrm(k, shape, scale=0.05):
        return scale * jax.random.normal(k, shape, dtype=jnp.float32)

    ks = jax.random.split(key, 14)
    return {
        "conv1_w": nrm(ks[0], (32, 6, 3, 3)),   "conv1_b": nrm(ks[1], (32,)),
        "conv2_w": nrm(ks[2], (64, 32, 3, 3)),  "conv2_b": nrm(ks[3], (64,)),
        "conv3_w": nrm(ks[4], (128, 64, 3, 3)), "conv3_b": nrm(ks[5], (128,)),
        "fc1_w": nrm(ks[6], (128, 128)),        "fc1_b": nrm(ks[7], (128,)),
        "fc2_w": nrm(ks[8], (128, 128)),        "fc2_b": nrm(ks[9], (128,)),
        "fc3_w": nrm(ks[10], (64, 128)),        "fc3_b": nrm(ks[11], (64,)),
        "fc4_w": nrm(ks[12], (1, 64)),          "fc4_b": nrm(ks[13], (1,)),
    }


def pack_params(p):
    """One-time repack of PyTorch-layout weights into the kernel layout."""
    def conv_w(w, cin_pad=None):
        o, i, _, _ = w.shape
        w = jnp.transpose(w, (2, 3, 1, 0)).reshape(9, i, o)   # (tap, Cin, Cout)
        if cin_pad is not None and cin_pad > i:
            w = jnp.pad(w, ((0, 0), (0, cin_pad - i), (0, 0)))
        return w.astype(jnp.float32)

    def row(b, pad_to=None):
        r = b.reshape(1, -1).astype(jnp.float32)
        if pad_to is not None and pad_to > r.shape[1]:
            r = jnp.pad(r, ((0, 0), (0, pad_to - r.shape[1])))
        return r

    # fc3: pad output width 64 -> 128 (zero cols); ReLU keeps the pad at exactly 0.
    f3w = jnp.pad(p["fc3_w"].T.astype(jnp.float32), ((0, 0), (0, 64)))
    # fc4: pad input 64 -> 128 (zero rows, matched to fc3 zero cols) and the
    # single output column -> lane-dense 128.
    f4w = jnp.pad(p["fc4_w"].T.astype(jnp.float32), ((0, 64), (0, 127)))

    return {
        "w1": conv_w(p["conv1_w"], C_IN_PAD), "b1": row(p["conv1_b"]),
        "w2": conv_w(p["conv2_w"]),           "b2": row(p["conv2_b"]),
        "w3": conv_w(p["conv3_w"]),           "b3": row(p["conv3_b"]),
        "f1w": p["fc1_w"].T.astype(jnp.float32), "f1b": row(p["fc1_b"]),
        "f2w": p["fc2_w"].T.astype(jnp.float32), "f2b": row(p["fc2_b"]),
        "f3w": f3w,                              "f3b": row(p["fc3_b"], 128),
        "f4w": f4w,                              "f4b": row(p["fc4_b"], 128),
    }


_PARAM_ORDER = ("w1", "b1", "w2", "b2", "w3", "b3",
                "f1w", "f1b", "f2w", "f2b", "f3w", "f3b", "f4w", "f4b")


# ----------------------------------------------------------------------------
# Forward pass: single fused pallas_call, grid over batch tiles
# ----------------------------------------------------------------------------
@jax.jit
def evaluator_forward(packed, x_nchw):
    n, c, h, w = x_nchw.shape
    assert (c, h, w) == (C_IN, H_IN, W_IN), "simple_bot expects (N, 6, 8, 8) input"

    # Static (trace-time) batch-tile choice: multiple of 8, capped at TB_MAX.
    tb = max(TB_MIN, min(TB_MAX, ((n + 7) // 8) * 8))
    n_pad = ((n + tb - 1) // tb) * tb

    # NCHW -> (H, W, N, C): batch on sublanes, channels on lanes in the kernel.
    x = jnp.transpose(x_nchw.astype(jnp.float32), (2, 3, 0, 1))
    x = jnp.pad(x, ((0, 0), (0, 0), (0, n_pad - n), (0, C_IN_PAD - c)))

    def const_spec(arr):
        nd = arr.ndim
        return pl.BlockSpec(arr.shape, lambda i, _nd=nd: (0,) * _nd)

    in_specs = [pl.BlockSpec((H_IN, W_IN, tb, C_IN_PAD), lambda i: (0, 0, i, 0))]
    in_specs += [const_spec(packed[k]) for k in _PARAM_ORDER]

    out = pl.pallas_call(
        functools.partial(_fused_kernel, tb=tb),
        out_shape=jax.ShapeDtypeStruct((n_pad, 128), jnp.float32),
        grid_spec=pltpu.PrefetchScalarGridSpec(
            num_scalar_prefetch=0,
            grid=(n_pad // tb,),
            in_specs=in_specs,
            out_specs=pl.BlockSpec((tb, 128), lambda i: (i, 0)),
            scratch_shapes=[
                pltpu.VMEM((H_IN + 2, W_IN + 2, tb, C_IN_PAD), jnp.float32),
                pltpu.VMEM((6, 6, tb, 32), jnp.float32),
                pltpu.VMEM((4, 4, tb, 64), jnp.float32),
            ],
        ),
        compiler_params=pltpu.CompilerParams(
            dimension_semantics=("parallel",),
            vmem_limit_bytes=32 * 1024 * 1024,
        ),
    )(x, *[packed[k] for k in _PARAM_ORDER])

    return out[:n, :1]


if __name__ == "__main__":
    key = jax.random.PRNGKey(0)
    k_params, k_x = jax.random.split(key)
    params = pack_params(init_params(k_params))

    # Input consistent with the model: batch=2, 6 channels, 8x8 board.
    x = jax.random.normal(k_x, (2, C_IN, H_IN, W_IN), dtype=jnp.float32)

    out = evaluator_forward(params, x)
    out = jax.block_until_ready(out)
    assert out.shape == (2, 1), out.shape
    print("KERNEL_OK")
</pallas_src>

<mosaic_0001>
module attributes {stable_mosaic.version = 11 : i64} {
  func.func @_fused_kernel(%arg0: i32, %arg1: memref<8x8x8x8xf32, #tpu.memory_space<vmem>>, %arg2: memref<9x8x32xf32, #tpu.memory_space<vmem>>, %arg3: memref<1x32xf32, #tpu.memory_space<vmem>>, %arg4: memref<9x32x64xf32, #tpu.memory_space<vmem>>, %arg5: memref<1x64xf32, #tpu.memory_space<vmem>>, %arg6: memref<9x64x128xf32, #tpu.memory_space<vmem>>, %arg7: memref<1x128xf32, #tpu.memory_space<vmem>>, %arg8: memref<128x128xf32, #tpu.memory_space<vmem>>, %arg9: memref<1x128xf32, #tpu.memory_space<vmem>>, %arg10: memref<128x128xf32, #tpu.memory_space<vmem>>, %arg11: memref<1x128xf32, #tpu.memory_space<vmem>>, %arg12: memref<128x128xf32, #tpu.memory_space<vmem>>, %arg13: memref<1x128xf32, #tpu.memory_space<vmem>>, %arg14: memref<128x128xf32, #tpu.memory_space<vmem>>, %arg15: memref<1x128xf32, #tpu.memory_space<vmem>>, %arg16: memref<8x128xf32, #tpu.memory_space<vmem>>, %arg17: memref<10x10x8x8xf32, #tpu.memory_space<vmem>>, %arg18: memref<6x6x8x32xf32, #tpu.memory_space<vmem>>, %arg19: memref<4x4x8x64xf32, #tpu.memory_space<vmem>>) attributes {dimension_semantics = [#tpu.dimension_semantics<parallel>], iteration_bounds = array<i64: 1>, scalar_prefetch = 0 : i64, scratch_operands = 3 : i64, tpu.core_type = #tpu.core_type<tc>, window_params = [{transform_indices = @transform_0, window_bounds = array<i64: 8, 8, 8, 8>}, {pipeline_mode = #tpu.pipeline_mode<synchronous>, transform_indices = @transform_1, window_bounds = array<i64: 9, 8, 32>}, {pipeline_mode = #tpu.pipeline_mode<synchronous>, transform_indices = @transform_2, window_bounds = array<i64: 1, 32>}, {pipeline_mode = #tpu.pipeline_mode<synchronous>, transform_indices = @transform_3, window_bounds = array<i64: 9, 32, 64>}, {pipeline_mode = #tpu.pipeline_mode<synchronous>, transform_indices = @transform_4, window_bounds = array<i64: 1, 64>}, {pipeline_mode = #tpu.pipeline_mode<synchronous>, transform_indices = @transform_5, window_bounds = array<i64: 9, 64, 128>}, {pipeline_mode = #tpu.pipeline_mode<synchronous>, transform_indices = @transform_6, window_bounds = array<i64: 1, 128>}, {pipeline_mode = #tpu.pipeline_mode<synchronous>, transform_indices = @transform_7, window_bounds = array<i64: 128, 128>}, {pipeline_mode = #tpu.pipeline_mode<synchronous>, transform_indices = @transform_8, window_bounds = array<i64: 1, 128>}, {pipeline_mode = #tpu.pipeline_mode<synchronous>, transform_indices = @transform_9, window_bounds = array<i64: 128, 128>}, {pipeline_mode = #tpu.pipeline_mode<synchronous>, transform_indices = @transform_10, window_bounds = array<i64: 1, 128>}, {pipeline_mode = #tpu.pipeline_mode<synchronous>, transform_indices = @transform_11, window_bounds = array<i64: 128, 128>}, {pipeline_mode = #tpu.pipeline_mode<synchronous>, transform_indices = @transform_12, window_bounds = array<i64: 1, 128>}, {pipeline_mode = #tpu.pipeline_mode<synchronous>, transform_indices = @transform_13, window_bounds = array<i64: 128, 128>}, {pipeline_mode = #tpu.pipeline_mode<synchronous>, transform_indices = @transform_14, window_bounds = array<i64: 1, 128>}, {transform_indices = @transform_15, window_bounds = array<i64: 8, 128>}]} {
    %cst = arith.constant 0.000000e+00 : f32
    %0 = vector.broadcast %cst : f32 to vector<10x10x8x8xf32>
    %c0 = arith.constant 0 : index
    %c0_0 = arith.constant 0 : index
    %c0_1 = arith.constant 0 : index
    %c0_2 = arith.constant 0 : index
    %1 = vector.load %arg17[%c0, %c0_0, %c0_1, %c0_2] : memref<10x10x8x8xf32, #tpu.memory_space<vmem>>, vector<10x10x8x8xf32>
    tpu.vector_store %arg17[%c0, %c0_0, %c0_1, %c0_2], %0 {strides = array<i32>} : memref<10x10x8x8xf32, #tpu.memory_space<vmem>>, vector<10x10x8x8xf32>,
    %c0_3 = arith.constant 0 : index
    %c0_4 = arith.constant 0 : index
    %c0_5 = arith.constant 0 : index
    %c0_6 = arith.constant 0 : index
    %2 = vector.load %arg1[%c0_3, %c0_4, %c0_5, %c0_6] : memref<8x8x8x8xf32, #tpu.memory_space<vmem>>, vector<8x8x8x8xf32>
    %c1 = arith.constant 1 : index
    %c1_7 = arith.constant 1 : index
    %c0_8 = arith.constant 0 : index
    %c0_9 = arith.constant 0 : index
    %3 = vector.load %arg17[%c1, %c1_7, %c0_8, %c0_9] : memref<10x10x8x8xf32, #tpu.memory_space<vmem>>, vector<8x8x8x8xf32>
    tpu.vector_store %arg17[%c1, %c1_7, %c0_8, %c0_9], %2 {strides = array<i32>} : memref<10x10x8x8xf32, #tpu.memory_space<vmem>>, vector<8x8x8x8xf32>,
    %cst_10 = arith.constant 0.000000e+00 : f32
    %4 = vector.broadcast %cst_10 : f32 to vector<512x32xf32>
    %c0_11 = arith.constant 0 : index
    %c0_12 = arith.constant 0 : index
    %c0_13 = arith.constant 0 : index
    %c0_14 = arith.constant 0 : index
    %5 = vector.load %arg17[%c0_11, %c0_12, %c0_13, %c0_14] : memref<10x10x8x8xf32, #tpu.memory_space<vmem>>, vector<8x8x8x8xf32>
    %6 = vector.shape_cast %5 : vector<8x8x8x8xf32> to vector<512x8xf32>
    %c0_15 = arith.constant 0 : index
    %c0_16 = arith.constant 0 : index
    %c0_17 = arith.constant 0 : index
    %7 = vector.load %arg2[%c0_15, %c0_16, %c0_17] : memref<9x8x32xf32, #tpu.memory_space<vmem>>, vector<1x8x32xf32>
    %8 = vector.shape_cast %7 : vector<1x8x32xf32> to vector<8x32xf32>
    %cst_18 = arith.constant dense<0.000000e+00> : vector<512x32xf32>
    %9 = tpu.matmul %6, %8, %cst_18 {dimension_numbers = #tpu.dot_dimension_numbers<[1], [0], [0], [1], [0, 0, 1, 1], [], []>} : vector<512x8xf32>, vector<8x32xf32>, vector<512x32xf32> -> vector<512x32xf32>
    %10 = arith.addf %4, %9 : vector<512x32xf32>
    %c0_19 = arith.constant 0 : index
    %c1_20 = arith.constant 1 : index
    %c0_21 = arith.constant 0 : index
    %c0_22 = arith.constant 0 : index
    %11 = vector.load %arg17[%c0_19, %c1_20, %c0_21, %c0_22] : memref<10x10x8x8xf32, #tpu.memory_space<vmem>>, vector<8x8x8x8xf32>
    %12 = vector.shape_cast %11 : vector<8x8x8x8xf32> to vector<512x8xf32>
    %c1_23 = arith.constant 1 : index
    %c0_24 = arith.constant 0 : index
    %c0_25 = arith.constant 0 : index
    %13 = vector.load %arg2[%c1_23, %c0_24, %c0_25] : memref<9x8x32xf32, #tpu.memory_space<vmem>>, vector<1x8x32xf32>
    %14 = vector.shape_cast %13 : vector<1x8x32xf32> to vector<8x32xf32>
    %cst_26 = arith.constant dense<0.000000e+00> : vector<512x32xf32>
    %15 = tpu.matmul %12, %14, %cst_26 {dimension_numbers = #tpu.dot_dimension_numbers<[1], [0], [0], [1], [0, 0, 1, 1], [], []>} : vector<512x8xf32>, vector<8x32xf32>, vector<512x32xf32> -> vector<512x32xf32>
    %16 = arith.addf %10, %15 : vector<512x32xf32>
    %c0_27 = arith.constant 0 : index
    %c2 = arith.constant 2 : index
    %c0_28 = arith.constant 0 : index
    %c0_29 = arith.constant 0 : index
    %17 = vector.load %arg17[%c0_27, %c2, %c0_28, %c0_29] : memref<10x10x8x8xf32, #tpu.memory_space<vmem>>, vector<8x8x8x8xf32>
    %18 = vector.shape_cast %17 : vector<8x8x8x8xf32> to vector<512x8xf32>
    %c2_30 = arith.constant 2 : index
    %c0_31 = arith.constant 0 : index
    %c0_32 = arith.constant 0 : index
    %19 = vector.load %arg2[%c2_30, %c0_31, %c0_32] : memref<9x8x32xf32, #tpu.memory_space<vmem>>, vector<1x8x32xf32>
    %20 = vector.shape_cast %19 : vector<1x8x32xf32> to vector<8x32xf32>
    %cst_33 = arith.constant dense<0.000000e+00> : vector<512x32xf32>
    %21 = tpu.matmul %18, %20, %cst_33 {dimension_numbers = #tpu.dot_dimension_numbers<[1], [0], [0], [1], [0, 0, 1, 1], [], []>} : vector<512x8xf32>, vector<8x32xf32>, vector<512x32xf32> -> vector<512x32xf32>
    %22 = arith.addf %16, %21 : vector<512x32xf32>
    %c1_34 = arith.constant 1 : index
    %c0_35 = arith.constant 0 : index
    %c0_36 = arith.constant 0 : index
    %c0_37 = arith.constant 0 : index
    %23 = vector.load %arg17[%c1_34, %c0_35, %c0_36, %c0_37] : memref<10x10x8x8xf32, #tpu.memory_space<vmem>>, vector<8x8x8x8xf32>
    %24 = vector.shape_cast %23 : vector<8x8x8x8xf32> to vector<512x8xf32>
    %c3 = arith.constant 3 : index
    %c0_38 = arith.constant 0 : index
    %c0_39 = arith.constant 0 : index
    %25 = vector.load %arg2[%c3, %c0_38, %c0_39] : memref<9x8x32xf32, #tpu.memory_space<vmem>>, vector<1x8x32xf32>
    %26 = vector.shape_cast %25 : vector<1x8x32xf32> to vector<8x32xf32>
    %cst_40 = arith.constant dense<0.000000e+00> : vector<512x32xf32>
    %27 = tpu.matmul %24, %26, %cst_40 {dimension_numbers = #tpu.dot_dimension_numbers<[1], [0], [0], [1], [0, 0, 1, 1], [], []>} : vector<512x8xf32>, vector<8x32xf32>, vector<512x32xf32> -> vector<512x32xf32>
    %28 = arith.addf %22, %27 : vector<512x32xf32>
    %c1_41 = arith.constant 1 : index
    %c1_42 = arith.constant 1 : index
    %c0_43 = arith.constant 0 : index
    %c0_44 = arith.constant 0 : index
    %29 = vector.load %arg17[%c1_41, %c1_42, %c0_43, %c0_44] : memref<10x10x8x8xf32, #tpu.memory_space<vmem>>, vector<8x8x8x8xf32>
    %30 = vector.shape_cast %29 : vector<8x8x8x8xf32> to vector<512x8xf32>
    %c4 = arith.constant 4 : index
    %c0_45 = arith.constant 0 : index
    %c0_46 = arith.constant 0 : index
    %31 = vector.load %arg2[%c4, %c0_45, %c0_46] : memref<9x8x32xf32, #tpu.memory_space<vmem>>, vector<1x8x32xf32>
    %32 = vector.shape_cast %31 : vector<1x8x32xf32> to vector<8x32xf32>
    %cst_47 = arith.constant dense<0.000000e+00> : vector<512x32xf32>
    %33 = tpu.matmul %30, %32, %cst_47 {dimension_numbers = #tpu.dot_dimension_numbers<[1], [0], [0], [1], [0, 0, 1, 1], [], []>} : vector<512x8xf32>, vector<8x32xf32>, vector<512x32xf32> -> vector<512x32xf32>
    %34 = arith.addf %28, %33 : vector<512x32xf32>
    %c1_48 = arith.constant 1 : index
    %c2_49 = arith.constant 2 : index
    %c0_50 = arith.constant 0 : index
    %c0_51 = arith.constant 0 : index
    %35 = vector.load %arg17[%c1_48, %c2_49, %c0_50, %c0_51] : memref<10x10x8x8xf32, #tpu.memory_space<vmem>>, vector<8x8x8x8xf32>
    %36 = vector.shape_cast %35 : vector<8x8x8x8xf32> to vector<512x8xf32>
    %c5 = arith.constant 5 : index
    %c0_52 = arith.constant 0 : index
    %c0_53 = arith.constant 0 : index
    %37 = vector.load %arg2[%c5, %c0_52, %c0_53] : memref<9x8x32xf32, #tpu.memory_space<vmem>>, vector<1x8x32xf32>
    %38 = vector.shape_cast %37 : vector<1x8x32xf32> to vector<8x32xf32>
    %cst_54 = arith.constant dense<0.000000e+00> : vector<512x32xf32>
    %39 = tpu.matmul %36, %38, %cst_54 {dimension_numbers = #tpu.dot_dimension_numbers<[1], [0], [0], [1], [0, 0, 1, 1], [], []>} : vector<512x8xf32>, vector<8x32xf32>, vector<512x32xf32> -> vector<512x32xf32>
    %40 = arith.addf %34, %39 : vector<512x32xf32>
    %c2_55 = arith.constant 2 : index
    %c0_56 = arith.constant 0 : index
    %c0_57 = arith.constant 0 : index
    %c0_58 = arith.constant 0 : index
    %41 = vector.load %arg17[%c2_55, %c0_56, %c0_57, %c0_58] : memref<10x10x8x8xf32, #tpu.memory_space<vmem>>, vector<8x8x8x8xf32>
    %42 = vector.shape_cast %41 : vector<8x8x8x8xf32> to vector<512x8xf32>
    %c6 = arith.constant 6 : index
    %c0_59 = arith.constant 0 : index
    %c0_60 = arith.constant 0 : index
    %43 = vector.load %arg2[%c6, %c0_59, %c0_60] : memref<9x8x32xf32, #tpu.memory_space<vmem>>, vector<1x8x32xf32>
    %44 = vector.shape_cast %43 : vector<1x8x32xf32> to vector<8x32xf32>
    %cst_61 = arith.constant dense<0.000000e+00> : vector<512x32xf32>
    %45 = tpu.matmul %42, %44, %cst_61 {dimension_numbers = #tpu.dot_dimension_numbers<[1], [0], [0], [1], [0, 0, 1, 1], [], []>} : vector<512x8xf32>, vector<8x32xf32>, vector<512x32xf32> -> vector<512x32xf32>
    %46 = arith.addf %40, %45 : vector<512x32xf32>
    %c2_62 = arith.constant 2 : index
    %c1_63 = arith.constant 1 : index
    %c0_64 = arith.constant 0 : index
    %c0_65 = arith.constant 0 : index
    %47 = vector.load %arg17[%c2_62, %c1_63, %c0_64, %c0_65] : memref<10x10x8x8xf32, #tpu.memory_space<vmem>>, vector<8x8x8x8xf32>
    %48 = vector.shape_cast %47 : vector<8x8x8x8xf32> to vector<512x8xf32>
    %c7 = arith.constant 7 : index
    %c0_66 = arith.constant 0 : index
    %c0_67 = arith.constant 0 : index
    %49 = vector.load %arg2[%c7, %c0_66, %c0_67] : memref<9x8x32xf32, #tpu.memory_space<vmem>>, vector<1x8x32xf32>
    %50 = vector.shape_cast %49 : vector<1x8x32xf32> to vector<8x32xf32>
    %cst_68 = arith.constant dense<0.000000e+00> : vector<512x32xf32>
    %51 = tpu.matmul %48, %50, %cst_68 {dimension_numbers = #tpu.dot_dimension_numbers<[1], [0], [0], [1], [0, 0, 1, 1], [], []>} : vector<512x8xf32>, vector<8x32xf32>, vector<512x32xf32> -> vector<512x32xf32>
    %52 = arith.addf %46, %51 : vector<512x32xf32>
    %c2_69 = arith.constant 2 : index
    %c2_70 = arith.constant 2 : index
    %c0_71 = arith.constant 0 : index
    %c0_72 = arith.constant 0 : index
    %53 = vector.load %arg17[%c2_69, %c2_70, %c0_71, %c0_72] : memref<10x10x8x8xf32, #tpu.memory_space<vmem>>, vector<8x8x8x8xf32>
    %54 = vector.shape_cast %53 : vector<8x8x8x8xf32> to vector<512x8xf32>
    %c8 = arith.constant 8 : index
    %c0_73 = arith.constant 0 : index
    %c0_74 = arith.constant 0 : index
    %55 = vector.load %arg2[%c8, %c0_73, %c0_74] : memref<9x8x32xf32, #tpu.memory_space<vmem>>, vector<1x8x32xf32>
    %56 = vector.shape_cast %55 : vector<1x8x32xf32> to vector<8x32xf32>
    %cst_75 = arith.constant dense<0.000000e+00> : vector<512x32xf32>
    %57 = tpu.matmul %54, %56, %cst_75 {dimension_numbers = #tpu.dot_dimension_numbers<[1], [0], [0], [1], [0, 0, 1, 1], [], []>} : vector<512x8xf32>, vector<8x32xf32>, vector<512x32xf32> -> vector<512x32xf32>
    %58 = arith.addf %52, %57 : vector<512x32xf32>
    %c0_76 = arith.constant 0 : index
    %c0_77 = arith.constant 0 : index
    %59 = vector.load %arg3[%c0_76, %c0_77] : memref<1x32xf32, #tpu.memory_space<vmem>>, vector<1x32xf32>
    %60 = vector.broadcast %59 : vector<1x32xf32> to vector<512x32xf32>
    %61 = arith.addf %58, %60 : vector<512x32xf32>
    %62 = vector.shape_cast %61 : vector<512x32xf32> to vector<8x8x8x32xf32>
    %63 = vector.shape_cast %62 : vector<8x8x8x32xf32> to vector<4x2x8x8x32xf32>
    %64 = vector.extract_strided_slice %63 {offsets = [0, 0, 0, 0, 0], sizes = [4, 1, 8, 8, 32], strides = [1, 1, 1, 1, 1]} : vector<4x2x8x8x32xf32> to vector<4x1x8x8x32xf32>
    %65 = vector.shape_cast %64 : vector<4x1x8x8x32xf32> to vector<4x8x8x32xf32>
    %66 = vector.extract_strided_slice %63 {offsets = [0, 1, 0, 0, 0], sizes = [4, 1, 8, 8, 32], strides = [1, 1, 1, 1, 1]} : vector<4x2x8x8x32xf32> to vector<4x1x8x8x32xf32>
    %67 = vector.shape_cast %66 : vector<4x1x8x8x32xf32> to vector<4x8x8x32xf32>
    %68 = arith.maximumf %65, %67 : vector<4x8x8x32xf32>
    %69 = vector.shape_cast %68 : vector<4x8x8x32xf32> to vector<4x4x2x8x32xf32>
    %70 = vector.extract_strided_slice %69 {offsets = [0, 0, 0, 0, 0], sizes = [4, 4, 1, 8, 32], strides = [1, 1, 1, 1, 1]} : vector<4x4x2x8x32xf32> to vector<4x4x1x8x32xf32>
    %71 = vector.shape_cast %70 : vector<4x4x1x8x32xf32> to vector<4x4x8x32xf32>
    %72 = vector.extract_strided_slice %69 {offsets = [0, 0, 1, 0, 0], sizes = [4, 4, 1, 8, 32], strides = [1, 1, 1, 1, 1]} : vector<4x4x2x8x32xf32> to vector<4x4x1x8x32xf32>
    %73 = vector.shape_cast %72 : vector<4x4x1x8x32xf32> to vector<4x4x8x32xf32>
    %74 = arith.maximumf %71, %73 : vector<4x4x8x32xf32>
    %cst_78 = arith.constant 0.000000e+00 : f32
    %75 = vector.broadcast %cst_78 : f32 to vector<6x6x8x32xf32>
    %c0_79 = arith.constant 0 : index
    %c0_80 = arith.constant 0 : index
    %c0_81 = arith.constant 0 : index
    %c0_82 = arith.constant 0 : index
    %76 = vector.load %arg18[%c0_79, %c0_80, %c0_81, %c0_82] : memref<6x6x8x32xf32, #tpu.memory_space<vmem>>, vector<6x6x8x32xf32>
    tpu.vector_store %arg18[%c0_79, %c0_80, %c0_81, %c0_82], %75 {strides = array<i32>} : memref<6x6x8x32xf32, #tpu.memory_space<vmem>>, vector<6x6x8x32xf32>,
    %c1_83 = arith.constant 1 : index
    %c1_84 = arith.constant 1 : index
    %c0_85 = arith.constant 0 : index
    %c0_86 = arith.constant 0 : index
    %77 = vector.load %arg18[%c1_83, %c1_84, %c0_85, %c0_86] : memref<6x6x8x32xf32, #tpu.memory_space<vmem>>, vector<4x4x8x32xf32>
    tpu.vector_store %arg18[%c1_83, %c1_84, %c0_85, %c0_86], %74 {strides = array<i32>} : memref<6x6x8x32xf32, #tpu.memory_space<vmem>>, vector<4x4x8x32xf32>,
    %cst_87 = arith.constant 0.000000e+00 : f32
    %78 = vector.broadcast %cst_87 : f32 to vector<128x64xf32>
    %c0_88 = arith.constant 0 : index
    %c0_89 = arith.constant 0 : index
    %c0_90 = arith.constant 0 : index
    %c0_91 = arith.constant 0 : index
    %79 = vector.load %arg18[%c0_88, %c0_89, %c0_90, %c0_91] : memref<6x6x8x32xf32, #tpu.memory_space<vmem>>, vector<4x4x8x32xf32>
    %80 = vector.shape_cast %79 : vector<4x4x8x32xf32> to vector<128x32xf32>
    %c0_92 = arith.constant 0 : index
    %c0_93 = arith.constant 0 : index
    %c0_94 = arith.constant 0 : index
    %81 = vector.load %arg4[%c0_92, %c0_93, %c0_94] : memref<9x32x64xf32, #tpu.memory_space<vmem>>, vector<1x32x64xf32>
    %82 = vector.shape_cast %81 : vector<1x32x64xf32> to vector<32x64xf32>
    %cst_95 = arith.constant dense<0.000000e+00> : vector<128x64xf32>
    %83 = tpu.matmul %80, %82, %cst_95 {dimension_numbers = #tpu.dot_dimension_numbers<[1], [0], [0], [1], [0, 0, 1, 1], [], []>} : vector<128x32xf32>, vector<32x64xf32>, vector<128x64xf32> -> vector<128x64xf32>
    %84 = arith.addf %78, %83 : vector<128x64xf32>
    %c0_96 = arith.constant 0 : index
    %c1_97 = arith.constant 1 : index
    %c0_98 = arith.constant 0 : index
    %c0_99 = arith.constant 0 : index
    %85 = vector.load %arg18[%c0_96, %c1_97, %c0_98, %c0_99] : memref<6x6x8x32xf32, #tpu.memory_space<vmem>>, vector<4x4x8x32xf32>
    %86 = vector.shape_cast %85 : vector<4x4x8x32xf32> to vector<128x32xf32>
    %c1_100 = arith.constant 1 : index
    %c0_101 = arith.constant 0 : index
    %c0_102 = arith.constant 0 : index
    %87 = vector.load %arg4[%c1_100, %c0_101, %c0_102] : memref<9x32x64xf32, #tpu.memory_space<vmem>>, vector<1x32x64xf32>
    %88 = vector.shape_cast %87 : vector<1x32x64xf32> to vector<32x64xf32>
    %cst_103 = arith.constant dense<0.000000e+00> : vector<128x64xf32>
    %89 = tpu.matmul %86, %88, %cst_103 {dimension_numbers = #tpu.dot_dimension_numbers<[1], [0], [0], [1], [0, 0, 1, 1], [], []>} : vector<128x32xf32>, vector<32x64xf32>, vector<128x64xf32> -> vector<128x64xf32>
    %90 = arith.addf %84, %89 : vector<128x64xf32>
    %c0_104 = arith.constant 0 : index
    %c2_105 = arith.constant 2 : index
    %c0_106 = arith.constant 0 : index
    %c0_107 = arith.constant 0 : index
    %91 = vector.load %arg18[%c0_104, %c2_105, %c0_106, %c0_107] : memref<6x6x8x32xf32, #tpu.memory_space<vmem>>, vector<4x4x8x32xf32>
    %92 = vector.shape_cast %91 : vector<4x4x8x32xf32> to vector<128x32xf32>
    %c2_108 = arith.constant 2 : index
    %c0_109 = arith.constant 0 : index
    %c0_110 = arith.constant 0 : index
    %93 = vector.load %arg4[%c2_108, %c0_109, %c0_110] : memref<9x32x64xf32, #tpu.memory_space<vmem>>, vector<1x32x64xf32>
    %94 = vector.shape_cast %93 : vector<1x32x64xf32> to vector<32x64xf32>
    %cst_111 = arith.constant dense<0.000000e+00> : vector<128x64xf32>
    %95 = tpu.matmul %92, %94, %cst_111 {dimension_numbers = #tpu.dot_dimension_numbers<[1], [0], [0], [1], [0, 0, 1, 1], [], []>} : vector<128x32xf32>, vector<32x64xf32>, vector<128x64xf32> -> vector<128x64xf32>
    %96 = arith.addf %90, %95 : vector<128x64xf32>
    %c1_112 = arith.constant 1 : index
    %c0_113 = arith.constant 0 : index
    %c0_114 = arith.constant 0 : index
    %c0_115 = arith.constant 0 : index
    %97 = vector.load %arg18[%c1_112, %c0_113, %c0_114, %c0_115] : memref<6x6x8x32xf32, #tpu.memory_space<vmem>>, vector<4x4x8x32xf32>
    %98 = vector.shape_cast %97 : vector<4x4x8x32xf32> to vector<128x32xf32>
    %c3_116 = arith.constant 3 : index
    %c0_117 = arith.constant 0 : index
    %c0_118 = arith.constant 0 : index
    %99 = vector.load %arg4[%c3_116, %c0_117, %c0_118] : memref<9x32x64xf32, #tpu.memory_space<vmem>>, vector<1x32x64xf32>
    %100 = vector.shape_cast %99 : vector<1x32x64xf32> to vector<32x64xf32>
    %cst_119 = arith.constant dense<0.000000e+00> : vector<128x64xf32>
    %101 = tpu.matmul %98, %100, %cst_119 {dimension_numbers = #tpu.dot_dimension_numbers<[1], [0], [0], [1], [0, 0, 1, 1], [], []>} : vector<128x32xf32>, vector<32x64xf32>, vector<128x64xf32> -> vector<128x64xf32>
    %102 = arith.addf %96, %101 : vector<128x64xf32>
    %c1_120 = arith.constant 1 : index
    %c1_121 = arith.constant 1 : index
    %c0_122 = arith.constant 0 : index
    %c0_123 = arith.constant 0 : index
    %103 = vector.load %arg18[%c1_120, %c1_121, %c0_122, %c0_123] : memref<6x6x8x32xf32, #tpu.memory_space<vmem>>, vector<4x4x8x32xf32>
    %104 = vector.shape_cast %103 : vector<4x4x8x32xf32> to vector<128x32xf32>
    %c4_124 = arith.constant 4 : index
    %c0_125 = arith.constant 0 : index
    %c0_126 = arith.constant 0 : index
    %105 = vector.load %arg4[%c4_124, %c0_125, %c0_126] : memref<9x32x64xf32, #tpu.memory_space<vmem>>, vector<1x32x64xf32>
    %106 = vector.shape_cast %105 : vector<1x32x64xf32> to vector<32x64xf32>
    %cst_127 = arith.constant dense<0.000000e+00> : vector<128x64xf32>
    %107 = tpu.matmul %104, %106, %cst_127 {dimension_numbers = #tpu.dot_dimension_numbers<[1], [0], [0], [1], [0, 0, 1, 1], [], []>} : vector<128x32xf32>, vector<32x64xf32>, vector<128x64xf32> -> vector<128x64xf32>
    %108 = arith.addf %102, %107 : vector<128x64xf32>
    %c1_128 = arith.constant 1 : index
    %c2_129 = arith.constant 2 : index
    %c0_130 = arith.constant 0 : index
    %c0_131 = arith.constant 0 : index
    %109 = vector.load %arg18[%c1_128, %c2_129, %c0_130, %c0_131] : memref<6x6x8x32xf32, #tpu.memory_space<vmem>>, vector<4x4x8x32xf32>
    %110 = vector.shape_cast %109 : vector<4x4x8x32xf32> to vector<128x32xf32>
    %c5_132 = arith.constant 5 : index
    %c0_133 = arith.constant 0 : index
    %c0_134 = arith.constant 0 : index
    %111 = vector.load %arg4[%c5_132, %c0_133, %c0_134] : memref<9x32x64xf32, #tpu.memory_space<vmem>>, vector<1x32x64xf32>
    %112 = vector.shape_cast %111 : vector<1x32x64xf32> to vector<32x64xf32>
    %cst_135 = arith.constant dense<0.000000e+00> : vector<128x64xf32>
    %113 = tpu.matmul %110, %112, %cst_135 {dimension_numbers = #tpu.dot_dimension_numbers<[1], [0], [0], [1], [0, 0, 1, 1], [], []>} : vector<128x32xf32>, vector<32x64xf32>, vector<128x64xf32> -> vector<128x64xf32>
    %114 = arith.addf %108, %113 : vector<128x64xf32>
    %c2_136 = arith.constant 2 : index
    %c0_137 = arith.constant 0 : index
    %c0_138 = arith.constant 0 : index
    %c0_139 = arith.constant 0 : index
    %115 = vector.load %arg18[%c2_136, %c0_137, %c0_138, %c0_139] : memref<6x6x8x32xf32, #tpu.memory_space<vmem>>, vector<4x4x8x32xf32>
    %116 = vector.shape_cast %115 : vector<4x4x8x32xf32> to vector<128x32xf32>
    %c6_140 = arith.constant 6 : index
    %c0_141 = arith.constant 0 : index
    %c0_142 = arith.constant 0 : index
    %117 = vector.load %arg4[%c6_140, %c0_141, %c0_142] : memref<9x32x64xf32, #tpu.memory_space<vmem>>, vector<1x32x64xf32>
    %118 = vector.shape_cast %117 : vector<1x32x64xf32> to vector<32x64xf32>
    %cst_143 = arith.constant dense<0.000000e+00> : vector<128x64xf32>
    %119 = tpu.matmul %116, %118, %cst_143 {dimension_numbers = #tpu.dot_dimension_numbers<[1], [0], [0], [1], [0, 0, 1, 1], [], []>} : vector<128x32xf32>, vector<32x64xf32>, vector<128x64xf32> -> vector<128x64xf32>
    %120 = arith.addf %114, %119 : vector<128x64xf32>
    %c2_144 = arith.constant 2 : index
    %c1_145 = arith.constant 1 : index
    %c0_146 = arith.constant 0 : index
    %c0_147 = arith.constant 0 : index
    %121 = vector.load %arg18[%c2_144, %c1_145, %c0_146, %c0_147] : memref<6x6x8x32xf32, #tpu.memory_space<vmem>>, vector<4x4x8x32xf32>
    %122 = vector.shape_cast %121 : vector<4x4x8x32xf32> to vector<128x32xf32>
    %c7_148 = arith.constant 7 : index
    %c0_149 = arith.constant 0 : index
    %c0_150 = arith.constant 0 : index
    %123 = vector.load %arg4[%c7_148, %c0_149, %c0_150] : memref<9x32x64xf32, #tpu.memory_space<vmem>>, vector<1x32x64xf32>
    %124 = vector.shape_cast %123 : vector<1x32x64xf32> to vector<32x64xf32>
    %cst_151 = arith.constant dense<0.000000e+00> : vector<128x64xf32>
    %125 = tpu.matmul %122, %124, %cst_151 {dimension_numbers = #tpu.dot_dimension_numbers<[1], [0], [0], [1], [0, 0, 1, 1], [], []>} : vector<128x32xf32>, vector<32x64xf32>, vector<128x64xf32> -> vector<128x64xf32>
    %126 = arith.addf %120, %125 : vector<128x64xf32>
    %c2_152 = arith.constant 2 : index
    %c2_153 = arith.constant 2 : index
    %c0_154 = arith.constant 0 : index
    %c0_155 = arith.constant 0 : index
    %127 = vector.load %arg18[%c2_152, %c2_153, %c0_154, %c0_155] : memref<6x6x8x32xf32, #tpu.memory_space<vmem>>, vector<4x4x8x32xf32>
    %128 = vector.shape_cast %127 : vector<4x4x8x32xf32> to vector<128x32xf32>
    %c8_156 = arith.constant 8 : index
    %c0_157 = arith.constant 0 : index
    %c0_158 = arith.constant 0 : index
    %129 = vector.load %arg4[%c8_156, %c0_157, %c0_158] : memref<9x32x64xf32, #tpu.memory_space<vmem>>, vector<1x32x64xf32>
    %130 = vector.shape_cast %129 : vector<1x32x64xf32> to vector<32x64xf32>
    %cst_159 = arith.constant dense<0.000000e+00> : vector<128x64xf32>
    %131 = tpu.matmul %128, %130, %cst_159 {dimension_numbers = #tpu.dot_dimension_numbers<[1], [0], [0], [1], [0, 0, 1, 1], [], []>} : vector<128x32xf32>, vector<32x64xf32>, vector<128x64xf32> -> vector<128x64xf32>
    %132 = arith.addf %126, %131 : vector<128x64xf32>
    %c0_160 = arith.constant 0 : index
    %c0_161 = arith.constant 0 : index
    %133 = vector.load %arg5[%c0_160, %c0_161] : memref<1x64xf32, #tpu.memory_space<vmem>>, vector<1x64xf32>
    %134 = vector.broadcast %133 : vector<1x64xf32> to vector<128x64xf32>
    %135 = arith.addf %132, %134 : vector<128x64xf32>
    %136 = vector.shape_cast %135 : vector<128x64xf32> to vector<4x4x8x64xf32>
    %137 = vector.shape_cast %136 : vector<4x4x8x64xf32> to vector<2x2x4x8x64xf32>
    %138 = vector.extract_strided_slice %137 {offsets = [0, 0, 0, 0, 0], sizes = [2, 1, 4, 8, 64], strides = [1, 1, 1, 1, 1]} : vector<2x2x4x8x64xf32> to vector<2x1x4x8x64xf32>
    %139 = vector.shape_cast %138 : vector<2x1x4x8x64xf32> to vector<2x4x8x64xf32>
    %140 = vector.extract_strided_slice %137 {offsets = [0, 1, 0, 0, 0], sizes = [2, 1, 4, 8, 64], strides = [1, 1, 1, 1, 1]} : vector<2x2x4x8x64xf32> to vector<2x1x4x8x64xf32>
    %141 = vector.shape_cast %140 : vector<2x1x4x8x64xf32> to vector<2x4x8x64xf32>
    %142 = arith.maximumf %139, %141 : vector<2x4x8x64xf32>
    %143 = vector.shape_cast %142 : vector<2x4x8x64xf32> to vector<2x2x2x8x64xf32>
    %144 = vector.extract_strided_slice %143 {offsets = [0, 0, 0, 0, 0], sizes = [2, 2, 1, 8, 64], strides = [1, 1, 1, 1, 1]} : vector<2x2x2x8x64xf32> to vector<2x2x1x8x64xf32>
    %145 = vector.shape_cast %144 : vector<2x2x1x8x64xf32> to vector<2x2x8x64xf32>
    %146 = vector.extract_strided_slice %143 {offsets = [0, 0, 1, 0, 0], sizes = [2, 2, 1, 8, 64], strides = [1, 1, 1, 1, 1]} : vector<2x2x2x8x64xf32> to vector<2x2x1x8x64xf32>
    %147 = vector.shape_cast %146 : vector<2x2x1x8x64xf32> to vector<2x2x8x64xf32>
    %148 = arith.maximumf %145, %147 : vector<2x2x8x64xf32>
    %cst_162 = arith.constant 0.000000e+00 : f32
    %149 = vector.broadcast %cst_162 : f32 to vector<4x4x8x64xf32>
    %c0_163 = arith.constant 0 : index
    %c0_164 = arith.constant 0 : index
    %c0_165 = arith.constant 0 : index
    %c0_166 = arith.constant 0 : index
    %150 = vector.load %arg19[%c0_163, %c0_164, %c0_165, %c0_166] : memref<4x4x8x64xf32, #tpu.memory_space<vmem>>, vector<4x4x8x64xf32>
    tpu.vector_store %arg19[%c0_163, %c0_164, %c0_165, %c0_166], %149 {strides = array<i32>} : memref<4x4x8x64xf32, #tpu.memory_space<vmem>>, vector<4x4x8x64xf32>,
    %c1_167 = arith.constant 1 : index
    %c1_168 = arith.constant 1 : index
    %c0_169 = arith.constant 0 : index
    %c0_170 = arith.constant 0 : index
    %151 = vector.load %arg19[%c1_167, %c1_168, %c0_169, %c0_170] : memref<4x4x8x64xf32, #tpu.memory_space<vmem>>, vector<2x2x8x64xf32>
    tpu.vector_store %arg19[%c1_167, %c1_168, %c0_169, %c0_170], %148 {strides = array<i32>} : memref<4x4x8x64xf32, #tpu.memory_space<vmem>>, vector<2x2x8x64xf32>,
    %cst_171 = arith.constant 0.000000e+00 : f32
    %152 = vector.broadcast %cst_171 : f32 to vector<32x128xf32>
    %c0_172 = arith.constant 0 : index
    %c0_173 = arith.constant 0 : index
    %c0_174 = arith.constant 0 : index
    %c0_175 = arith.constant 0 : index
    %153 = vector.load %arg19[%c0_172, %c0_173, %c0_174, %c0_175] : memref<4x4x8x64xf32, #tpu.memory_space<vmem>>, vector<2x2x8x64xf32>
    %154 = vector.shape_cast %153 : vector<2x2x8x64xf32> to vector<32x64xf32>
    %c0_176 = arith.constant 0 : index
    %c0_177 = arith.constant 0 : index
    %c0_178 = arith.constant 0 : index
    %155 = vector.load %arg6[%c0_176, %c0_177, %c0_178] : memref<9x64x128xf32, #tpu.memory_space<vmem>>, vector<1x64x128xf32>
    %156 = vector.shape_cast %155 : vector<1x64x128xf32> to vector<64x128xf32>
    %cst_179 = arith.constant dense<0.000000e+00> : vector<32x128xf32>
    %157 = tpu.matmul %154, %156, %cst_179 {dimension_numbers = #tpu.dot_dimension_numbers<[1], [0], [0], [1], [0, 0, 1, 1], [], []>} : vector<32x64xf32>, vector<64x128xf32>, vector<32x128xf32> -> vector<32x128xf32>
    %158 = arith.addf %152, %157 : vector<32x128xf32>
    %c0_180 = arith.constant 0 : index
    %c1_181 = arith.constant 1 : index
    %c0_182 = arith.constant 0 : index
    %c0_183 = arith.constant 0 : index
    %159 = vector.load %arg19[%c0_180, %c1_181, %c0_182, %c0_183] : memref<4x4x8x64xf32, #tpu.memory_space<vmem>>, vector<2x2x8x64xf32>
    %160 = vector.shape_cast %159 : vector<2x2x8x64xf32> to vector<32x64xf32>
    %c1_184 = arith.constant 1 : index
    %c0_185 = arith.constant 0 : index
    %c0_186 = arith.constant 0 : index
    %161 = vector.load %arg6[%c1_184, %c0_185, %c0_186] : memref<9x64x128xf32, #tpu.memory_space<vmem>>, vector<1x64x128xf32>
    %162 = vector.shape_cast %161 : vector<1x64x128xf32> to vector<64x128xf32>
    %cst_187 = arith.constant dense<0.000000e+00> : vector<32x128xf32>
    %163 = tpu.matmul %160, %162, %cst_187 {dimension_numbers = #tpu.dot_dimension_numbers<[1], [0], [0], [1], [0, 0, 1, 1], [], []>} : vector<32x64xf32>, vector<64x128xf32>, vector<32x128xf32> -> vector<32x128xf32>
    %164 = arith.addf %158, %163 : vector<32x128xf32>
    %c0_188 = arith.constant 0 : index
    %c2_189 = arith.constant 2 : index
    %c0_190 = arith.constant 0 : index
    %c0_191 = arith.constant 0 : index
    %165 = vector.load %arg19[%c0_188, %c2_189, %c0_190, %c0_191] : memref<4x4x8x64xf32, #tpu.memory_space<vmem>>, vector<2x2x8x64xf32>
    %166 = vector.shape_cast %165 : vector<2x2x8x64xf32> to vector<32x64xf32>
    %c2_192 = arith.constant 2 : index
    %c0_193 = arith.constant 0 : index
    %c0_194 = arith.constant 0 : index
    %167 = vector.load %arg6[%c2_192, %c0_193, %c0_194] : memref<9x64x128xf32, #tpu.memory_space<vmem>>, vector<1x64x128xf32>
    %168 = vector.shape_cast %167 : vector<1x64x128xf32> to vector<64x128xf32>
    %cst_195 = arith.constant dense<0.000000e+00> : vector<32x128xf32>
    %169 = tpu.matmul %166, %168, %cst_195 {dimension_numbers = #tpu.dot_dimension_numbers<[1], [0], [0], [1], [0, 0, 1, 1], [], []>} : vector<32x64xf32>, vector<64x128xf32>, vector<32x128xf32> -> vector<32x128xf32>
    %170 = arith.addf %164, %169 : vector<32x128xf32>
    %c1_196 = arith.constant 1 : index
    %c0_197 = arith.constant 0 : index
    %c0_198 = arith.constant 0 : index
    %c0_199 = arith.constant 0 : index
    %171 = vector.load %arg19[%c1_196, %c0_197, %c0_198, %c0_199] : memref<4x4x8x64xf32, #tpu.memory_space<vmem>>, vector<2x2x8x64xf32>
    %172 = vector.shape_cast %171 : vector<2x2x8x64xf32> to vector<32x64xf32>
    %c3_200 = arith.constant 3 : index
    %c0_201 = arith.constant 0 : index
    %c0_202 = arith.constant 0 : index
    %173 = vector.load %arg6[%c3_200, %c0_201, %c0_202] : memref<9x64x128xf32, #tpu.memory_space<vmem>>, vector<1x64x128xf32>
    %174 = vector.shape_cast %173 : vector<1x64x128xf32> to vector<64x128xf32>
    %cst_203 = arith.constant dense<0.000000e+00> : vector<32x128xf32>
    %175 = tpu.matmul %172, %174, %cst_203 {dimension_numbers = #tpu.dot_dimension_numbers<[1], [0], [0], [1], [0, 0, 1, 1], [], []>} : vector<32x64xf32>, vector<64x128xf32>, vector<32x128xf32> -> vector<32x128xf32>
    %176 = arith.addf %170, %175 : vector<32x128xf32>
    %c1_204 = arith.constant 1 : index
    %c1_205 = arith.constant 1 : index
    %c0_206 = arith.constant 0 : index
    %c0_207 = arith.constant 0 : index
    %177 = vector.load %arg19[%c1_204, %c1_205, %c0_206, %c0_207] : memref<4x4x8x64xf32, #tpu.memory_space<vmem>>, vector<2x2x8x64xf32>
    %178 = vector.shape_cast %177 : vector<2x2x8x64xf32> to vector<32x64xf32>
    %c4_208 = arith.constant 4 : index
    %c0_209 = arith.constant 0 : index
    %c0_210 = arith.constant 0 : index
    %179 = vector.load %arg6[%c4_208, %c0_209, %c0_210] : memref<9x64x128xf32, #tpu.memory_space<vmem>>, vector<1x64x128xf32>
    %180 = vector.shape_cast %179 : vector<1x64x128xf32> to vector<64x128xf32>
    %cst_211 = arith.constant dense<0.000000e+00> : vector<32x128xf32>
    %181 = tpu.matmul %178, %180, %cst_211 {dimension_numbers = #tpu.dot_dimension_numbers<[1], [0], [0], [1], [0, 0, 1, 1], [], []>} : vector<32x64xf32>, vector<64x128xf32>, vector<32x128xf32> -> vector<32x128xf32>
    %182 = arith.addf %176, %181 : vector<32x128xf32>
    %c1_212 = arith.constant 1 : index
    %c2_213 = arith.constant 2 : index
    %c0_214 = arith.constant 0 : index
    %c0_215 = arith.constant 0 : index
    %183 = vector.load %arg19[%c1_212, %c2_213, %c0_214, %c0_215] : memref<4x4x8x64xf32, #tpu.memory_space<vmem>>, vector<2x2x8x64xf32>
    %184 = vector.shape_cast %183 : vector<2x2x8x64xf32> to vector<32x64xf32>
    %c5_216 = arith.constant 5 : index
    %c0_217 = arith.constant 0 : index
    %c0_218 = arith.constant 0 : index
    %185 = vector.load %arg6[%c5_216, %c0_217, %c0_218] : memref<9x64x128xf32, #tpu.memory_space<vmem>>, vector<1x64x128xf32>
    %186 = vector.shape_cast %185 : vector<1x64x128xf32> to vector<64x128xf32>
    %cst_219 = arith.constant dense<0.000000e+00> : vector<32x128xf32>
    %187 = tpu.matmul %184, %186, %cst_219 {dimension_numbers = #tpu.dot_dimension_numbers<[1], [0], [0], [1], [0, 0, 1, 1], [], []>} : vector<32x64xf32>, vector<64x128xf32>, vector<32x128xf32> -> vector<32x128xf32>
    %188 = arith.addf %182, %187 : vector<32x128xf32>
    %c2_220 = arith.constant 2 : index
    %c0_221 = arith.constant 0 : index
    %c0_222 = arith.constant 0 : index
    %c0_223 = arith.constant 0 : index
    %189 = vector.load %arg19[%c2_220, %c0_221, %c0_222, %c0_223] : memref<4x4x8x64xf32, #tpu.memory_space<vmem>>, vector<2x2x8x64xf32>
    %190 = vector.shape_cast %189 : vector<2x2x8x64xf32> to vector<32x64xf32>
    %c6_224 = arith.constant 6 : index
    %c0_225 = arith.constant 0 : index
    %c0_226 = arith.constant 0 : index
    %191 = vector.load %arg6[%c6_224, %c0_225, %c0_226] : memref<9x64x128xf32, #tpu.memory_space<vmem>>, vector<1x64x128xf32>
    %192 = vector.shape_cast %191 : vector<1x64x128xf32> to vector<64x128xf32>
    %cst_227 = arith.constant dense<0.000000e+00> : vector<32x128xf32>
    %193 = tpu.matmul %190, %192, %cst_227 {dimension_numbers = #tpu.dot_dimension_numbers<[1], [0], [0], [1], [0, 0, 1, 1], [], []>} : vector<32x64xf32>, vector<64x128xf32>, vector<32x128xf32> -> vector<32x128xf32>
    %194 = arith.addf %188, %193 : vector<32x128xf32>
    %c2_228 = arith.constant 2 : index
    %c1_229 = arith.constant 1 : index
    %c0_230 = arith.constant 0 : index
    %c0_231 = arith.constant 0 : index
    %195 = vector.load %arg19[%c2_228, %c1_229, %c0_230, %c0_231] : memref<4x4x8x64xf32, #tpu.memory_space<vmem>>, vector<2x2x8x64xf32>
    %196 = vector.shape_cast %195 : vector<2x2x8x64xf32> to vector<32x64xf32>
    %c7_232 = arith.constant 7 : index
    %c0_233 = arith.constant 0 : index
    %c0_234 = arith.constant 0 : index
    %197 = vector.load %arg6[%c7_232, %c0_233, %c0_234] : memref<9x64x128xf32, #tpu.memory_space<vmem>>, vector<1x64x128xf32>
    %198 = vector.shape_cast %197 : vector<1x64x128xf32> to vector<64x128xf32>
    %cst_235 = arith.constant dense<0.000000e+00> : vector<32x128xf32>
    %199 = tpu.matmul %196, %198, %cst_235 {dimension_numbers = #tpu.dot_dimension_numbers<[1], [0], [0], [1], [0, 0, 1, 1], [], []>} : vector<32x64xf32>, vector<64x128xf32>, vector<32x128xf32> -> vector<32x128xf32>
    %200 = arith.addf %194, %199 : vector<32x128xf32>
    %c2_236 = arith.constant 2 : index
    %c2_237 = arith.constant 2 : index
    %c0_238 = arith.constant 0 : index
    %c0_239 = arith.constant 0 : index
    %201 = vector.load %arg19[%c2_236, %c2_237, %c0_238, %c0_239] : memref<4x4x8x64xf32, #tpu.memory_space<vmem>>, vector<2x2x8x64xf32>
    %202 = vector.shape_cast %201 : vector<2x2x8x64xf32> to vector<32x64xf32>
    %c8_240 = arith.constant 8 : index
    %c0_241 = arith.constant 0 : index
    %c0_242 = arith.constant 0 : index
    %203 = vector.load %arg6[%c8_240, %c0_241, %c0_242] : memref<9x64x128xf32, #tpu.memory_space<vmem>>, vector<1x64x128xf32>
    %204 = vector.shape_cast %203 : vector<1x64x128xf32> to vector<64x128xf32>
    %cst_243 = arith.constant dense<0.000000e+00> : vector<32x128xf32>
    %205 = tpu.matmul %202, %204, %cst_243 {dimension_numbers = #tpu.dot_dimension_numbers<[1], [0], [0], [1], [0, 0, 1, 1], [], []>} : vector<32x64xf32>, vector<64x128xf32>, vector<32x128xf32> -> vector<32x128xf32>
    %206 = arith.addf %200, %205 : vector<32x128xf32>
    %c0_244 = arith.constant 0 : index
    %c0_245 = arith.constant 0 : index
    %207 = vector.load %arg7[%c0_244, %c0_245] : memref<1x128xf32, #tpu.memory_space<vmem>>, vector<1x128xf32>
    %208 = vector.broadcast %207 : vector<1x128xf32> to vector<32x128xf32>
    %209 = arith.addf %206, %208 : vector<32x128xf32>
    %210 = vector.shape_cast %209 : vector<32x128xf32> to vector<2x2x8x128xf32>
    %211 = math.tanh %210 : vector<2x2x8x128xf32>
    %212 = vector.shape_cast %211 : vector<2x2x8x128xf32> to vector<1x2x2x8x128xf32>
    %213 = vector.extract_strided_slice %212 {offsets = [0, 0, 0, 0, 0], sizes = [1, 1, 2, 8, 128], strides = [1, 1, 1, 1, 1]} : vector<1x2x2x8x128xf32> to vector<1x1x2x8x128xf32>
    %214 = vector.shape_cast %213 : vector<1x1x2x8x128xf32> to vector<1x2x8x128xf32>
    %215 = vector.extract_strided_slice %212 {offsets = [0, 1, 0, 0, 0], sizes = [1, 1, 2, 8, 128], strides = [1, 1, 1, 1, 1]} : vector<1x2x2x8x128xf32> to vector<1x1x2x8x128xf32>
    %216 = vector.shape_cast %215 : vector<1x1x2x8x128xf32> to vector<1x2x8x128xf32>
    %217 = arith.maximumf %214, %216 : vector<1x2x8x128xf32>
    %218 = vector.shape_cast %217 : vector<1x2x8x128xf32> to vector<1x1x2x8x128xf32>
    %219 = vector.extract_strided_slice %218 {offsets = [0, 0, 0, 0, 0], sizes = [1, 1, 1, 8, 128], strides = [1, 1, 1, 1, 1]} : vector<1x1x2x8x128xf32> to vector<1x1x1x8x128xf32>
    %220 = vector.shape_cast %219 : vector<1x1x1x8x128xf32> to vector<1x1x8x128xf32>
    %221 = vector.extract_strided_slice %218 {offsets = [0, 0, 1, 0, 0], sizes = [1, 1, 1, 8, 128], strides = [1, 1, 1, 1, 1]} : vector<1x1x2x8x128xf32> to vector<1x1x1x8x128xf32>
    %222 = vector.shape_cast %221 : vector<1x1x1x8x128xf32> to vector<1x1x8x128xf32>
    %223 = arith.maximumf %220, %222 : vector<1x1x8x128xf32>
    %224 = vector.shape_cast %223 : vector<1x1x8x128xf32> to vector<8x128xf32>
    %c0_246 = arith.constant 0 : index
    %c0_247 = arith.constant 0 : index
    %225 = vector.load %arg8[%c0_246, %c0_247] : memref<128x128xf32, #tpu.memory_space<vmem>>, vector<128x128xf32>
    %cst_248 = arith.constant dense<0.000000e+00> : vector<8x128xf32>
    %226 = tpu.matmul %224, %225, %cst_248 {dimension_numbers = #tpu.dot_dimension_numbers<[1], [0], [0], [1], [0, 0, 1, 1], [], []>} : vector<8x128xf32>, vector<128x128xf32>, vector<8x128xf32> -> vector<8x128xf32>
    %c0_249 = arith.constant 0 : index
    %c0_250 = arith.constant 0 : index
    %227 = vector.load %arg9[%c0_249, %c0_250] : memref<1x128xf32, #tpu.memory_space<vmem>>, vector<1x128xf32>
    %228 = vector.broadcast %227 : vector<1x128xf32> to vector<8x128xf32>
    %229 = arith.addf %226, %228 : vector<8x128xf32>
    %cst_251 = arith.constant 0.000000e+00 : f32
    %230 = vector.broadcast %cst_251 : f32 to vector<8x128xf32>
    %231 = arith.cmpf ogt, %229, %230 : vector<8x128xf32>
    %cst_252 = arith.constant 1.000000e-01 : f32
    %232 = vector.broadcast %cst_252 : f32 to vector<8x128xf32>
    %233 = arith.mulf %232, %229 : vector<8x128xf32>
    %234 = arith.select %231, %229, %233 : vector<8x128xi1>, vector<8x128xf32>
    %c0_253 = arith.constant 0 : index
    %c0_254 = arith.constant 0 : index
    %235 = vector.load %arg10[%c0_253, %c0_254] : memref<128x128xf32, #tpu.memory_space<vmem>>, vector<128x128xf32>
    %cst_255 = arith.constant dense<0.000000e+00> : vector<8x128xf32>
    %236 = tpu.matmul %234, %235, %cst_255 {dimension_numbers = #tpu.dot_dimension_numbers<[1], [0], [0], [1], [0, 0, 1, 1], [], []>} : vector<8x128xf32>, vector<128x128xf32>, vector<8x128xf32> -> vector<8x128xf32>
    %c0_256 = arith.constant 0 : index
    %c0_257 = arith.constant 0 : index
    %237 = vector.load %arg11[%c0_256, %c0_257] : memref<1x128xf32, #tpu.memory_space<vmem>>, vector<1x128xf32>
    %238 = vector.broadcast %237 : vector<1x128xf32> to vector<8x128xf32>
    %239 = arith.addf %236, %238 : vector<8x128xf32>
    %cst_258 = arith.constant 0.000000e+00 : f32
    %240 = vector.broadcast %cst_258 : f32 to vector<8x128xf32>
    %241 = arith.cmpf ogt, %239, %240 : vector<8x128xf32>
    %cst_259 = arith.constant 1.000000e-01 : f32
    %242 = vector.broadcast %cst_259 : f32 to vector<8x128xf32>
    %243 = arith.mulf %242, %239 : vector<8x128xf32>
    %244 = arith.select %241, %239, %243 : vector<8x128xi1>, vector<8x128xf32>
    %c0_260 = arith.constant 0 : index
    %c0_261 = arith.constant 0 : index
    %245 = vector.load %arg12[%c0_260, %c0_261] : memref<128x128xf32, #tpu.memory_space<vmem>>, vector<128x128xf32>
    %cst_262 = arith.constant dense<0.000000e+00> : vector<8x128xf32>
    %246 = tpu.matmul %244, %245, %cst_262 {dimension_numbers = #tpu.dot_dimension_numbers<[1], [0], [0], [1], [0, 0, 1, 1], [], []>} : vector<8x128xf32>, vector<128x128xf32>, vector<8x128xf32> -> vector<8x128xf32>
    %c0_263 = arith.constant 0 : index
    %c0_264 = arith.constant 0 : index
    %247 = vector.load %arg13[%c0_263, %c0_264] : memref<1x128xf32, #tpu.memory_space<vmem>>, vector<1x128xf32>
    %248 = vector.broadcast %247 : vector<1x128xf32> to vector<8x128xf32>
    %249 = arith.addf %246, %248 : vector<8x128xf32>
    %cst_265 = arith.constant 0.000000e+00 : f32
    %250 = vector.broadcast %cst_265 : f32 to vector<8x128xf32>
    %251 = arith.maximumf %249, %250 : vector<8x128xf32>
    %c0_266 = arith.constant 0 : index
    %c0_267 = arith.constant 0 : index
    %252 = vector.load %arg14[%c0_266, %c0_267] : memref<128x128xf32, #tpu.memory_space<vmem>>, vector<128x128xf32>
    %cst_268 = arith.constant dense<0.000000e+00> : vector<8x128xf32>
    %253 = tpu.matmul %251, %252, %cst_268 {dimension_numbers = #tpu.dot_dimension_numbers<[1], [0], [0], [1], [0, 0, 1, 1], [], []>} : vector<8x128xf32>, vector<128x128xf32>, vector<8x128xf32> -> vector<8x128xf32>
    %c0_269 = arith.constant 0 : index
    %c0_270 = arith.constant 0 : index
    %254 = vector.load %arg15[%c0_269, %c0_270] : memref<1x128xf32, #tpu.memory_space<vmem>>, vector<1x128xf32>
    %255 = vector.broadcast %254 : vector<1x128xf32> to vector<8x128xf32>
    %256 = arith.addf %253, %255 : vector<8x128xf32>
    %c0_271 = arith.constant 0 : index
    %c0_272 = arith.constant 0 : index
    %257 = vector.load %arg16[%c0_271, %c0_272] : memref<8x128xf32, #tpu.memory_space<vmem>>, vector<8x128xf32>
    tpu.vector_store %arg16[%c0_271, %c0_272], %256 {strides = array<i32>} : memref<8x128xf32, #tpu.memory_space<vmem>>, vector<8x128xf32>,
    return
  }
  func.func @transform_0(%arg0: i32) -> (i32, i32, i32, i32) {
    %c0_i32 = arith.constant 0 : i32
    %c0_i32_0 = arith.constant 0 : i32
    %c0_i32_1 = arith.constant 0 : i32
    %c0_i32_2 = arith.constant 0 : i32
    return %c0_i32, %c0_i32_0, %arg0, %c0_i32_1 : i32, i32, i32, i32
  }
  func.func @transform_1(%arg0: i32) -> (i32, i32, i32) {
    %c0_i32 = arith.constant 0 : i32
    %c0_i32_0 = arith.constant 0 : i32
    %c0_i32_1 = arith.constant 0 : i32
    %c0_i32_2 = arith.constant 0 : i32
    return %c0_i32, %c0_i32_0, %c0_i32_1 : i32, i32, i32
  }
  func.func @transform_2(%arg0: i32) -> (i32, i32) {
    %c0_i32 = arith.constant 0 : i32
    %c0_i32_0 = arith.constant 0 : i32
    %c0_i32_1 = arith.constant 0 : i32
    return %c0_i32, %c0_i32_0 : i32, i32
  }
  func.func @transform_3(%arg0: i32) -> (i32, i32, i32) {
    %c0_i32 = arith.constant 0 : i32
    %c0_i32_0 = arith.constant 0 : i32
    %c0_i32_1 = arith.constant 0 : i32
    %c0_i32_2 = arith.constant 0 : i32
    return %c0_i32, %c0_i32_0, %c0_i32_1 : i32, i32, i32
  }
  func.func @transform_4(%arg0: i32) -> (i32, i32) {
    %c0_i32 = arith.constant 0 : i32
    %c0_i32_0 = arith.constant 0 : i32
    %c0_i32_1 = arith.constant 0 : i32
    return %c0_i32, %c0_i32_0 : i32, i32
  }
  func.func @transform_5(%arg0: i32) -> (i32, i32, i32) {
    %c0_i32 = arith.constant 0 : i32
    %c0_i32_0 = arith.constant 0 : i32
    %c0_i32_1 = arith.constant 0 : i32
    %c0_i32_2 = arith.constant 0 : i32
    return %c0_i32, %c0_i32_0, %c0_i32_1 : i32, i32, i32
  }
  func.func @transform_6(%arg0: i32) -> (i32, i32) {
    %c0_i32 = arith.constant 0 : i32
    %c0_i32_0 = arith.constant 0 : i32
    %c0_i32_1 = arith.constant 0 : i32
    return %c0_i32, %c0_i32_0 : i32, i32
  }
  func.func @transform_7(%arg0: i32) -> (i32, i32) {
    %c0_i32 = arith.constant 0 : i32
    %c0_i32_0 = arith.constant 0 : i32
    %c0_i32_1 = arith.constant 0 : i32
    return %c0_i32, %c0_i32_0 : i32, i32
  }
  func.func @transform_8(%arg0: i32) -> (i32, i32) {
    %c0_i32 = arith.constant 0 : i32
    %c0_i32_0 = arith.constant 0 : i32
    %c0_i32_1 = arith.constant 0 : i32
    return %c0_i32, %c0_i32_0 : i32, i32
  }
  func.func @transform_9(%arg0: i32) -> (i32, i32) {
    %c0_i32 = arith.constant 0 : i32
    %c0_i32_0 = arith.constant 0 : i32
    %c0_i32_1 = arith.constant 0 : i32
    return %c0_i32, %c0_i32_0 : i32, i32
  }
  func.func @transform_10(%arg0: i32) -> (i32, i32) {
    %c0_i32 = arith.constant 0 : i32
    %c0_i32_0 = arith.constant 0 : i32
    %c0_i32_1 = arith.constant 0 : i32
    return %c0_i32, %c0_i32_0 : i32, i32
  }
  func.func @transform_11(%arg0: i32) -> (i32, i32) {
    %c0_i32 = arith.constant 0 : i32
    %c0_i32_0 = arith.constant 0 : i32
    %c0_i32_1 = arith.constant 0 : i32
    return %c0_i32, %c0_i32_0 : i32, i32
  }
  func.func @transform_12(%arg0: i32) -> (i32, i32) {
    %c0_i32 = arith.constant 0 : i32
    %c0_i32_0 = arith.constant 0 : i32
    %c0_i32_1 = arith.constant 0 : i32
    return %c0_i32, %c0_i32_0 : i32, i32
  }
  func.func @transform_13(%arg0: i32) -> (i32, i32) {
    %c0_i32 = arith.constant 0 : i32
    %c0_i32_0 = arith.constant 0 : i32
    %c0_i32_1 = arith.constant 0 : i32
    return %c0_i32, %c0_i32_0 : i32, i32
  }
  func.func @transform_14(%arg0: i32) -> (i32, i32) {
    %c0_i32 = arith.constant 0 : i32
    %c0_i32_0 = arith.constant 0 : i32
    %c0_i32_1 = arith.constant 0 : i32
    return %c0_i32, %c0_i32_0 : i32, i32
  }
  func.func @transform_15(%arg0: i32) -> (i32, i32) {
    %c0_i32 = arith.constant 0 : i32
    %c0_i32_0 = arith.constant 0 : i32
    return %arg0, %c0_i32 : i32, i32
  }
}

</mosaic_0001>

<bundles_post_ra>
// kernel: evaluator_forward.1
= control target key start
LH: loop header
LB: loop body
LE: loop exit
PB: predicated region body
PF: predicated region fallthrough
CT: control target
= control target key end

     0   :  { %20 = vsyncpa [#allocation6], 0  ;;  %s17972_s0 = inlined_call_operand.vmem [shape: f32[8,8,8,8], index: 0, kind: input, shape index: {}]   ;;  %s17973_s1 = inlined_call_operand.hbm [shape: f32[9,8,32], index: 1, kind: input, shape index: {}]   ;;  %s17974_s2 = inlined_call_operand.vmem [shape: f32[1,32], index: 2, kind: input, shape index: {}]   ;;  %s17975_s3 = inlined_call_operand.vmem [shape: f32[9,32,64], index: 3, kind: input, shape index: {}]   ;;  %s17976_s4 = inlined_call_operand.vmem [shape: f32[1,64], index: 4, kind: input, shape index: {}]   ;;  %s17977_s5 = inlined_call_operand.vmem [shape: f32[9,64,128], index: 5, kind: input, shape index: {}]   ;;  %s17978_s6 = inlined_call_operand.vmem [shape: f32[1,128], index: 6, kind: input, shape index: {}]   ;;  %s17979_s7 = inlined_call_operand.hbm [shape: f32[128,128], index: 7, kind: input, shape index: {}]   ;;  %s17980_s8 = inlined_call_operand.vmem [shape: f32[1,128], index: 8, kind: input, shape index: {}]   ;;  %s17981_s9 = inlined_call_operand.hbm [shape: f32[128,128], index: 9, kind: input, shape index: {}]   ;;  %s17982_s10 = inlined_call_operand.vmem [shape: f32[1,128], index: 10, kind: input, shape index: {}]   ;;  %s17983_s11 = inlined_call_operand.hbm [shape: f32[128,128], index: 11, kind: input, shape index: {}]   ;;  %s17984_s12 = inlined_call_operand.vmem [shape: f32[1,128], index: 12, kind: input, shape index: {}]   ;;  %s17985_s13 = inlined_call_operand.hbm [shape: f32[128,128], index: 13, kind: input, shape index: {}]   ;;  %s17986_s14 = inlined_call_operand.vmem [shape: f32[1,128], index: 14, kind: input, shape index: {}]   ;;  %s17987_s15 = inlined_call_operand.vmem [shape: f32[8,128], index: 15, kind: output, shape index: {}]  }
   0x1   :  { %21 = vsyncpa [#allocation8], 0 }
   0x2   :  { %22 = vsyncpa [#allocation11], 0  ;;  %s14721_s18 = smov [#allocation7]   ;;  %s14722_s20 = smov [#allocation10]  }
   0x3   :  { %s52_s19 = sshll.u32 %s14721_s18, 4  ;;  %s80_s21 = sshll.u32 %s14722_s20, 4  ;;  %s53_s19 = int_to_ptr.vmem [resolvable:$true] %s52_s19  ;;  %s14811_s21 = int_to_ptr.vmem [resolvable:$true] %s80_s21 }
   0x4   :  { %s14605_s24 = scalar_lea.hbm %s17979_s7, 2048 }
   0x5   :  { %p14606_p0 = scmp.ne.s32.totalorder %s17979_s7, %s14605_s24  ;;  %p14609_p1 = scmp.lt.u32.totalorder %s14605_s24, %s17979_s7 }
   0x7   :  { %p14611_p2 = pnand %p14609_p1, %p14606_p0 }
   0x9   :  { %14614 = shalt.err (!%p14611_p2)
}
   0xa   :  { %s14615_s29 = scalar_lea.vmem %s53_s19, 2048  ;;  %p14620_p4 = scmp.lt.s32.totalorder %s53_s19, %s53_s19 }
   0xb   :  { %p14616_p3 = scmp.ne.s32.totalorder %s53_s19, %s14615_s29  ;;  %p14621_p5 = scmp.lt.s32.totalorder %s14615_s29, %s14615_s29 }
   0xd   :  { %p14622_p6 = por %p14621_p5, %p14620_p4 }
   0xf   :  { %p14623_p7 = pnand %p14622_p6, %p14616_p3 }
  0x11   :  { %14626 = shalt.err (!%p14623_p7)
}
  0x12   :  { %s14723_s30 = smov 128   ;;  %s14724_s16 = smov 8  }
  0x13   :  { %58 = dma.hbm_to_vmem [thread:$0]  %s17979_s7, 2048, %s53_s19, [#allocation8], %s14723_s30, %s14723_s30, %s14724_s16  }
  0x14   :  { %s14627_s23 = scalar_lea.hbm %s17983_s11, 2048 }
  0x15   :  { %p14628_p8 = scmp.ne.s32.totalorder %s17983_s11, %s14627_s23  ;;  %p14631_p9 = scmp.lt.u32.totalorder %s14627_s23, %s17983_s11 }
  0x17   :  { %p14633_p10 = pnand %p14631_p9, %p14628_p8 }
  0x19   :  { %14636 = shalt.err (!%p14633_p10)
}
  0x1a   :  { %s14637_s28 = scalar_lea.vmem %s14811_s21, 2048  ;;  %p14642_p12 = scmp.lt.s32.totalorder %s14811_s21, %s14811_s21 }
  0x1b   :  { %p14638_p11 = scmp.ne.s32.totalorder %s14811_s21, %s14637_s28  ;;  %p14643_p13 = scmp.lt.s32.totalorder %s14637_s28, %s14637_s28 }
  0x1d   :  { %p14644_p0 = por %p14643_p13, %p14642_p12 }
  0x1f   :  { %p14645_p1 = pnand %p14644_p0, %p14638_p11 }
  0x21   :  { %14648 = shalt.err (!%p14645_p1)
}
  0x22   :  { %86 = dma.hbm_to_vmem [thread:$0]  %s17983_s11, 2048, %s14811_s21, [#allocation11], %s14723_s30, %s14723_s30, %s14724_s16  }
  0x23   :  { %s14725_s29 = smov [#allocation5]   ;;  %s14726_s18 = smov [#allocation9]  }
  0x24   :  { %s30_s17 = sshll.u32 %s14725_s29, 4  ;;  %s66_s20 = sshll.u32 %s14726_s18, 4  ;;  %s31_s17 = int_to_ptr.vmem [resolvable:$true] %s30_s17  ;;  %s14848_s20 = int_to_ptr.vmem [resolvable:$true] %s66_s20 }
  0x25   :  { %s14649_s24 = scalar_lea.hbm %s17973_s1, 1152 }
  0x26   :  { %p14650_p2 = scmp.ne.s32.totalorder %s17973_s1, %s14649_s24  ;;  %p14653_p3 = scmp.lt.u32.totalorder %s14649_s24, %s17973_s1 }
  0x28   :  { %p14655_p4 = pnand %p14653_p3, %p14650_p2 }
  0x2a   :  { %14658 = shalt.err (!%p14655_p4)
}
  0x2b   :  { %s14659_s11 = scalar_lea.vmem %s31_s17, 1152  ;;  %p14664_p6 = scmp.lt.s32.totalorder %s31_s17, %s31_s17 }
  0x2c   :  { %p14660_p5 = scmp.ne.s32.totalorder %s31_s17, %s14659_s11  ;;  %p14665_p7 = scmp.lt.s32.totalorder %s14659_s11, %s14659_s11 }
  0x2e   :  { %p14666_p8 = por %p14665_p7, %p14664_p6 }
  0x30   :  { %p14667_p9 = pnand %p14666_p8, %p14660_p5 }
  0x32   :  { %14670 = shalt.err (!%p14667_p9)
}
  0x33   :  { %36 = dma.hbm_to_vmem [thread:$0]  %s17973_s1, 1152, %s31_s17, [#allocation6], %s14723_s30, %s14723_s30, %s14724_s16  }
  0x34   :  { %s14671_s18 = scalar_lea.hbm %s17981_s9, 2048 }
  0x35   :  { %p14672_p10 = scmp.ne.s32.totalorder %s17981_s9, %s14671_s18  ;;  %p14675_p11 = scmp.lt.u32.totalorder %s14671_s18, %s17981_s9 }
  0x37   :  { %p14677_p12 = pnand %p14675_p11, %p14672_p10 }
  0x39   :  { %14680 = shalt.err (!%p14677_p12)
}
  0x3a   :  { %s14681_s26 = scalar_lea.vmem %s14848_s20, 2048  ;;  %p14686_p0 = scmp.lt.s32.totalorder %s14848_s20, %s14848_s20 }
  0x3b   :  { %p14682_p13 = scmp.ne.s32.totalorder %s14848_s20, %s14681_s26  ;;  %p14687_p1 = scmp.lt.s32.totalorder %s14681_s26, %s14681_s26 }
  0x3d   :  { %p14688_p2 = por %p14687_p1, %p14686_p0 }
  0x3f   :  { %p14689_p3 = pnand %p14688_p2, %p14682_p13 }
  0x41   :  { %14692 = shalt.err (!%p14689_p3)
}
  0x42   :  { %72 = dma.hbm_to_vmem [thread:$0]  %s17981_s9, 2048, %s14848_s20, [#allocation8], %s14723_s30, %s14723_s30, %s14724_s16  }
  0x43   :  { %s14727_s27 = smov [#allocation12]   ;;  %s14693_s7 = scalar_lea.hbm %s17985_s13, 2048 }
  0x44   :  { %s94_s28 = sshll.u32 %s14727_s27, 4  ;;  %p14694_p4 = scmp.ne.s32.totalorder %s17985_s13, %s14693_s7  ;;  %s95_s28 = int_to_ptr.vmem [resolvable:$true] %s94_s28 }
  0x45   :  { %p14697_p5 = scmp.lt.u32.totalorder %s14693_s7, %s17985_s13 }
  0x47   :  { %p14699_p6 = pnand %p14697_p5, %p14694_p4 }
  0x49   :  { %14702 = shalt.err (!%p14699_p6)
}
  0x4a   :  { %s14703_s23 = scalar_lea.vmem %s95_s28, 2048  ;;  %p14708_p8 = scmp.lt.s32.totalorder %s95_s28, %s95_s28 }
  0x4b   :  { %p14704_p7 = scmp.ne.s32.totalorder %s95_s28, %s14703_s23  ;;  %p14709_p9 = scmp.lt.s32.totalorder %s14703_s23, %s14703_s23 }
  0x4d   :  { %p14710_p10 = por %p14709_p9, %p14708_p8 }
  0x4f   :  { %p14711_p11 = pnand %p14710_p10, %p14704_p7 }
  0x51   :  { %14714 = shalt.err (!%p14711_p11)
}
  0x52   :  { %100 = dma.hbm_to_vmem [thread:$0]  %s17985_s13, 2048, %s95_s28, [#allocation11], %s14723_s30, %s14723_s30, %s14724_s16  }
  0x53   :  { %14715 = dma.done.wait [#allocation6], 1152  }
  0x54   :  { %14716 = vsyncadd [#allocation6], 4294966144 }
  0x55   :  { %14717 = dma.done.wait [#allocation8], 4096  }
  0x56   :  { %14718 = vsyncadd [#allocation8], 4294963200 }
  0x57   :  { %14719 = dma.done.wait [#allocation11], 4096  }
  0x58   :  { %14720 = vsyncadd [#allocation11], 4294963200  ;;  %vm118_vm0 = vcmask 64512   ;;  %v17988_v0 = vmov 0.0   ;;  %v1700_v1 = vld [vmem:[#allocation5 + $0x10] sm:$0xff]  ;;  %v2408_v2 = vld [vmem:[#allocation5 + $0x18] sm:$0xff] }
  0x59   :  { %121 = vst.msk [vmem:[#allocation2 + $0x10] sm:$0xff] %vm118_vm0, %v17988_v0  ;;  %119 = vst.msk [vmem:[#allocation2] sm:$0xff] %vm118_vm0, %v17988_v0  ;;  %v220_v3 = vld [vmem:[%s17972_s0 + $0x8] sm:$0xff]  ;;  %12288 = vmatprep.subr.mxu0 %v1700_v1  ;;  %v221_v8 = vld [vmem:[%s17972_s0 + $0x10] sm:$0xff]  ;;  %vm6708_vm1 = vcmask 261120   ;;  %vm8841_vm2 = vcmask 523264  }
  0x5a   :  { %120 = vst.msk [vmem:[#allocation2 + $0x8] sm:$0xff] %vm118_vm0, %v17988_v0  ;;  %122 = vst.msk [vmem:[#allocation2 + $0x18] sm:$0xff] %vm118_vm0, %v17988_v0  ;;  %12289 = vmatpush3.msra.mxu0 %v1700_v1  ;;  %v222_v9 = vld [vmem:[%s17972_s0 + $0x18] sm:$0xff]  ;;  %v223_v10 = vld [vmem:[%s17972_s0 + $0x20] sm:$0xff]  ;;  %vm14730_vm3 = vmmov 0  }
  0x5b   :  { %123 = vst.msk [vmem:[#allocation2 + $0x20] sm:$0xff] %vm118_vm0, %v17988_v0  ;;  %124 = vst.msk [vmem:[#allocation2 + $0x28] sm:$0xff] %vm118_vm0, %v17988_v0  ;;  %12386 = vmatprep.subr.mxu0 %v2408_v2  ;;  %v224_v11 = vld [vmem:[%s17972_s0 + $0x28] sm:$0xff]  ;;  %v225_v13 = vld [vmem:[%s17972_s0 + $0x30] sm:$0xff] }
  0x5c   :  { %125 = vst.msk [vmem:[#allocation2 + $0x30] sm:$0xff] %vm118_vm0, %v17988_v0  ;;  %126 = vst.msk [vmem:[#allocation2 + $0x38] sm:$0xff] %vm118_vm0, %v17988_v0  ;;  %v226_v14 = vld [vmem:[%s17972_s0 + $0x38] sm:$0xff]  ;;  %v228_v15 = vld [vmem:[%s17972_s0 + $0x48] sm:$0xff] }
  0x5d   :  { %127 = vst.msk [vmem:[#allocation2 + $0x40] sm:$0xff] %vm118_vm0, %v17988_v0  ;;  %128 = vst.msk [vmem:[#allocation2 + $0x48] sm:$0xff] %vm118_vm0, %v17988_v0  ;;  %v229_v16 = vld [vmem:[%s17972_s0 + $0x50] sm:$0xff]  ;;  %v230_v17 = vld [vmem:[%s17972_s0 + $0x58] sm:$0xff] }
  0x5e   :  { %129 = vst.msk [vmem:[#allocation2 + $0x50] sm:$0xff] %vm118_vm0, %v17988_v0  ;;  %130 = vst.msk [vmem:[#allocation2 + $0x58] sm:$0xff] %vm118_vm0, %v17988_v0  ;;  %v231_v18 = vld [vmem:[%s17972_s0 + $0x60] sm:$0xff]  ;;  %v232_v19 = vld [vmem:[%s17972_s0 + $0x68] sm:$0xff] }
  0x5f   :  { %131 = vst.msk [vmem:[#allocation2 + $0x60] sm:$0xff] %vm118_vm0, %v17988_v0  ;;  %132 = vst.msk [vmem:[#allocation2 + $0x68] sm:$0xff] %vm118_vm0, %v17988_v0  ;;  %v233_v20 = vld [vmem:[%s17972_s0 + $0x70] sm:$0xff]  ;;  %v234_v23 = vld [vmem:[%s17972_s0 + $0x78] sm:$0xff] }
  0x60   :  { %133 = vst.msk [vmem:[#allocation2 + $0x70] sm:$0xff] %vm118_vm0, %v17988_v0  ;;  %134 = vst.msk [vmem:[#allocation2 + $0x78] sm:$0xff] %vm118_vm0, %v17988_v0  ;;  %v1635_v4 = vld [vmem:[#allocation2 + $0x10] sm:$0xff]  ;;  %v236_v24 = vld [vmem:[%s17972_s0 + $0x88] sm:$0xff] }
  0x61   :  { %135 = vst.msk [vmem:[#allocation2 + $0x80] sm:$0xff] %vm118_vm0, %v17988_v0  ;;  %136 = vst.msk [vmem:[#allocation2 + $0x88] sm:$0xff] %vm118_vm0, %v17988_v0  ;;  %v1636_v5 = vld [vmem:[#allocation2 + $0x18] sm:$0xff]  ;;  %12290 = vmatprep.mubr.msk.f32.mxu0 %vm118_vm0, %v1635_v4  ;;  %v237_v25 = vld [vmem:[%s17972_s0 + $0x90] sm:$0xff] }
  0x62   :  { %137 = vst.msk [vmem:[#allocation2 + $0x90] sm:$0xff] %vm118_vm0, %v17988_v0  ;;  %138 = vst.msk [vmem:[#allocation2 + $0x98] sm:$0xff] %vm118_vm0, %v17988_v0  ;;  %v1637_v6 = vld [vmem:[#allocation2 + $0x20] sm:$0xff]  ;;  %12291 = vmatmul.mubr.msk.f32.vlgmr.msra.gmra.mrb[0].mxu0 %vm118_vm0, %v1636_v5  ;;  %v1638_v7 = vld [vmem:[#allocation2 + $0x28] sm:$0xff] }
  0x63   :  { %139 = vst.msk [vmem:[#allocation2 + $0xa0] sm:$0xff] %vm118_vm0, %v17988_v0  ;;  %140 = vst.msk [vmem:[#allocation2 + $0xa8] sm:$0xff] %vm118_vm0, %v17988_v0  ;;  %12387 = vmatpush3.msra.mxu0 %v2408_v2  ;;  %12293 = vmatprep.mubr.msk.f32.mxu0 %vm118_vm0, %v1637_v6  ;;  %v1639_v12 = vld [vmem:[#allocation2 + $0x30] sm:$0xff]  ;;  %v1640_v21 = vld [vmem:[#allocation2 + $0x38] sm:$0xff] }
  0x64   :  { %141 = vst.msk [vmem:[#allocation2 + $0xb0] sm:$0xff] %vm118_vm0, %v17988_v0  ;;  %142 = vst.msk [vmem:[#allocation2 + $0xb8] sm:$0xff] %vm118_vm0, %v17988_v0  ;;  %v1641_v22 = vld [vmem:[#allocation2 + $0x40] sm:$0xff]  ;;  %v238_v26 = vld [vmem:[%s17972_s0 + $0x98] sm:$0xff] }
  0x65   :  { %143 = vst.msk [vmem:[#allocation2 + $0xc0] sm:$0xff] %vm118_vm0, %v17988_v0  ;;  %144 = vst.msk [vmem:[#allocation2 + $0xc8] sm:$0xff] %vm118_vm0, %v17988_v0  ;;  %v239_v27 = vld [vmem:[%s17972_s0 + $0xa0] sm:$0xff]  ;;  %v240_v28 = vld [vmem:[%s17972_s0 + $0xa8] sm:$0xff] }
  0x66   :  { %145 = vst.msk [vmem:[#allocation2 + $0xd0] sm:$0xff] %vm118_vm0, %v17988_v0  ;;  %146 = vst.msk [vmem:[#allocation2 + $0xd8] sm:$0xff] %vm118_vm0, %v17988_v0  ;;  %12294 = vmatmul.mubr.msk.f32.gmra.mrb[2].mxu0 %vm118_vm0, %v1638_v7  ;;  %v241_v29 = vld [vmem:[%s17972_s0 + $0xb0] sm:$0xff]  ;;  %v242_v30 = vld [vmem:[%s17972_s0 + $0xb8] sm:$0xff] }
  0x67   :  { %147 = vst.msk [vmem:[#allocation2 + $0xe0] sm:$0xff] %vm118_vm0, %v17988_v0  ;;  %148 = vst.msk [vmem:[#allocation2 + $0xe8] sm:$0xff] %vm118_vm0, %v17988_v0  ;;  %12296 = vmatprep.mubr.msk.f32.mxu0 %vm118_vm0, %v1639_v12  ;;  %v1642_v31 = vld [vmem:[#allocation2 + $0x48] sm:$0xff]  ;;  %v245_v35 = vld [vmem:[%s17972_s0 + $0xd0] sm:$0xff] }
  0x68   :  { %149 = vst.msk [vmem:[#allocation2 + $0xf0] sm:$0xff] %vm118_vm0, %v17988_v0  ;;  %150 = vst.msk [vmem:[#allocation2 + $0xf8] sm:$0xff] %vm118_vm0, %v17988_v0  ;;  %v244_v33 = vld [vmem:[%s17972_s0 + $0xc8] sm:$0xff]  ;;  %v246_v36 = vld [vmem:[%s17972_s0 + $0xd8] sm:$0xff] }
  0x69   :  { %151 = vst.msk [vmem:[#allocation2 + $0x100] sm:$0xff] %vm118_vm0, %v17988_v0  ;;  %152 = vst.msk [vmem:[#allocation2 + $0x108] sm:$0xff] %vm118_vm0, %v17988_v0  ;;  %v247_v38 = vld [vmem:[%s17972_s0 + $0xe0] sm:$0xff]  ;;  %v248_v39 = vld [vmem:[%s17972_s0 + $0xe8] sm:$0xff] }
  0x6a   :  { %153 = vst.msk [vmem:[#allocation2 + $0x110] sm:$0xff] %vm118_vm0, %v17988_v0  ;;  %154 = vst.msk [vmem:[#allocation2 + $0x118] sm:$0xff] %vm118_vm0, %v17988_v0  ;;  %12297 = vmatmul.mubr.msk.f32.gmra.mrb[4].mxu0 %vm118_vm0, %v1640_v21  ;;  %v249_v41 = vld [vmem:[%s17972_s0 + $0xf0] sm:$0xff]  ;;  %v250_v42 = vld [vmem:[%s17972_s0 + $0xf8] sm:$0xff] }
  0x6b   :  { %155 = vst.msk [vmem:[#allocation2 + $0x120] sm:$0xff] %vm118_vm0, %v17988_v0  ;;  %156 = vst.msk [vmem:[#allocation2 + $0x128] sm:$0xff] %vm118_vm0, %v17988_v0  ;;  %12299 = vmatprep.mubr.msk.f32.mxu0 %vm118_vm0, %v1641_v22  ;;  %v252_v44 = vld [vmem:[%s17972_s0 + $0x108] sm:$0xff]  ;;  %v253_v45 = vld [vmem:[%s17972_s0 + $0x110] sm:$0xff] }
  0x6c   :  { %157 = vst.msk [vmem:[#allocation2 + $0x130] sm:$0xff] %vm118_vm0, %v17988_v0  ;;  %158 = vst.msk [vmem:[#allocation2 + $0x138] sm:$0xff] %vm118_vm0, %v17988_v0  ;;  %v219_v46 = vld [vmem:[%s17972_s0] sm:$0xff]  ;;  %v254_v54 = vld [vmem:[%s17972_s0 + $0x118] sm:$0xff] }
  0x6d   :  { %159 = vst.msk [vmem:[#allocation2 + $0x140] sm:$0xff] %vm118_vm0, %v17988_v0  ;;  %160 = vst.msk [vmem:[#allocation2 + $0x148] sm:$0xff] %vm118_vm0, %v17988_v0  ;;  %v15247_v47 = vld [vmem:[#allocation5 + $0x20] sm:$0xff]  ;;  %v256_v56 = vld [vmem:[%s17972_s0 + $0x128] sm:$0xff] }
  0x6e   :  { %161 = vst.msk [vmem:[#allocation2 + $0x150] sm:$0xff] %vm118_vm0, %v17988_v0  ;;  %162 = vst.msk [vmem:[#allocation2 + $0x158] sm:$0xff] %vm118_vm0, %v17988_v0  ;;  %12300 = vmatmul.mubr.msk.f32.gmra.mrb[6].mxu0 %vm118_vm0, %v1642_v31  ;;  %12484 = vmatprep.subr.mxu0 %v15247_v47  ;;  %v227_v48 = vld [vmem:[%s17972_s0 + $0x40] sm:$0xff]  ;;  %v15290_v57 = vld [vmem:[#allocation2 + $0x98] sm:$0xff] }
  0x6f   :  { %163 = vst.msk [vmem:[#allocation2 + $0x160] sm:$0xff] %vm118_vm0, %v17988_v0  ;;  %164 = vst.msk [vmem:[#allocation2 + $0x168] sm:$0xff] %vm118_vm0, %v17988_v0  ;;  %v235_v50 = vld [vmem:[%s17972_s0 + $0x80] sm:$0xff]  ;;  %v257_v58 = vld [vmem:[%s17972_s0 + $0x130] sm:$0xff] }
  0x70   :  { %165 = vst.msk [vmem:[#allocation2 + $0x170] sm:$0xff] %vm118_vm0, %v17988_v0  ;;  %166 = vst.msk [vmem:[#allocation2 + $0x178] sm:$0xff] %vm118_vm0, %v17988_v0  ;;  %v243_v52 = vld [vmem:[%s17972_s0 + $0xc0] sm:$0xff]  ;;  %v260_v63 = vld [vmem:[%s17972_s0 + $0x148] sm:$0xff] }
  0x71   :  { %167 = vst.msk [vmem:[#allocation2 + $0x180] sm:$0xff] %vm118_vm0, %v17988_v0  ;;  %168 = vst.msk [vmem:[#allocation2 + $0x188] sm:$0xff] %vm118_vm0, %v17988_v0  ;;  %v251_v53 = vld [vmem:[%s17972_s0 + $0x100] sm:$0xff]  ;;  %v261_v1 = vld [vmem:[%s17972_s0 + $0x150] sm:$0xff] }
  0x72   :  { %169 = vst.msk [vmem:[#allocation2 + $0x190] sm:$0xff] %vm118_vm0, %v17988_v0  ;;  %170 = vst.msk [vmem:[#allocation2 + $0x198] sm:$0xff] %vm118_vm0, %v17988_v0  ;;  %v255_v55 = vld [vmem:[%s17972_s0 + $0x120] sm:$0xff]  ;;  %v262_v4 = vld [vmem:[%s17972_s0 + $0x158] sm:$0xff] }
  0x73   :  { %171 = vst.msk [vmem:[#allocation2 + $0x1a0] sm:$0xff] %vm118_vm0, %v17988_v0  ;;  %172 = vst.msk [vmem:[#allocation2 + $0x1a8] sm:$0xff] %vm118_vm0, %v17988_v0  ;;  %v259_v60 = vld [vmem:[%s17972_s0 + $0x140] sm:$0xff]  ;;  %v277_v31 = vld [vmem:[%s17972_s0 + $0x1d0] sm:$0xff] }
  0x74   :  { %173 = vst.msk [vmem:[#allocation2 + $0x1b0] sm:$0xff] %vm118_vm0, %v17988_v0  ;;  %174 = vst.msk [vmem:[#allocation2 + $0x1b8] sm:$0xff] %vm118_vm0, %v17988_v0  ;;  %v263_v5 = vld [vmem:[%s17972_s0 + $0x160] sm:$0xff] }
  0x75   :  { %175 = vst.msk [vmem:[#allocation2 + $0x1c0] sm:$0xff] %vm118_vm0, %v17988_v0  ;;  %176 = vst.msk [vmem:[#allocation2 + $0x1c8] sm:$0xff] %vm118_vm0, %v17988_v0  ;;  %v267_v12 = vld [vmem:[%s17972_s0 + $0x180] sm:$0xff] }
  0x76   :  { %177 = vst.msk [vmem:[#allocation2 + $0x1d0] sm:$0xff] %vm118_vm0, %v17988_v0  ;;  %178 = vst.msk [vmem:[#allocation2 + $0x1d8] sm:$0xff] %vm118_vm0, %v17988_v0 }
  0x77   :  { %179 = vst.msk [vmem:[#allocation2 + $0x1e0] sm:$0xff] %vm118_vm0, %v17988_v0  ;;  %180 = vst.msk [vmem:[#allocation2 + $0x1e8] sm:$0xff] %vm118_vm0, %v17988_v0 }
  0x78   :  { %181 = vst.msk [vmem:[#allocation2 + $0x1f0] sm:$0xff] %vm118_vm0, %v17988_v0  ;;  %182 = vst.msk [vmem:[#allocation2 + $0x1f8] sm:$0xff] %vm118_vm0, %v17988_v0 }
  0x79   :  { %183 = vst.msk [vmem:[#allocation2 + $0x200] sm:$0xff] %vm118_vm0, %v17988_v0  ;;  %184 = vst.msk [vmem:[#allocation2 + $0x208] sm:$0xff] %vm118_vm0, %v17988_v0 }
  0x7a   :  { %185 = vst.msk [vmem:[#allocation2 + $0x210] sm:$0xff] %vm118_vm0, %v17988_v0  ;;  %186 = vst.msk [vmem:[#allocation2 + $0x218] sm:$0xff] %vm118_vm0, %v17988_v0 }
  0x7b   :  { %187 = vst.msk [vmem:[#allocation2 + $0x220] sm:$0xff] %vm118_vm0, %v17988_v0  ;;  %188 = vst.msk [vmem:[#allocation2 + $0x228] sm:$0xff] %vm118_vm0, %v17988_v0 }
  0x7c   :  { %189 = vst.msk [vmem:[#allocation2 + $0x230] sm:$0xff] %vm118_vm0, %v17988_v0  ;;  %190 = vst.msk [vmem:[#allocation2 + $0x238] sm:$0xff] %vm118_vm0, %v17988_v0 }
  0x7d   :  { %191 = vst.msk [vmem:[#allocation2 + $0x240] sm:$0xff] %vm118_vm0, %v17988_v0  ;;  %192 = vst.msk [vmem:[#allocation2 + $0x248] sm:$0xff] %vm118_vm0, %v17988_v0 }
  0x7e   :  { %193 = vst.msk [vmem:[#allocation2 + $0x250] sm:$0xff] %vm118_vm0, %v17988_v0  ;;  %194 = vst.msk [vmem:[#allocation2 + $0x258] sm:$0xff] %vm118_vm0, %v17988_v0 }
  0x7f   :  { %195 = vst.msk [vmem:[#allocation2 + $0x260] sm:$0xff] %vm118_vm0, %v17988_v0  ;;  %196 = vst.msk [vmem:[#allocation2 + $0x268] sm:$0xff] %vm118_vm0, %v17988_v0 }
  0x80   :  { %197 = vst.msk [vmem:[#allocation2 + $0x270] sm:$0xff] %vm118_vm0, %v17988_v0  ;;  %198 = vst.msk [vmem:[#allocation2 + $0x278] sm:$0xff] %vm118_vm0, %v17988_v0 }
  0x81   :  { %199 = vst.msk [vmem:[#allocation2 + $0x280] sm:$0xff] %vm118_vm0, %v17988_v0  ;;  %200 = vst.msk [vmem:[#allocation2 + $0x288] sm:$0xff] %vm118_vm0, %v17988_v0 }
  0x82   :  { %201 = vst.msk [vmem:[#allocation2 + $0x290] sm:$0xff] %vm118_vm0, %v17988_v0  ;;  %202 = vst.msk [vmem:[#allocation2 + $0x298] sm:$0xff] %vm118_vm0, %v17988_v0 }
  0x83   :  { %203 = vst.msk [vmem:[#allocation2 + $0x2a0] sm:$0xff] %vm118_vm0, %v17988_v0  ;;  %204 = vst.msk [vmem:[#allocation2 + $0x2a8] sm:$0xff] %vm118_vm0, %v17988_v0 }
  0x84   :  { %205 = vst.msk [vmem:[#allocation2 + $0x2b0] sm:$0xff] %vm118_vm0, %v17988_v0  ;;  %206 = vst.msk [vmem:[#allocation2 + $0x2b8] sm:$0xff] %vm118_vm0, %v17988_v0 }
  0x85   :  { %207 = vst.msk [vmem:[#allocation2 + $0x2c0] sm:$0xff] %vm118_vm0, %v17988_v0  ;;  %208 = vst.msk [vmem:[#allocation2 + $0x2c8] sm:$0xff] %vm118_vm0, %v17988_v0 }
  0x86   :  { %209 = vst.msk [vmem:[#allocation2 + $0x2d0] sm:$0xff] %vm118_vm0, %v17988_v0  ;;  %210 = vst.msk [vmem:[#allocation2 + $0x2d8] sm:$0xff] %vm118_vm0, %v17988_v0 }
  0x87   :  { %211 = vst.msk [vmem:[#allocation2 + $0x2e0] sm:$0xff] %vm118_vm0, %v17988_v0  ;;  %212 = vst.msk [vmem:[#allocation2 + $0x2e8] sm:$0xff] %vm118_vm0, %v17988_v0 }
  0x88   :  { %213 = vst.msk [vmem:[#allocation2 + $0x2f0] sm:$0xff] %vm118_vm0, %v17988_v0  ;;  %214 = vst.msk [vmem:[#allocation2 + $0x2f8] sm:$0xff] %vm118_vm0, %v17988_v0 }
  0x89   :  { %215 = vst.msk [vmem:[#allocation2 + $0x300] sm:$0xff] %vm118_vm0, %v17988_v0  ;;  %216 = vst.msk [vmem:[#allocation2 + $0x308] sm:$0xff] %vm118_vm0, %v17988_v0 }
  0x8a   :  { %217 = vst.msk [vmem:[#allocation2 + $0x310] sm:$0xff] %vm118_vm0, %v17988_v0  ;;  %218 = vst.msk [vmem:[#allocation2 + $0x318] sm:$0xff] %vm118_vm0, %v17988_v0  ;;  %v282_v0 = vld [vmem:[%s17972_s0 + $0x1f8] sm:$0xff] }
  0x8b   :  { %285 = vst.msk [vmem:[#allocation2 + $0x60] sm:$0xff] %vm118_vm0, %v220_v3  ;;  %286 = vst.msk [vmem:[#allocation2 + $0x68] sm:$0xff] %vm118_vm0, %v221_v8  ;;  %v264_v8 = vld [vmem:[%s17972_s0 + $0x168] sm:$0xff] }
  0x8c   :  { %287 = vst.msk [vmem:[#allocation2 + $0x70] sm:$0xff] %vm118_vm0, %v222_v9  ;;  %288 = vst.msk [vmem:[#allocation2 + $0x78] sm:$0xff] %vm118_vm0, %v223_v10  ;;  %v265_v9 = vld [vmem:[%s17972_s0 + $0x170] sm:$0xff]  ;;  %v15355_v10 = vld [vmem:[#allocation2 + $0xe8] sm:$0xff] }
  0x8d   :  { %289 = vst.msk [vmem:[#allocation2 + $0x80] sm:$0xff] %vm118_vm0, %v224_v11  ;;  %290 = vst.msk [vmem:[#allocation2 + $0x88] sm:$0xff] %vm118_vm0, %v225_v13 }
  0x8e   :  { %291 = vst.msk [vmem:[#allocation2 + $0x90] sm:$0xff] %vm118_vm0, %v226_v14  ;;  %293 = vst.msk [vmem:[#allocation2 + $0xb0] sm:$0xff] %vm118_vm0, %v228_v15  ;;  %v268_v15 = vld [vmem:[%s17972_s0 + $0x188] sm:$0xff] }
  0x8f   :  { %294 = vst.msk [vmem:[#allocation2 + $0xb8] sm:$0xff] %vm118_vm0, %v229_v16  ;;  %295 = vst.msk [vmem:[#allocation2 + $0xc0] sm:$0xff] %vm118_vm0, %v230_v17  ;;  %v269_v16 = vld [vmem:[%s17972_s0 + $0x190] sm:$0xff] }
  0x90   :  { %296 = vst.msk [vmem:[#allocation2 + $0xc8] sm:$0xff] %vm118_vm0, %v231_v18  ;;  %297 = vst.msk [vmem:[#allocation2 + $0xd0] sm:$0xff] %vm118_vm0, %v232_v19  ;;  %v270_v19 = vld [vmem:[%s17972_s0 + $0x198] sm:$0xff] }
  0x91   :  { %298 = vst.msk [vmem:[#allocation2 + $0xd8] sm:$0xff] %vm118_vm0, %v233_v20  ;;  %299 = vst.msk [vmem:[#allocation2 + $0xe0] sm:$0xff] %vm118_vm0, %v234_v23  ;;  %v271_v20 = vld [vmem:[%s17972_s0 + $0x1a0] sm:$0xff]  ;;  %v272_v23 = vld [vmem:[%s17972_s0 + $0x1a8] sm:$0xff] }
  0x92   :  { %301 = vst.msk [vmem:[#allocation2 + $0x100] sm:$0xff] %vm118_vm0, %v236_v24  ;;  %302 = vst.msk [vmem:[#allocation2 + $0x108] sm:$0xff] %vm118_vm0, %v237_v25  ;;  %v15191_v32 = vld [vmem:[#allocation2 + $0x60] sm:$0xff]  ;;  %v15200_v34 = vld [vmem:[#allocation2 + $0x68] sm:$0xff] }
  0x93   :  { %303 = vst.msk [vmem:[#allocation2 + $0x110] sm:$0xff] %vm118_vm0, %v238_v26  ;;  %304 = vst.msk [vmem:[#allocation2 + $0x118] sm:$0xff] %vm118_vm0, %v239_v27  ;;  %12302 = vmatprep.mubr.msk.f32.mxu0 %vm118_vm0, %v15191_v32  ;;  %v15208_v37 = vld [vmem:[#allocation2 + $0x70] sm:$0xff]  ;;  %v15222_v40 = vld [vmem:[#allocation2 + $0x78] sm:$0xff] }
  0x94   :  { %305 = vst.msk [vmem:[#allocation2 + $0x120] sm:$0xff] %vm118_vm0, %v240_v28  ;;  %306 = vst.msk [vmem:[#allocation2 + $0x128] sm:$0xff] %vm118_vm0, %v241_v29  ;;  %12303 = vmatmul.mubr.msk.f32.gmra.mrb[8].mxu0 %vm118_vm0, %v15200_v34  ;;  %v15232_v43 = vld [vmem:[#allocation2 + $0x80] sm:$0xff]  ;;  %v15258_v49 = vld [vmem:[#allocation2 + $0x88] sm:$0xff] }
  0x95   :  { %307 = vst.msk [vmem:[#allocation2 + $0x130] sm:$0xff] %vm118_vm0, %v242_v30  ;;  %309 = vst.msk [vmem:[#allocation2 + $0x150] sm:$0xff] %vm118_vm0, %v244_v33  ;;  %12305 = vmatprep.mubr.msk.f32.mxu0 %vm118_vm0, %v15208_v37  ;;  %v15264_v51 = vld [vmem:[#allocation2 + $0x90] sm:$0xff]  ;;  %v15415_v25 = vld [vmem:[#allocation2 + $0x138] sm:$0xff] }
  0x96   :  { %310 = vst.msk [vmem:[#allocation2 + $0x158] sm:$0xff] %vm118_vm0, %v245_v35  ;;  %311 = vst.msk [vmem:[#allocation2 + $0x160] sm:$0xff] %vm118_vm0, %v246_v36  ;;  %v15296_v59 = vld [vmem:[#allocation2 + $0xb0] sm:$0xff]  ;;  %v15307_v61 = vld [vmem:[#allocation2 + $0xb8] sm:$0xff] }
  0x97   :  { %312 = vst.msk [vmem:[#allocation2 + $0x168] sm:$0xff] %vm118_vm0, %v247_v38  ;;  %313 = vst.msk [vmem:[#allocation2 + $0x170] sm:$0xff] %vm118_vm0, %v248_v39  ;;  %v15309_v62 = vld [vmem:[#allocation2 + $0xc0] sm:$0xff]  ;;  %v15322_v2 = vld [vmem:[#allocation2 + $0xc8] sm:$0xff] }
  0x98   :  { %314 = vst.msk [vmem:[#allocation2 + $0x178] sm:$0xff] %vm118_vm0, %v249_v41  ;;  %315 = vst.msk [vmem:[#allocation2 + $0x180] sm:$0xff] %vm118_vm0, %v250_v42  ;;  %12306 = vmatmul.mubr.msk.f32.gmra.mrb[10].mxu0 %vm118_vm0, %v15222_v40  ;;  %v15325_v3 = vld [vmem:[#allocation2 + $0xd0] sm:$0xff]  ;;  %v15339_v6 = vld [vmem:[#allocation2 + $0xd8] sm:$0xff] }
  0x99   :  { %317 = vst.msk [vmem:[#allocation2 + $0x1a0] sm:$0xff] %vm118_vm0, %v252_v44  ;;  %318 = vst.msk [vmem:[#allocation2 + $0x1a8] sm:$0xff] %vm118_vm0, %v253_v45  ;;  %12308 = vmatprep.mubr.msk.f32.mxu0 %vm118_vm0, %v15232_v43  ;;  %v15341_v7 = vld [vmem:[#allocation2 + $0xe0] sm:$0xff]  ;;  %v15367_v13 = vld [vmem:[#allocation2 + $0x108] sm:$0xff] }
  0x9a   :  { %284 = vst.msk [vmem:[#allocation2 + $0x58] sm:$0xff] %vm118_vm0, %v219_v46  ;;  %292 = vst.msk [vmem:[#allocation2 + $0xa8] sm:$0xff] %vm118_vm0, %v227_v48  ;;  %v15357_v11 = vld [vmem:[#allocation2 + $0x100] sm:$0xff]  ;;  %v15369_v14 = vld [vmem:[#allocation2 + $0x110] sm:$0xff] }
  0x9b   :  { %300 = vst.msk [vmem:[#allocation2 + $0xf8] sm:$0xff] %vm118_vm0, %v235_v50  ;;  %308 = vst.msk [vmem:[#allocation2 + $0x148] sm:$0xff] %vm118_vm0, %v243_v52  ;;  %v15383_v17 = vld [vmem:[#allocation2 + $0x118] sm:$0xff]  ;;  %v15385_v18 = vld [vmem:[#allocation2 + $0x120] sm:$0xff] }
  0x9c   :  { %12309 = vmatmul.mubr.msk.f32.gmra.mrb[12].mxu0 %vm118_vm0, %v15258_v49  ;;  %316 = vst.msk [vmem:[#allocation2 + $0x198] sm:$0xff] %vm118_vm0, %v251_v53  ;;  %319 = vst.msk [vmem:[#allocation2 + $0x1b0] sm:$0xff] %vm118_vm0, %v254_v54  ;;  %v15399_v21 = vld [vmem:[#allocation2 + $0x128] sm:$0xff]  ;;  %v15401_v22 = vld [vmem:[#allocation2 + $0x130] sm:$0xff] }
  0x9d   :  { %320 = vst.msk [vmem:[#allocation2 + $0x1b8] sm:$0xff] %vm118_vm0, %v255_v55  ;;  %12311 = vmatprep.mubr.msk.f32.mxu0 %vm118_vm0, %v15264_v51  ;;  %321 = vst.msk [vmem:[#allocation2 + $0x1c0] sm:$0xff] %vm118_vm0, %v256_v56  ;;  %v273_v24 = vld [vmem:[%s17972_s0 + $0x1b0] sm:$0xff]  ;;  %v275_v27 = vld [vmem:[%s17972_s0 + $0x1c0] sm:$0xff] }
  0x9e   :  { %322 = vst.msk [vmem:[#allocation2 + $0x1c8] sm:$0xff] %vm118_vm0, %v257_v58  ;;  %324 = vst.msk [vmem:[#allocation2 + $0x1e8] sm:$0xff] %vm118_vm0, %v259_v60  ;;  %v15417_v26 = vld [vmem:[#allocation2 + $0x150] sm:$0xff]  ;;  %v15427_v28 = vld [vmem:[#allocation2 + $0x158] sm:$0xff] }
  0x9f   :  { %325 = vst.msk [vmem:[#allocation2 + $0x1f0] sm:$0xff] %vm118_vm0, %v260_v63  ;;  %326 = vst.msk [vmem:[#allocation2 + $0x1f8] sm:$0xff] %vm118_vm0, %v261_v1  ;;  %v15429_v29 = vld [vmem:[#allocation2 + $0x160] sm:$0xff]  ;;  %v276_v30 = vld [vmem:[%s17972_s0 + $0x1c8] sm:$0xff] }
  0xa0   :  { %12312 = vmatmul.mubr.msk.f32.gmra.mrb[14].mxu0 %vm118_vm0, %v15290_v57  ;;  %327 = vst.msk [vmem:[#allocation2 + $0x200] sm:$0xff] %vm118_vm0, %v262_v4  ;;  %328 = vst.msk [vmem:[#allocation2 + $0x208] sm:$0xff] %vm118_vm0, %v263_v5  ;;  %v15443_v33 = vld [vmem:[#allocation2 + $0x168] sm:$0xff]  ;;  %v15445_v35 = vld [vmem:[#allocation2 + $0x170] sm:$0xff] }
  0xa1   :  { %12314 = vmatprep.mubr.msk.f32.mxu0 %vm118_vm0, %v15296_v59  ;;  %18042 = vst [vmem:[#allocation16_spill] sm:$0xff] %v15341_v7  ;;  %329 = vst.msk [vmem:[#allocation2 + $0x210] sm:$0xff] %vm118_vm0, %v264_v8  ;;  %v278_v36 = vld [vmem:[%s17972_s0 + $0x1d8] sm:$0xff]  ;;  %v279_v38 = vld [vmem:[%s17972_s0 + $0x1e0] sm:$0xff] }
  0xa2   :  { %330 = vst.msk [vmem:[#allocation2 + $0x218] sm:$0xff] %vm118_vm0, %v265_v9  ;;  %18043 = vst [vmem:[#allocation17_spill] sm:$0xff] %v15355_v10  ;;  %v15459_v39 = vld [vmem:[#allocation2 + $0x178] sm:$0xff]  ;;  %v15461_v41 = vld [vmem:[#allocation2 + $0x180] sm:$0xff] }
  0xa3   :  { %332 = vst.msk [vmem:[#allocation2 + $0x238] sm:$0xff] %vm118_vm0, %v267_v12  ;;  %18044 = vst [vmem:[#allocation18_spill] sm:$0xff] %v15369_v14  ;;  %v280_v42 = vld [vmem:[%s17972_s0 + $0x1e8] sm:$0xff]  ;;  %v281_v44 = vld [vmem:[%s17972_s0 + $0x1f0] sm:$0xff] }
  0xa4   :  { %12315 = vmatmul.mubr.msk.f32.gmra.mrb[16].mxu0 %vm118_vm0, %v15307_v61  ;;  %333 = vst.msk [vmem:[#allocation2 + $0x240] sm:$0xff] %vm118_vm0, %v268_v15  ;;  %334 = vst.msk [vmem:[#allocation2 + $0x248] sm:$0xff] %vm118_vm0, %v269_v16  ;;  %v15475_v45 = vld [vmem:[#allocation2 + $0x188] sm:$0xff]  ;;  %v15477_v46 = vld [vmem:[#allocation2 + $0x1a0] sm:$0xff] }
  0xa5   :  { %12317 = vmatprep.mubr.msk.f32.mxu0 %vm118_vm0, %v15309_v62  ;;  %18045 = vst [vmem:[#allocation19_spill] sm:$0xff] %v15383_v17  ;;  %335 = vst.msk [vmem:[#allocation2 + $0x250] sm:$0xff] %vm118_vm0, %v270_v19  ;;  %v15483_v48 = vld [vmem:[#allocation2 + $0x1a8] sm:$0xff]  ;;  %v2343_v50 = vld [vmem:[#allocation2 + $0x50] sm:$0xff] }
  0xa6   :  { %336 = vst.msk [vmem:[#allocation2 + $0x258] sm:$0xff] %vm118_vm0, %v271_v20  ;;  %337 = vst.msk [vmem:[#allocation2 + $0x260] sm:$0xff] %vm118_vm0, %v272_v23  ;;  %v15488_v52 = vld [vmem:[#allocation2 + $0x58] sm:$0xff]  ;;  %v15492_v53 = vld [vmem:[#allocation5 + $0x28] sm:$0xff] }
  0xa7   :  { %338 = vst.msk [vmem:[#allocation2 + $0x268] sm:$0xff] %vm118_vm0, %v273_v24  ;;  %18046 = vst [vmem:[#allocation20_spill] sm:$0xff] %v15415_v25  ;;  %v2351_v54 = vld [vmem:[#allocation2 + $0xa0] sm:$0xff]  ;;  %v2359_v55 = vld [vmem:[#allocation2 + $0xf0] sm:$0xff] }
  0xa8   :  { %12318 = vmatmul.mubr.msk.f32.gmra.mrb[18].mxu0 %vm118_vm0, %v15322_v2  ;;  %340 = vst.msk [vmem:[#allocation2 + $0x288] sm:$0xff] %vm118_vm0, %v275_v27  ;;  %341 = vst.msk [vmem:[#allocation2 + $0x290] sm:$0xff] %vm118_vm0, %v276_v30  ;;  %v15526_v56 = vld [vmem:[#allocation2 + $0xf8] sm:$0xff]  ;;  %v2367_v58 = vld [vmem:[#allocation2 + $0x140] sm:$0xff] }
  0xa9   :  { %12320 = vmatprep.mubr.msk.f32.mxu0 %vm118_vm0, %v15325_v3  ;;  %342 = vst.msk [vmem:[#allocation2 + $0x298] sm:$0xff] %vm118_vm0, %v277_v31  ;;  %343 = vst.msk [vmem:[#allocation2 + $0x2a0] sm:$0xff] %vm118_vm0, %v278_v36  ;;  %v15543_v60 = vld [vmem:[#allocation2 + $0x148] sm:$0xff]  ;;  %v2375_v63 = vld [vmem:[#allocation2 + $0x190] sm:$0xff] }
  0xaa   :  { %344 = vst.msk [vmem:[#allocation2 + $0x2a8] sm:$0xff] %vm118_vm0, %v279_v38  ;;  %345 = vst.msk [vmem:[#allocation2 + $0x2b0] sm:$0xff] %vm118_vm0, %v280_v42  ;;  %v15560_v1 = vld [vmem:[#allocation2 + $0x198] sm:$0xff]  ;;  %v15566_v4 = vld [vmem:[#allocation2 + $0x1b0] sm:$0xff] }
  0xab   :  { %346 = vst.msk [vmem:[#allocation2 + $0x2b8] sm:$0xff] %vm118_vm0, %v281_v44  ;;  %18047 = vst [vmem:[#allocation21_spill] sm:$0xff] %v15475_v45  ;;  %v258_v5 = vld [vmem:[%s17972_s0 + $0x138] sm:$0xff]  ;;  %v15578_v9 = vld [vmem:[#allocation2 + $0x1c0] sm:$0xff] }
  0xac   :  { %12321 = vmatmul.mubr.msk.f32.gmra.mrb[20].mxu0 %vm118_vm0, %v15339_v6  ;;  %18048 = vst [vmem:[#allocation22_spill] sm:$0xff] %v15483_v48  ;;  %323 = vst.msk [vmem:[#allocation2 + $0x1d0] sm:$0xff] %vm118_vm0, %v258_v5  ;;  %v15576_v8 = vld [vmem:[#allocation2 + $0x1b8] sm:$0xff]  ;;  %v15584_v12 = vld [vmem:[#allocation2 + $0x1c8] sm:$0xff] }
  0xad   :  { %12323 = vmatprep.mubr.msk.f32.mxu0 %vm118_vm0, %v15341_v7  ;;  %v2383_v15 = vld [vmem:[#allocation2 + $0x1e0] sm:$0xff]  ;;  %v15589_v16 = vld [vmem:[#allocation2 + $0x1e8] sm:$0xff]  ;;  %v15591_v19 = vld [vmem:[#allocation2 + $0x1f0] sm:$0xff]  ;;  %347 = vst.msk [vmem:[#allocation2 + $0x2c0] sm:$0xff] %vm118_vm0, %v282_v0 }
  0xae   :  { %v15597_v20 = vld [vmem:[#allocation2 + $0x1f8] sm:$0xff]  ;;  %v15599_v23 = vld [vmem:[#allocation2 + $0x200] sm:$0xff]  ;;  %v15609_v27 = vld [vmem:[#allocation2 + $0x208] sm:$0xff] }
  0xaf   :  { %v266_v24 = vld [vmem:[%s17972_s0 + $0x178] sm:$0xff]  ;;  %v15611_v30 = vld [vmem:[#allocation2 + $0x210] sm:$0xff]  ;;  %v15624_v42 = vld [vmem:[#allocation2 + $0x240] sm:$0xff] }
  0xb0   :  { %12324 = vmatmul.mubr.msk.f32.gmra.mrb[22].mxu0 %vm118_vm0, %v15355_v10  ;;  %331 = vst.msk [vmem:[#allocation2 + $0x220] sm:$0xff] %vm118_vm0, %v266_v24  ;;  %v15617_v31 = vld [vmem:[#allocation2 + $0x218] sm:$0xff]  ;;  %v2391_v36 = vld [vmem:[#allocation2 + $0x230] sm:$0xff]  ;;  %v15630_v44 = vld [vmem:[#allocation2 + $0x248] sm:$0xff] }
  0xb1   :  { %12326 = vmatprep.mubr.msk.f32.mxu0 %vm118_vm0, %v15357_v11  ;;  %v15622_v38 = vld [vmem:[#allocation2 + $0x238] sm:$0xff]  ;;  %v2399_v5 = vld [vmem:[#allocation2 + $0x280] sm:$0xff]  ;;  %v15657_v24 = vld [vmem:[#allocation2 + $0x290] sm:$0xff] }
  0xb2   :  { %v15691_v0 = vld [vmem:[#allocation5 + $0x30] sm:$0xff]  ;;  %v15731_v10 = vld [vmem:[#allocation2 + $0x8] sm:$0xff] }
  0xb3   :  { %12094 = vmatprep.mubr.msk.f32.mxu1 %vm118_vm0, %v15731_v10 }
  0xb4   :  { %12327 = vmatmul.mubr.msk.f32.gmra.mrb[24].mxu0 %vm118_vm0, %v15367_v13 }
  0xb5   :  { %12329 = vmatprep.mubr.msk.f32.mxu0 %vm118_vm0, %v15369_v14 }
  0xb8   :  { %12330 = vmatmul.mubr.msk.f32.gmra.mrb[26].mxu0 %vm118_vm0, %v15383_v17 }
  0xb9   :  { %12332 = vmatprep.mubr.msk.f32.mxu0 %vm118_vm0, %v15385_v18 }
  0xbc   :  { %12333 = vmatmul.mubr.msk.f32.gmra.mrb[28].mxu0 %vm118_vm0, %v15399_v21 }
  0xbd   :  { %12335 = vmatprep.mubr.msk.f32.mxu0 %vm118_vm0, %v15401_v22 }
  0xc0   :  { %12336 = vmatmul.mubr.msk.f32.gmra.mrb[30].mxu0 %vm118_vm0, %v15415_v25  ;;  %v15683_v25 = vld [vmem:[#allocation2 + $0x2b8] sm:$0xff] }
  0xc1   :  { %12338 = vmatprep.mubr.msk.f32.mxu0 %vm118_vm0, %v15417_v26 }
  0xc4   :  { %12339 = vmatmul.mubr.msk.f32.gmra.mrb[32].mxu0 %vm118_vm0, %v15427_v28 }
  0xc5   :  { %12341 = vmatprep.mubr.msk.f32.mxu0 %vm118_vm0, %v15429_v29 }
  0xc8   :  { %12342 = vmatmul.mubr.msk.f32.gmra.mrb[34].mxu0 %vm118_vm0, %v15443_v33 }
  0xc9   :  { %12344 = vmatprep.mubr.msk.f32.mxu0 %vm118_vm0, %v15445_v35 }
  0xcc   :  { %12345 = vmatmul.mubr.msk.f32.gmra.mrb[36].mxu0 %vm118_vm0, %v15459_v39 }
  0xcd   :  { %12347 = vmatprep.mubr.msk.f32.mxu0 %vm118_vm0, %v15461_v41 }
  0xd0   :  { %12348 = vmatmul.mubr.msk.f32.gmra.mrb[38].mxu0 %vm118_vm0, %v15475_v45  ;;  %v15677_v45 = vld [vmem:[#allocation2 + $0x2b0] sm:$0xff] }
  0xd1   :  { %12350 = vmatprep.mubr.msk.f32.mxu0 %vm118_vm0, %v15477_v46 }
  0xd4   :  { %12351 = vmatmul.mubr.msk.f32.gmra.mrb[40].mxu0 %vm118_vm0, %v15483_v48 }
  0xd5   :  { %12388 = vmatprep.mubr.msk.f32.mxu0 %vm118_vm0, %v2343_v50  ;;  %v15632_v50 = vld [vmem:[#allocation2 + $0x250] sm:$0xff] }
  0xd8   :  { %12389 = vmatmul.mubr.msk.f32.vlgmr.msra.gmra.mrb[0].mxu0 %vm118_vm0, %v15488_v52 }
  0xd9   :  { %12485 = vmatpush3.msra.mxu0 %v15247_v47  ;;  %12391 = vmatprep.mubr.msk.f32.mxu0 %vm118_vm0, %v15191_v32  ;;  %v15509_v47 = vld [vmem:[#allocation2 + $0xa8] sm:$0xff] }
  0xda   :  { %12582 = vmatprep.subr.mxu0 %v15492_v53 }
  0xdc   :  { %12392 = vmatmul.mubr.msk.f32.gmra.mrb[2].mxu0 %vm118_vm0, %v15200_v34 }
  0xdd   :  { %12394 = vmatprep.mubr.msk.f32.mxu0 %vm118_vm0, %v15208_v37 }
  0xe0   :  { %12395 = vmatmul.mubr.msk.f32.gmra.mrb[4].mxu0 %vm118_vm0, %v15222_v40 }
  0xe1   :  { %12397 = vmatprep.mubr.msk.f32.mxu0 %vm118_vm0, %v15232_v43 }
  0xe4   :  { %12398 = vmatmul.mubr.msk.f32.gmra.mrb[6].mxu0 %vm118_vm0, %v15258_v49 }
  0xe5   :  { %12400 = vmatprep.mubr.msk.f32.mxu0 %vm118_vm0, %v2351_v54  ;;  %v274_v54 = vld [vmem:[%s17972_s0 + $0x1b8] sm:$0xff] }
  0xe6   :  { %339 = vst.msk [vmem:[#allocation2 + $0x270] sm:$0xff] %vm118_vm0, %v274_v54  ;;  %v15665_v54 = vld [vmem:[#allocation2 + $0x2a0] sm:$0xff] }
  0xe8   :  { %12401 = vmatmul.mubr.msk.f32.gmra.mrb[8].mxu0 %vm118_vm0, %v15509_v47 }
  0xe9   :  { %12403 = vmatprep.mubr.msk.f32.mxu0 %vm118_vm0, %v15296_v59 }
  0xec   :  { %12404 = vmatmul.mubr.msk.f32.gmra.mrb[10].mxu0 %vm118_vm0, %v15307_v61 }
  0xed   :  { %12406 = vmatprep.mubr.msk.f32.mxu0 %vm118_vm0, %v15309_v62 }
  0xf0   :  { %12407 = vmatmul.mubr.msk.f32.gmra.mrb[12].mxu0 %vm118_vm0, %v15322_v2 }
  0xf1   :  { %12409 = vmatprep.mubr.msk.f32.mxu0 %vm118_vm0, %v15325_v3 }
  0xf4   :  { %12410 = vmatmul.mubr.msk.f32.gmra.mrb[14].mxu0 %vm118_vm0, %v15339_v6 }
  0xf5   :  { %12412 = vmatprep.mubr.msk.f32.mxu0 %vm118_vm0, %v2359_v55  ;;  %v15642_v55 = vld [vmem:[#allocation2 + $0x258] sm:$0xff] }
  0xf8   :  { %12413 = vmatmul.mubr.msk.f32.gmra.mrb[16].mxu0 %vm118_vm0, %v15526_v56 }
  0xf9   :  { %12415 = vmatprep.mubr.msk.f32.mxu0 %vm118_vm0, %v15357_v11 }
  0xfc   :  { %12416 = vmatmul.mubr.msk.f32.gmra.mrb[18].mxu0 %vm118_vm0, %v15367_v13 }
  0xfd   :  { %12418 = vmatprep.mubr.msk.f32.mxu0 %vm118_vm0, %v15369_v14 }
 0x100   :  { %12419 = vmatmul.mubr.msk.f32.gmra.mrb[20].mxu0 %vm118_vm0, %v15383_v17 }
 0x101   :  { %12421 = vmatprep.mubr.msk.f32.mxu0 %vm118_vm0, %v15385_v18 }
 0x104   :  { %12422 = vmatmul.mubr.msk.f32.gmra.mrb[22].mxu0 %vm118_vm0, %v15399_v21 }
 0x105   :  { %12424 = vmatprep.mubr.msk.f32.mxu0 %vm118_vm0, %v2367_v58  ;;  %v15644_v58 = vld [vmem:[#allocation2 + $0x260] sm:$0xff] }
 0x108   :  { %12425 = vmatmul.mubr.msk.f32.gmra.mrb[24].mxu0 %vm118_vm0, %v15543_v60 }
 0x109   :  { %12427 = vmatprep.mubr.msk.f32.mxu0 %vm118_vm0, %v15417_v26 }
 0x10c   :  { %12428 = vmatmul.mubr.msk.f32.gmra.mrb[26].mxu0 %vm118_vm0, %v15427_v28 }
 0x10d   :  { %12430 = vmatprep.mubr.msk.f32.mxu0 %vm118_vm0, %v15429_v29 }
 0x110   :  { %12431 = vmatmul.mubr.msk.f32.gmra.mrb[28].mxu0 %vm118_vm0, %v15443_v33 }
 0x111   :  { %12433 = vmatprep.mubr.msk.f32.mxu0 %vm118_vm0, %v15445_v35 }
 0x114   :  { %12434 = vmatmul.mubr.msk.f32.gmra.mrb[30].mxu0 %vm118_vm0, %v15459_v39 }
 0x115   :  { %12436 = vmatprep.mubr.msk.f32.mxu0 %vm118_vm0, %v2375_v63  ;;  %v15650_v63 = vld [vmem:[#allocation2 + $0x268] sm:$0xff] }
 0x118   :  { %12437 = vmatmul.mubr.msk.f32.gmra.mrb[32].mxu0 %vm118_vm0, %v15560_v1 }
 0x119   :  { %12439 = vmatprep.mubr.msk.f32.mxu0 %vm118_vm0, %v15477_v46 }
 0x11c   :  { %12440 = vmatmul.mubr.msk.f32.gmra.mrb[34].mxu0 %vm118_vm0, %v15483_v48 }
 0x11d   :  { %12442 = vmatprep.mubr.msk.f32.mxu0 %vm118_vm0, %v15566_v4 }
 0x120   :  { %12443 = vmatmul.mubr.msk.f32.gmra.mrb[36].mxu0 %vm118_vm0, %v15576_v8 }
 0x121   :  { %12445 = vmatprep.mubr.msk.f32.mxu0 %vm118_vm0, %v15578_v9 }
 0x124   :  { %12446 = vmatmul.mubr.msk.f32.gmra.mrb[38].mxu0 %vm118_vm0, %v15584_v12 }
 0x125   :  { %12448 = vmatprep.mubr.msk.f32.mxu0 %vm118_vm0, %v2383_v15  ;;  %v15655_v15 = vld [vmem:[#allocation2 + $0x288] sm:$0xff] }
 0x128   :  { %12449 = vmatmul.mubr.msk.f32.gmra.mrb[40].mxu0 %vm118_vm0, %v15589_v16 }
 0x129   :  { %12451 = vmatprep.mubr.msk.f32.mxu0 %vm118_vm0, %v15591_v19 }
 0x12c   :  { %12452 = vmatmul.mubr.msk.f32.gmra.mrb[42].mxu0 %vm118_vm0, %v15597_v20 }
 0x12d   :  { %12454 = vmatprep.mubr.msk.f32.mxu0 %vm118_vm0, %v15599_v23 }
 0x130   :  { %12455 = vmatmul.mubr.msk.f32.gmra.mrb[44].mxu0 %vm118_vm0, %v15609_v27 }
 0x131   :  { %12457 = vmatprep.mubr.msk.f32.mxu0 %vm118_vm0, %v15611_v30 }
 0x134   :  { %12458 = vmatmul.mubr.msk.f32.gmra.mrb[46].mxu0 %vm118_vm0, %v15617_v31 }
 0x135   :  { %12460 = vmatprep.mubr.msk.f32.mxu0 %vm118_vm0, %v2391_v36  ;;  %v15663_v36 = vld [vmem:[#allocation2 + $0x298] sm:$0xff] }
 0x138   :  { %12461 = vmatmul.mubr.msk.f32.gmra.mrb[48].mxu0 %vm118_vm0, %v15622_v38 }
 0x139   :  { %12463 = vmatprep.mubr.msk.f32.mxu0 %vm118_vm0, %v15624_v42 }
 0x13c   :  { %12464 = vmatmul.mubr.msk.f32.gmra.mrb[50].mxu0 %vm118_vm0, %v15630_v44 }
 0x13d   :  { %12466 = vmatprep.mubr.msk.f32.mxu0 %vm118_vm0, %v15632_v50 }
 0x140   :  { %12467 = vmatmul.mubr.msk.f32.gmra.mrb[52].mxu0 %vm118_vm0, %v15642_v55 }
 0x141   :  { %12469 = vmatprep.mubr.msk.f32.mxu0 %vm118_vm0, %v15644_v58 }
 0x144   :  { %12470 = vmatmul.mubr.msk.f32.gmra.mrb[54].mxu0 %vm118_vm0, %v15650_v63 }
 0x145   :  { %12472 = vmatprep.mubr.msk.f32.mxu0 %vm118_vm0, %v2399_v5  ;;  %v15675_v5 = vld [vmem:[#allocation2 + $0x2a8] sm:$0xff] }
 0x148   :  { %12473 = vmatmul.mubr.msk.f32.gmra.mrb[56].mxu0 %vm118_vm0, %v15655_v15 }
 0x149   :  { %12475 = vmatprep.mubr.msk.f32.mxu0 %vm118_vm0, %v15657_v24 }
 0x14c   :  { %12476 = vmatmul.mubr.msk.f32.gmra.mrb[58].mxu0 %vm118_vm0, %v15663_v36 }
 0x14d   :  { %12478 = vmatprep.mubr.msk.f32.mxu0 %vm118_vm0, %v15665_v54 }
 0x150   :  { %12479 = vmatmul.mubr.msk.f32.gmra.mrb[60].mxu0 %vm118_vm0, %v15675_v5 }
 0x151   :  { %12481 = vmatprep.mubr.msk.f32.mxu0 %vm118_vm0, %v15677_v45 }
 0x154   :  { %12482 = vmatmul.mubr.msk.f32.gmra.mrb[62].mxu0 %vm118_vm0, %v15683_v25 }
 0x155   :  { %12486 = vmatprep.mubr.msk.f32.mxu0 %vm118_vm0, %v15488_v52 }
 0x158   :  { %12487 = vmatmul.mubr.msk.f32.vlgmr.msra.gmra.mrb[0].mxu0 %vm118_vm0, %v15191_v32 }
 0x159   :  { %12583 = vmatpush3.msra.mxu0 %v15492_v53  ;;  %12489 = vmatprep.mubr.msk.f32.mxu0 %vm118_vm0, %v15200_v34  ;;  %v479_v53 = vld [vmem:[#allocation5 + $0x8] sm:$0xff] }
 0x15a   :  { %12680 = vmatprep.subr.mxu0 %v15691_v0  ;;  %12092 = vmatprep.subr.mxu1 %v479_v53 }
 0x15b   :  { %12093 = vmatpush3.msra.mxu1 %v479_v53  ;;  %v15755_v53 = vld [vmem:[#allocation2 + $0x28] sm:$0xff] }
 0x15c   :  { %12490 = vmatmul.mubr.msk.f32.gmra.mrb[2].mxu0 %vm118_vm0, %v15208_v37 }
 0x15d   :  { %12492 = vmatprep.mubr.msk.f32.mxu0 %vm118_vm0, %v15222_v40 }
 0x160   :  { %12493 = vmatmul.mubr.msk.f32.gmra.mrb[4].mxu0 %vm118_vm0, %v15232_v43 }
 0x161   :  { %12495 = vmatprep.mubr.msk.f32.mxu0 %vm118_vm0, %v15258_v49 }
 0x164   :  { %12496 = vmatmul.mubr.msk.f32.gmra.mrb[6].mxu0 %vm118_vm0, %v15264_v51 }
 0x165   :  { %12498 = vmatprep.mubr.msk.f32.mxu0 %vm118_vm0, %v15509_v47 }
 0x168   :  { %12499 = vmatmul.mubr.msk.f32.gmra.mrb[8].mxu0 %vm118_vm0, %v15296_v59 }
 0x169   :  { %12501 = vmatprep.mubr.msk.f32.mxu0 %vm118_vm0, %v15307_v61 }
 0x16c   :  { %12502 = vmatmul.mubr.msk.f32.gmra.mrb[10].mxu0 %vm118_vm0, %v15309_v62 }
 0x16d   :  { %12504 = vmatprep.mubr.msk.f32.mxu0 %vm118_vm0, %v15322_v2 }
 0x170   :  { %12505 = vmatmul.mubr.msk.f32.gmra.mrb[12].mxu0 %vm118_vm0, %v15325_v3 }
 0x171   :  { %12507 = vmatprep.mubr.msk.f32.mxu0 %vm118_vm0, %v15339_v6 }
 0x174   :  { %12508 = vmatmul.mubr.msk.f32.gmra.mrb[14].mxu0 %vm118_vm0, %v15341_v7  ;;  %v15735_v7 = vld [vmem:[#allocation2 + $0x10] sm:$0xff] }
 0x175   :  { %12510 = vmatprep.mubr.msk.f32.mxu0 %vm118_vm0, %v15526_v56  ;;  %18049 = vst [vmem:[#allocation23_spill] sm:$0xff] %v15735_v7  ;;  %12095 = vmatmul.mubr.msk.f32.vlgmr.msra.gmra.mrb[0].mxu1 %vm118_vm0, %v15735_v7  ;;  %v15761_v7 = vld [vmem:[#allocation2 + $0x30] sm:$0xff] }
 0x176   :  { %18052 = vst [vmem:[#allocation26_spill] sm:$0xff] %v15761_v7 }
 0x178   :  { %12511 = vmatmul.mubr.msk.f32.gmra.mrb[16].mxu0 %vm118_vm0, %v15357_v11 }
 0x179   :  { %12513 = vmatprep.mubr.msk.f32.mxu0 %vm118_vm0, %v15367_v13 }
 0x17c   :  { %12514 = vmatmul.mubr.msk.f32.gmra.mrb[18].mxu0 %vm118_vm0, %v15369_v14  ;;  %v15743_v14 = vld [vmem:[#allocation2 + $0x18] sm:$0xff] }
 0x17d   :  { %12516 = vmatprep.mubr.msk.f32.mxu0 %vm118_vm0, %v15383_v17  ;;  %18050 = vst [vmem:[#allocation24_spill] sm:$0xff] %v15743_v14  ;;  %12097 = vmatprep.mubr.msk.f32.mxu1 %vm118_vm0, %v15743_v14  ;;  %v15749_v17 = vld [vmem:[#allocation2 + $0x20] sm:$0xff] }
 0x17e   :  { %18051 = vst [vmem:[#allocation25_spill] sm:$0xff] %v15749_v17  ;;  %12098 = vmatmul.mubr.msk.f32.gmra.mrb[2].mxu1 %vm118_vm0, %v15749_v17  ;;  %v15767_v17 = vld [vmem:[#allocation2 + $0x38] sm:$0xff]  ;;  %v421_v14 = vld [vmem:[#allocation2 + $0x40] sm:$0xff] }
 0x17f   :  { %12100 = vmatprep.mubr.msk.f32.mxu1 %vm118_vm0, %v15755_v53  ;;  %18053 = vst [vmem:[#allocation27_spill] sm:$0xff] %v15767_v17 }
 0x180   :  { %12517 = vmatmul.mubr.msk.f32.gmra.mrb[20].mxu0 %vm118_vm0, %v15385_v18 }
 0x181   :  { %12519 = vmatprep.mubr.msk.f32.mxu0 %vm118_vm0, %v15399_v21 }
 0x182   :  { %12101 = vmatmul.mubr.msk.f32.gmra.mrb[4].mxu1 %vm118_vm0, %v15761_v7  ;;  %v15780_v7 = vld [vmem:[#allocation2 + $0x60] sm:$0xff] }
 0x183   :  { %12103 = vmatprep.mubr.msk.f32.mxu1 %vm118_vm0, %v15767_v17  ;;  %18054 = vst [vmem:[#allocation28_spill] sm:$0xff] %v15780_v7  ;;  %v15786_v17 = vld [vmem:[#allocation2 + $0x68] sm:$0xff] }
 0x184   :  { %12520 = vmatmul.mubr.msk.f32.gmra.mrb[22].mxu0 %vm118_vm0, %v15401_v22  ;;  %18055 = vst [vmem:[#allocation29_spill] sm:$0xff] %v15786_v17 }
 0x185   :  { %12522 = vmatprep.mubr.msk.f32.mxu0 %vm118_vm0, %v15543_v60 }
 0x186   :  { %12104 = vmatmul.mubr.msk.f32.gmra.mrb[6].mxu1 %vm118_vm0, %v421_v14  ;;  %v15792_v14 = vld [vmem:[#allocation2 + $0x70] sm:$0xff] }
 0x187   :  { %12106 = vmatprep.mubr.msk.f32.mxu1 %vm118_vm0, %v15488_v52  ;;  %18056 = vst [vmem:[#allocation30_spill] sm:$0xff] %v15792_v14  ;;  %v15798_v52 = vld [vmem:[#allocation2 + $0x78] sm:$0xff] }
 0x188   :  { %12523 = vmatmul.mubr.msk.f32.gmra.mrb[24].mxu0 %vm118_vm0, %v15417_v26 }
 0x189   :  { %12525 = vmatprep.mubr.msk.f32.mxu0 %vm118_vm0, %v15427_v28 }
 0x18a   :  { %12107 = vmatmul.mubr.msk.f32.gmra.mrb[8].mxu1 %vm118_vm0, %v15780_v7  ;;  %v15804_v7 = vld [vmem:[#allocation2 + $0x80] sm:$0xff] }
 0x18b   :  { %12109 = vmatprep.mubr.msk.f32.mxu1 %vm118_vm0, %v15786_v17  ;;  %18057 = vst [vmem:[#allocation31_spill] sm:$0xff] %v15804_v7  ;;  %v429_v17 = vld [vmem:[#allocation2 + $0x90] sm:$0xff] }
 0x18c   :  { %12526 = vmatmul.mubr.msk.f32.gmra.mrb[26].mxu0 %vm118_vm0, %v15429_v29 }
 0x18d   :  { %12528 = vmatprep.mubr.msk.f32.mxu0 %vm118_vm0, %v15443_v33 }
 0x18e   :  { %12110 = vmatmul.mubr.msk.f32.gmra.mrb[10].mxu1 %vm118_vm0, %v15792_v14  ;;  %v15810_v14 = vld [vmem:[#allocation2 + $0x88] sm:$0xff] }
 0x18f   :  { %12112 = vmatprep.mubr.msk.f32.mxu1 %vm118_vm0, %v15798_v52  ;;  %18058 = vst [vmem:[#allocation32_spill] sm:$0xff] %v15810_v14 }
 0x190   :  { %12529 = vmatmul.mubr.msk.f32.gmra.mrb[28].mxu0 %vm118_vm0, %v15445_v35 }
 0x191   :  { %12531 = vmatprep.mubr.msk.f32.mxu0 %vm118_vm0, %v15459_v39 }
 0x192   :  { %12113 = vmatmul.mubr.msk.f32.gmra.mrb[12].mxu1 %vm118_vm0, %v15804_v7  ;;  %v15823_v7 = vld [vmem:[#allocation2 + $0xb0] sm:$0xff] }
 0x193   :  { %12115 = vmatprep.mubr.msk.f32.mxu1 %vm118_vm0, %v15810_v14  ;;  %18059 = vst [vmem:[#allocation33_spill] sm:$0xff] %v15823_v7  ;;  %v15829_v14 = vld [vmem:[#allocation2 + $0xb8] sm:$0xff] }
 0x194   :  { %12532 = vmatmul.mubr.msk.f32.gmra.mrb[30].mxu0 %vm118_vm0, %v15461_v41  ;;  %18060 = vst [vmem:[#allocation34_spill] sm:$0xff] %v15829_v14 }
 0x195   :  { %12534 = vmatprep.mubr.msk.f32.mxu0 %vm118_vm0, %v15560_v1 }
 0x196   :  { %12116 = vmatmul.mubr.msk.f32.gmra.mrb[14].mxu1 %vm118_vm0, %v429_v17  ;;  %v15833_v17 = vld [vmem:[#allocation2 + $0x1d0] sm:$0xff] }
 0x197   :  { %12118 = vmatprep.mubr.msk.f32.mxu1 %vm118_vm0, %v15509_v47  ;;  %v15837_v47 = vld [vmem:[#allocation2 + $0xc0] sm:$0xff] }
 0x198   :  { %12535 = vmatmul.mubr.msk.f32.gmra.mrb[32].mxu0 %vm118_vm0, %v15477_v46  ;;  %18061 = vst [vmem:[#allocation35_spill] sm:$0xff] %v15837_v47 }
 0x199   :  { %12537 = vmatprep.mubr.msk.f32.mxu0 %vm118_vm0, %v15483_v48  ;;  %v15849_v48 = vld [vmem:[#allocation2 + $0xd0] sm:$0xff] }
 0x19a   :  { %12119 = vmatmul.mubr.msk.f32.gmra.mrb[16].mxu1 %vm118_vm0, %v15823_v7  ;;  %v15843_v7 = vld [vmem:[#allocation2 + $0xc8] sm:$0xff]  ;;  %18063 = vst [vmem:[#allocation37_spill] sm:$0xff] %v15849_v48 }
 0x19b   :  { %12121 = vmatprep.mubr.msk.f32.mxu1 %vm118_vm0, %v15829_v14  ;;  %18062 = vst [vmem:[#allocation36_spill] sm:$0xff] %v15843_v7  ;;  %v15861_v14 = vld [vmem:[#allocation2 + $0xe0] sm:$0xff] }
 0x19c   :  { %12538 = vmatmul.mubr.msk.f32.gmra.mrb[34].mxu0 %vm118_vm0, %v15566_v4  ;;  %18065 = vst [vmem:[#allocation39_spill] sm:$0xff] %v15861_v14 }
 0x19d   :  { %12540 = vmatprep.mubr.msk.f32.mxu0 %vm118_vm0, %v15576_v8 }
 0x19e   :  { %12122 = vmatmul.mubr.msk.f32.gmra.mrb[18].mxu1 %vm118_vm0, %v15837_v47  ;;  %v15855_v47 = vld [vmem:[#allocation2 + $0xd8] sm:$0xff] }
 0x19f   :  { %12124 = vmatprep.mubr.msk.f32.mxu1 %vm118_vm0, %v15843_v7  ;;  %18064 = vst [vmem:[#allocation38_spill] sm:$0xff] %v15855_v47  ;;  %v15897_v7 = vld [vmem:[#allocation2 + $0x120] sm:$0xff] }
 0x1a0   :  { %12541 = vmatmul.mubr.msk.f32.gmra.mrb[36].mxu0 %vm118_vm0, %v15578_v9  ;;  %18070 = vst [vmem:[#allocation44_spill] sm:$0xff] %v15897_v7 }
 0x1a1   :  { %12543 = vmatprep.mubr.msk.f32.mxu0 %vm118_vm0, %v15584_v12 }
 0x1a2   :  { %12125 = vmatmul.mubr.msk.f32.gmra.mrb[20].mxu1 %vm118_vm0, %v15849_v48  ;;  %v15871_v48 = vld [vmem:[#allocation2 + $0x100] sm:$0xff] }
 0x1a3   :  { %12127 = vmatprep.mubr.msk.f32.mxu1 %vm118_vm0, %v15855_v47  ;;  %18066 = vst [vmem:[#allocation40_spill] sm:$0xff] %v15871_v48  ;;  %v15877_v47 = vld [vmem:[#allocation2 + $0x108] sm:$0xff] }
 0x1a4   :  { %12544 = vmatmul.mubr.msk.f32.gmra.mrb[38].mxu0 %vm118_vm0, %v15833_v17  ;;  %18067 = vst [vmem:[#allocation41_spill] sm:$0xff] %v15877_v47 }
 0x1a5   :  { %12546 = vmatprep.mubr.msk.f32.mxu0 %vm118_vm0, %v15589_v16 }
 0x1a6   :  { %12128 = vmatmul.mubr.msk.f32.gmra.mrb[22].mxu1 %vm118_vm0, %v15861_v14  ;;  %v15881_v14 = vld [vmem:[#allocation2 + $0x220] sm:$0xff] }
 0x1a7   :  { %12130 = vmatprep.mubr.msk.f32.mxu1 %vm118_vm0, %v15526_v56  ;;  %v15885_v56 = vld [vmem:[#allocation2 + $0x110] sm:$0xff] }
 0x1a8   :  { %12547 = vmatmul.mubr.msk.f32.gmra.mrb[40].mxu0 %vm118_vm0, %v15591_v19  ;;  %18068 = vst [vmem:[#allocation42_spill] sm:$0xff] %v15885_v56 }
 0x1a9   :  { %12549 = vmatprep.mubr.msk.f32.mxu0 %vm118_vm0, %v15597_v20 }
 0x1aa   :  { %12131 = vmatmul.mubr.msk.f32.gmra.mrb[24].mxu1 %vm118_vm0, %v15871_v48  ;;  %v15891_v48 = vld [vmem:[#allocation2 + $0x118] sm:$0xff] }
 0x1ab   :  { %12133 = vmatprep.mubr.msk.f32.mxu1 %vm118_vm0, %v15877_v47  ;;  %18069 = vst [vmem:[#allocation43_spill] sm:$0xff] %v15891_v48  ;;  %v15909_v47 = vld [vmem:[#allocation2 + $0x130] sm:$0xff] }
 0x1ac   :  { %12550 = vmatmul.mubr.msk.f32.gmra.mrb[42].mxu0 %vm118_vm0, %v15599_v23  ;;  %18072 = vst [vmem:[#allocation46_spill] sm:$0xff] %v15909_v47 }
 0x1ad   :  { %12552 = vmatprep.mubr.msk.f32.mxu0 %vm118_vm0, %v15609_v27 }
 0x1ae   :  { %12134 = vmatmul.mubr.msk.f32.gmra.mrb[26].mxu1 %vm118_vm0, %v15885_v56  ;;  %v15903_v56 = vld [vmem:[#allocation2 + $0x128] sm:$0xff] }
 0x1af   :  { %12136 = vmatprep.mubr.msk.f32.mxu1 %vm118_vm0, %v15891_v48  ;;  %18071 = vst [vmem:[#allocation45_spill] sm:$0xff] %v15903_v56  ;;  %v15945_v48 = vld [vmem:[#allocation2 + $0x170] sm:$0xff] }
 0x1b0   :  { %12553 = vmatmul.mubr.msk.f32.gmra.mrb[44].mxu0 %vm118_vm0, %v15611_v30  ;;  %18075 = vst [vmem:[#allocation49_spill] sm:$0xff] %v15945_v48 }
 0x1b1   :  { %12555 = vmatprep.mubr.msk.f32.mxu0 %vm118_vm0, %v15617_v31 }
 0x1b2   :  { %12137 = vmatmul.mubr.msk.f32.gmra.mrb[28].mxu1 %vm118_vm0, %v15897_v7  ;;  %v15919_v7 = vld [vmem:[#allocation2 + $0x150] sm:$0xff] }
 0x1b3   :  { %12139 = vmatprep.mubr.msk.f32.mxu1 %vm118_vm0, %v15903_v56  ;;  %18073 = vst [vmem:[#allocation47_spill] sm:$0xff] %v15919_v7  ;;  %v15925_v56 = vld [vmem:[#allocation2 + $0x158] sm:$0xff] }
 0x1b4   :  { %12556 = vmatmul.mubr.msk.f32.gmra.mrb[46].mxu0 %vm118_vm0, %v15881_v14 }
 0x1b5   :  { %12558 = vmatprep.mubr.msk.f32.mxu0 %vm118_vm0, %v15622_v38 }
 0x1b6   :  { %12140 = vmatmul.mubr.msk.f32.gmra.mrb[30].mxu1 %vm118_vm0, %v15909_v47  ;;  %v15929_v47 = vld [vmem:[#allocation2 + $0x270] sm:$0xff] }
 0x1b7   :  { %12142 = vmatprep.mubr.msk.f32.mxu1 %vm118_vm0, %v15543_v60  ;;  %v15933_v60 = vld [vmem:[#allocation2 + $0x160] sm:$0xff] }
 0x1b8   :  { %12559 = vmatmul.mubr.msk.f32.gmra.mrb[48].mxu0 %vm118_vm0, %v15624_v42  ;;  %18074 = vst [vmem:[#allocation48_spill] sm:$0xff] %v15933_v60 }
 0x1b9   :  { %12561 = vmatprep.mubr.msk.f32.mxu0 %vm118_vm0, %v15630_v44 }
 0x1ba   :  { %12143 = vmatmul.mubr.msk.f32.gmra.mrb[32].mxu1 %vm118_vm0, %v15919_v7  ;;  %v15939_v7 = vld [vmem:[#allocation2 + $0x168] sm:$0xff] }
 0x1bb   :  { %12145 = vmatprep.mubr.msk.f32.mxu1 %vm118_vm0, %v15925_v56 }
 0x1bc   :  { %12562 = vmatmul.mubr.msk.f32.gmra.mrb[50].mxu0 %vm118_vm0, %v15632_v50 }
 0x1bd   :  { %12564 = vmatprep.mubr.msk.f32.mxu0 %vm118_vm0, %v15642_v55 }
 0x1be   :  { %12146 = vmatmul.mubr.msk.f32.gmra.mrb[34].mxu1 %vm118_vm0, %v15933_v60  ;;  %v15951_v60 = vld [vmem:[#allocation2 + $0x178] sm:$0xff] }
 0x1bf   :  { %12148 = vmatprep.mubr.msk.f32.mxu1 %vm118_vm0, %v15939_v7  ;;  %18076 = vst [vmem:[#allocation50_spill] sm:$0xff] %v15951_v60 }
 0x1c0   :  { %12565 = vmatmul.mubr.msk.f32.gmra.mrb[52].mxu0 %vm118_vm0, %v15644_v58 }
 0x1c1   :  { %12567 = vmatprep.mubr.msk.f32.mxu0 %vm118_vm0, %v15650_v63 }
 0x1c2   :  { %12149 = vmatmul.mubr.msk.f32.gmra.mrb[36].mxu1 %vm118_vm0, %v15945_v48  ;;  %v15967_v48 = vld [vmem:[#allocation2 + $0x1a0] sm:$0xff] }
 0x1c3   :  { %12151 = vmatprep.mubr.msk.f32.mxu1 %vm118_vm0, %v15951_v60  ;;  %v15973_v60 = vld [vmem:[#allocation2 + $0x1a8] sm:$0xff] }
 0x1c4   :  { %12568 = vmatmul.mubr.msk.f32.gmra.mrb[54].mxu0 %vm118_vm0, %v15929_v47 }
 0x1c5   :  { %12570 = vmatprep.mubr.msk.f32.mxu0 %vm118_vm0, %v15655_v15  ;;  %v15957_v15 = vld [vmem:[#allocation2 + $0x180] sm:$0xff] }
 0x1c6   :  { %18077 = vst [vmem:[#allocation51_spill] sm:$0xff] %v15957_v15  ;;  %12152 = vmatmul.mubr.msk.f32.gmra.mrb[38].mxu1 %vm118_vm0, %v15957_v15  ;;  %v15977_v15 = vld [vmem:[#allocation2 + $0x2c0] sm:$0xff] }
 0x1c7   :  { %12154 = vmatprep.mubr.msk.f32.mxu1 %vm118_vm0, %v15560_v1  ;;  %v15993_v1 = vld [vmem:[#allocation5 + $0x38] sm:$0xff] }
 0x1c8   :  { %12571 = vmatmul.mubr.msk.f32.gmra.mrb[56].mxu0 %vm118_vm0, %v15657_v24 }
 0x1c9   :  { %12573 = vmatprep.mubr.msk.f32.mxu0 %vm118_vm0, %v15663_v36 }
 0x1ca   :  { %12155 = vmatmul.mubr.msk.f32.gmra.mrb[40].mxu1 %vm118_vm0, %v15967_v48 }
 0x1cb   :  { %12157 = vmatprep.mubr.msk.f32.mxu1 %vm118_vm0, %v15973_v60 }
 0x1cc   :  { %12574 = vmatmul.mubr.msk.f32.gmra.mrb[58].mxu0 %vm118_vm0, %v15665_v54 }
 0x1cd   :  { %12576 = vmatprep.mubr.msk.f32.mxu0 %vm118_vm0, %v15675_v5 }
 0x1ce   :  { %12158 = vmatmul.mubr.msk.f32.gmra.mrb[42].mxu1 %vm118_vm0, %v15566_v4 }
 0x1cf   :  { %12160 = vmatprep.mubr.msk.f32.mxu1 %vm118_vm0, %v15576_v8 }
 0x1d0   :  { %12577 = vmatmul.mubr.msk.f32.gmra.mrb[60].mxu0 %vm118_vm0, %v15677_v45 }
 0x1d1   :  { %12579 = vmatprep.mubr.msk.f32.mxu0 %vm118_vm0, %v15683_v25 }
 0x1d2   :  { %12161 = vmatmul.mubr.msk.f32.gmra.mrb[44].mxu1 %vm118_vm0, %v15578_v9 }
 0x1d3   :  { %12163 = vmatprep.mubr.msk.f32.mxu1 %vm118_vm0, %v15584_v12 }
 0x1d4   :  { %12580 = vmatmul.mubr.msk.f32.gmra.mrb[62].mxu0 %vm118_vm0, %v15977_v15 }
 0x1d5   :  { %12584 = vmatprep.mubr.msk.f32.mxu0 %vm118_vm0, %v15191_v32  ;;  %v18078_v32 = vld [vmem:[#allocation16_spill] sm:$0xff] }
 0x1d6   :  { %12164 = vmatmul.mubr.msk.f32.gmra.mrb[46].mxu1 %vm118_vm0, %v15833_v17 }
 0x1d7   :  { %12166 = vmatprep.mubr.msk.f32.mxu1 %vm118_vm0, %v15589_v16  ;;  %v16174_v16 = vld [vmem:[#allocation2 + $0xf8] sm:$0xff] }
 0x1d8   :  { %12585 = vmatmul.mubr.msk.f32.vlgmr.msra.gmra.mrb[0].mxu0 %vm118_vm0, %v15200_v34  ;;  %v18079_v34 = vld [vmem:[#allocation17_spill] sm:$0xff] }
 0x1d9   :  { %12681 = vmatpush3.msra.mxu0 %v15691_v0  ;;  %12587 = vmatprep.mubr.msk.f32.mxu0 %vm118_vm0, %v15208_v37  ;;  %v18080_v37 = vld [vmem:[#allocation18_spill] sm:$0xff]  ;;  %v18106_v0 = vld [vmem:[#allocation45_spill] sm:$0xff] }
 0x1da   :  { %12778 = vmatprep.subr.mxu0 %v15993_v1  ;;  %12167 = vmatmul.mubr.msk.f32.gmra.mrb[48].mxu1 %vm118_vm0, %v15591_v19 }
 0x1db   :  { %12169 = vmatprep.mubr.msk.f32.mxu1 %vm118_vm0, %v15597_v20 }
 0x1dc   :  { %12588 = vmatmul.mubr.msk.f32.gmra.mrb[2].mxu0 %vm118_vm0, %v15222_v40  ;;  %v18081_v40 = vld [vmem:[#allocation19_spill] sm:$0xff] }
 0x1dd   :  { %12590 = vmatprep.mubr.msk.f32.mxu0 %vm118_vm0, %v15232_v43  ;;  %v412_v43 = vld [vmem:[#allocation5] sm:$0xff] }
 0x1de   :  { %12170 = vmatmul.mubr.msk.f32.gmra.mrb[50].mxu1 %vm118_vm0, %v15599_v23  ;;  %12190 = vmatprep.subr.mxu1 %v412_v43 }
 0x1df   :  { %12172 = vmatprep.mubr.msk.f32.mxu1 %vm118_vm0, %v15609_v27  ;;  %12191 = vmatpush3.msra.mxu1 %v412_v43  ;;  %v16345_v43 = vld [vmem:[#allocation2 + $0x238] sm:$0xff] }
 0x1e0   :  { %12591 = vmatmul.mubr.msk.f32.gmra.mrb[4].mxu0 %vm118_vm0, %v15258_v49  ;;  %v348_v49 = vld [vmem:[#allocation2] sm:$0xff] }
 0x1e1   :  { %12593 = vmatprep.mubr.msk.f32.mxu0 %vm118_vm0, %v15264_v51  ;;  %v14604_v51 = vld [vmem:[#allocation5 + $0x10] sm:$0xff] }
 0x1e2   :  { %12173 = vmatmul.mubr.msk.f32.gmra.mrb[52].mxu1 %vm118_vm0, %v15611_v30  ;;  %13912 = vmatprep.subr.mxu1 %v14604_v51 }
 0x1e3   :  { %12175 = vmatprep.mubr.msk.f32.mxu1 %vm118_vm0, %v15617_v31 }
 0x1e4   :  { %12594 = vmatmul.mubr.msk.f32.gmra.mrb[6].mxu0 %vm118_vm0, %v15290_v57  ;;  %v18082_v57 = vld [vmem:[#allocation23_spill] sm:$0xff] }
 0x1e5   :  { %12596 = vmatprep.mubr.msk.f32.mxu0 %vm118_vm0, %v15296_v59  ;;  %v18083_v59 = vld [vmem:[#allocation24_spill] sm:$0xff] }
 0x1e6   :  { %12176 = vmatmul.mubr.msk.f32.gmra.mrb[54].mxu1 %vm118_vm0, %v15881_v14 }
 0x1e7   :  { %12178 = vmatprep.mubr.msk.f32.mxu1 %vm118_vm0, %v15622_v38  ;;  %v16202_v38 = vld [vmem:[#allocation2 + $0x140] sm:$0xff] }
 0x1e8   :  { %12597 = vmatmul.mubr.msk.f32.gmra.mrb[8].mxu0 %vm118_vm0, %v15307_v61  ;;  %v18084_v61 = vld [vmem:[#allocation20_spill] sm:$0xff] }
 0x1e9   :  { %12599 = vmatprep.mubr.msk.f32.mxu0 %vm118_vm0, %v15309_v62  ;;  %v18085_v62 = vld [vmem:[#allocation25_spill] sm:$0xff] }
 0x1ea   :  { %12179 = vmatmul.mubr.msk.f32.gmra.mrb[56].mxu1 %vm118_vm0, %v15624_v42 }
 0x1eb   :  { %12181 = vmatprep.mubr.msk.f32.mxu1 %vm118_vm0, %v15630_v44 }
 0x1ec   :  { %12600 = vmatmul.mubr.msk.f32.gmra.mrb[10].mxu0 %vm118_vm0, %v15322_v2  ;;  %v18086_v2 = vld [vmem:[#allocation26_spill] sm:$0xff] }
 0x1ed   :  { %12602 = vmatprep.mubr.msk.f32.mxu0 %vm118_vm0, %v15325_v3  ;;  %v18087_v3 = vld [vmem:[#allocation27_spill] sm:$0xff] }
 0x1ee   :  { %12182 = vmatmul.mubr.msk.f32.gmra.mrb[58].mxu1 %vm118_vm0, %v15632_v50 }
 0x1ef   :  { %12184 = vmatprep.mubr.msk.f32.mxu1 %vm118_vm0, %v15642_v55 }
 0x1f0   :  { %12603 = vmatmul.mubr.msk.f32.gmra.mrb[12].mxu0 %vm118_vm0, %v15339_v6  ;;  %v356_v6 = vld [vmem:[#allocation2 + $0x50] sm:$0xff] }
 0x1f1   :  { %12605 = vmatprep.mubr.msk.f32.mxu0 %vm118_vm0, %v18078_v32  ;;  %v16321_v32 = vld [vmem:[#allocation2 + $0x208] sm:$0xff] }
 0x1f2   :  { %12185 = vmatmul.mubr.msk.f32.gmra.mrb[60].mxu1 %vm118_vm0, %v15644_v58 }
 0x1f3   :  { %12187 = vmatprep.mubr.msk.f32.mxu1 %vm118_vm0, %v15650_v63 }
 0x1f4   :  { %12606 = vmatmul.mubr.msk.f32.gmra.mrb[14].mxu0 %vm118_vm0, %v18079_v34  ;;  %v16323_v34 = vld [vmem:[#allocation2 + $0x210] sm:$0xff] }
 0x1f5   :  { %12608 = vmatprep.mubr.msk.f32.mxu0 %vm118_vm0, %v15357_v11  ;;  %v18088_v11 = vld [vmem:[#allocation28_spill] sm:$0xff] }
 0x1f6   :  { %12188 = vmatmul.mubr.msk.f32.gmra.mrb[62].mxu1 %vm118_vm0, %v15929_v47 }
 0x1f7   :  { %12192 = vmatprep.mubr.msk.f32.mxu1 %vm118_vm0, %v348_v49  ;;  %v16347_v49 = vld [vmem:[#allocation2 + $0x240] sm:$0xff] }
 0x1f8   :  { %12609 = vmatmul.mubr.msk.f32.gmra.mrb[16].mxu0 %vm118_vm0, %v15367_v13  ;;  %v18089_v13 = vld [vmem:[#allocation29_spill] sm:$0xff] }
 0x1f9   :  { %12611 = vmatprep.mubr.msk.f32.mxu0 %vm118_vm0, %v18080_v37  ;;  %v16333_v37 = vld [vmem:[#allocation2 + $0x218] sm:$0xff] }
 0x1fa   :  { %12193 = vmatmul.mubr.msk.f32.vlgmr.msra.gmra.mrb[0].mxu1 %vm118_vm0, %v15731_v10  ;;  %v357_v10 = vld [vmem:[#allocation2 + $0x58] sm:$0xff] }
 0x1fb   :  { %12195 = vmatprep.mubr.msk.f32.mxu1 %vm118_vm0, %v18082_v57  ;;  %13913 = vmatpush3.msra.mxu1 %v14604_v51  ;;  %v16357_v51 = vld [vmem:[#allocation2 + $0x248] sm:$0xff]  ;;  %v16359_v57 = vld [vmem:[#allocation2 + $0x250] sm:$0xff] }
 0x1fc   :  { %12612 = vmatmul.mubr.msk.f32.gmra.mrb[18].mxu0 %vm118_vm0, %v18081_v40  ;;  %v16335_v40 = vld [vmem:[#allocation2 + $0x230] sm:$0xff] }
 0x1fd   :  { %12614 = vmatprep.mubr.msk.f32.mxu0 %vm118_vm0, %v15385_v18  ;;  %v18090_v18 = vld [vmem:[#allocation21_spill] sm:$0xff] }
 0x1fe   :  { %12196 = vmatmul.mubr.msk.f32.gmra.mrb[2].mxu1 %vm118_vm0, %v18083_v59  ;;  %v16369_v59 = vld [vmem:[#allocation2 + $0x258] sm:$0xff] }
 0x1ff   :  { %12198 = vmatprep.mubr.msk.f32.mxu1 %vm118_vm0, %v18085_v62  ;;  %v16381_v62 = vld [vmem:[#allocation2 + $0x268] sm:$0xff] }
 0x200   :  { %12615 = vmatmul.mubr.msk.f32.gmra.mrb[20].mxu0 %vm118_vm0, %v15399_v21  ;;  %v18091_v21 = vld [vmem:[#allocation30_spill] sm:$0xff] }
 0x201   :  { %12617 = vmatprep.mubr.msk.f32.mxu0 %vm118_vm0, %v15401_v22  ;;  %v18092_v22 = vld [vmem:[#allocation22_spill] sm:$0xff] }
 0x202   :  { %12199 = vmatmul.mubr.msk.f32.gmra.mrb[4].mxu1 %vm118_vm0, %v15755_v53  ;;  %v18110_v53 = vld [vmem:[#allocation50_spill] sm:$0xff] }
 0x203   :  { %12201 = vmatprep.mubr.msk.f32.mxu1 %vm118_vm0, %v18086_v2  ;;  %v16403_v2 = vld [vmem:[#allocation2 + $0x1d0] sm:$0xff] }
 0x204   :  { %12618 = vmatmul.mubr.msk.f32.gmra.mrb[22].mxu0 %vm118_vm0, %v18084_v61  ;;  %v16371_v61 = vld [vmem:[#allocation2 + $0x260] sm:$0xff] }
 0x205   :  { %12620 = vmatprep.mubr.msk.f32.mxu0 %vm118_vm0, %v15417_v26  ;;  %v18093_v26 = vld [vmem:[#allocation31_spill] sm:$0xff] }
 0x206   :  { %12202 = vmatmul.mubr.msk.f32.gmra.mrb[6].mxu1 %vm118_vm0, %v18087_v3  ;;  %v16437_v3 = vld [vmem:[#allocation2 + $0x220] sm:$0xff] }
 0x207   :  { %12204 = vmatprep.mubr.msk.f32.mxu1 %vm118_vm0, %v356_v6  ;;  %v16471_v6 = vld [vmem:[#allocation2 + $0x270] sm:$0xff] }
 0x208   :  { %12621 = vmatmul.mubr.msk.f32.gmra.mrb[24].mxu0 %vm118_vm0, %v15427_v28  ;;  %v16126_v28 = vld [vmem:[#allocation2 + $0xa0] sm:$0xff] }
 0x209   :  { %12623 = vmatprep.mubr.msk.f32.mxu0 %vm118_vm0, %v15429_v29  ;;  %v18094_v29 = vld [vmem:[#allocation32_spill] sm:$0xff] }
 0x20a   :  { %12205 = vmatmul.mubr.msk.f32.gmra.mrb[8].mxu1 %vm118_vm0, %v357_v10  ;;  %v4514_v10 = vld [vmem:[#allocation2 + $0x280] sm:$0xff] }
 0x20b   :  { %12207 = vmatprep.mubr.msk.f32.mxu1 %vm118_vm0, %v18088_v11  ;;  %v16494_v11 = vld [vmem:[#allocation2 + $0x288] sm:$0xff] }
 0x20c   :  { %12624 = vmatmul.mubr.msk.f32.gmra.mrb[26].mxu0 %vm118_vm0, %v15443_v33  ;;  %v16136_v33 = vld [vmem:[#allocation2 + $0xa8] sm:$0xff] }
 0x20d   :  { %12626 = vmatprep.mubr.msk.f32.mxu0 %vm118_vm0, %v15445_v35  ;;  %v18095_v35 = vld [vmem:[#allocation33_spill] sm:$0xff] }
 0x20e   :  { %12208 = vmatmul.mubr.msk.f32.gmra.mrb[10].mxu1 %vm118_vm0, %v18089_v13  ;;  %v16496_v13 = vld [vmem:[#allocation2 + $0x290] sm:$0xff] }
 0x20f   :  { %12210 = vmatprep.mubr.msk.f32.mxu1 %vm118_vm0, %v18091_v21  ;;  %v16504_v21 = vld [vmem:[#allocation2 + $0x2a0] sm:$0xff] }
 0x210   :  { %12627 = vmatmul.mubr.msk.f32.gmra.mrb[28].mxu0 %vm118_vm0, %v15459_v39  ;;  %v16146_v39 = vld [vmem:[#allocation2 + $0x1d8] sm:$0xff] }
 0x211   :  { %12629 = vmatprep.mubr.msk.f32.mxu0 %vm118_vm0, %v15461_v41  ;;  %v18096_v41 = vld [vmem:[#allocation34_spill] sm:$0xff] }
 0x212   :  { %12211 = vmatmul.mubr.msk.f32.gmra.mrb[12].mxu1 %vm118_vm0, %v15798_v52  ;;  %v16287_v52 = vld [vmem:[#allocation2 + $0x1e0] sm:$0xff] }
 0x213   :  { %12213 = vmatprep.mubr.msk.f32.mxu1 %vm118_vm0, %v18093_v26  ;;  %v16512_v26 = vld [vmem:[#allocation2 + $0x2b0] sm:$0xff] }
 0x214   :  { %12630 = vmatmul.mubr.msk.f32.gmra.mrb[30].mxu0 %vm118_vm0, %v18090_v18  ;;  %v16502_v18 = vld [vmem:[#allocation2 + $0x298] sm:$0xff] }
 0x215   :  { %12632 = vmatprep.mubr.msk.f32.mxu0 %vm118_vm0, %v15477_v46  ;;  %v18097_v46 = vld [vmem:[#allocation35_spill] sm:$0xff] }
 0x216   :  { %12214 = vmatmul.mubr.msk.f32.gmra.mrb[14].mxu1 %vm118_vm0, %v18094_v29  ;;  %v4522_v29 = vld [vmem:[#allocation2 + $0x2d0] sm:$0xff] }
 0x217   :  { %12216 = vmatprep.mubr.msk.f32.mxu1 %vm118_vm0, %v16126_v28 }
 0x218   :  { %12633 = vmatmul.mubr.msk.f32.gmra.mrb[32].mxu0 %vm118_vm0, %v18092_v22  ;;  %v16510_v22 = vld [vmem:[#allocation2 + $0x2a8] sm:$0xff] }
 0x219   :  { %12635 = vmatprep.mubr.msk.f32.mxu0 %vm118_vm0, %v15566_v4  ;;  %v18098_v4 = vld [vmem:[#allocation36_spill] sm:$0xff] }
 0x21a   :  { %12217 = vmatmul.mubr.msk.f32.gmra.mrb[16].mxu1 %vm118_vm0, %v16136_v33 }
 0x21b   :  { %12219 = vmatprep.mubr.msk.f32.mxu1 %vm118_vm0, %v18095_v35 }
 0x21c   :  { %12636 = vmatmul.mubr.msk.f32.gmra.mrb[34].mxu0 %vm118_vm0, %v15576_v8  ;;  %v18099_v8 = vld [vmem:[#allocation37_spill] sm:$0xff] }
 0x21d   :  { %12638 = vmatprep.mubr.msk.f32.mxu0 %vm118_vm0, %v15578_v9  ;;  %v16164_v9 = vld [vmem:[#allocation2 + $0xf0] sm:$0xff] }
 0x21e   :  { %12220 = vmatmul.mubr.msk.f32.gmra.mrb[18].mxu1 %vm118_vm0, %v18096_v41 }
 0x21f   :  { %12222 = vmatprep.mubr.msk.f32.mxu1 %vm118_vm0, %v18097_v46 }
 0x220   :  { %12639 = vmatmul.mubr.msk.f32.gmra.mrb[36].mxu0 %vm118_vm0, %v15584_v12  ;;  %v18100_v12 = vld [vmem:[#allocation38_spill] sm:$0xff] }
 0x221   :  { %12641 = vmatprep.mubr.msk.f32.mxu0 %vm118_vm0, %v15833_v17  ;;  %v16297_v17 = vld [vmem:[#allocation2 + $0x1e8] sm:$0xff] }
 0x222   :  { %12223 = vmatmul.mubr.msk.f32.gmra.mrb[20].mxu1 %vm118_vm0, %v18098_v4 }
 0x223   :  { %12225 = vmatprep.mubr.msk.f32.mxu1 %vm118_vm0, %v18099_v8 }
 0x224   :  { %12642 = vmatmul.mubr.msk.f32.gmra.mrb[38].mxu0 %vm118_vm0, %v16146_v39 }
 0x225   :  { %12644 = vmatprep.mubr.msk.f32.mxu0 %vm118_vm0, %v15591_v19  ;;  %v18101_v19 = vld [vmem:[#allocation40_spill] sm:$0xff] }
 0x226   :  { %12226 = vmatmul.mubr.msk.f32.gmra.mrb[22].mxu1 %vm118_vm0, %v18100_v12 }
 0x227   :  { %12228 = vmatprep.mubr.msk.f32.mxu1 %vm118_vm0, %v16164_v9 }
 0x228   :  { %12645 = vmatmul.mubr.msk.f32.gmra.mrb[40].mxu0 %vm118_vm0, %v15597_v20  ;;  %v16184_v20 = vld [vmem:[#allocation2 + $0x228] sm:$0xff] }
 0x229   :  { %12647 = vmatprep.mubr.msk.f32.mxu0 %vm118_vm0, %v15599_v23  ;;  %v18102_v23 = vld [vmem:[#allocation41_spill] sm:$0xff] }
 0x22a   :  { %12229 = vmatmul.mubr.msk.f32.gmra.mrb[24].mxu1 %vm118_vm0, %v16174_v16 }
 0x22b   :  { %12231 = vmatprep.mubr.msk.f32.mxu1 %vm118_vm0, %v18101_v19 }
 0x22c   :  { %12648 = vmatmul.mubr.msk.f32.gmra.mrb[42].mxu0 %vm118_vm0, %v15609_v27  ;;  %v18103_v27 = vld [vmem:[#allocation42_spill] sm:$0xff] }
 0x22d   :  { %12650 = vmatprep.mubr.msk.f32.mxu0 %vm118_vm0, %v15611_v30  ;;  %v18104_v30 = vld [vmem:[#allocation43_spill] sm:$0xff] }
 0x22e   :  { %12232 = vmatmul.mubr.msk.f32.gmra.mrb[26].mxu1 %vm118_vm0, %v18102_v23 }
 0x22f   :  { %12234 = vmatprep.mubr.msk.f32.mxu1 %vm118_vm0, %v18103_v27 }
 0x230   :  { %12651 = vmatmul.mubr.msk.f32.gmra.mrb[44].mxu0 %vm118_vm0, %v15617_v31  ;;  %v18105_v31 = vld [vmem:[#allocation44_spill] sm:$0xff] }
 0x231   :  { %12653 = vmatprep.mubr.msk.f32.mxu0 %vm118_vm0, %v15881_v14  ;;  %v16284_v14 = vld [vmem:[#allocation2 + $0x1c8] sm:$0xff] }
 0x232   :  { %12235 = vmatmul.mubr.msk.f32.gmra.mrb[28].mxu1 %vm118_vm0, %v18104_v30 }
 0x233   :  { %12237 = vmatprep.mubr.msk.f32.mxu1 %vm118_vm0, %v18105_v31 }
 0x234   :  { %12654 = vmatmul.mubr.msk.f32.gmra.mrb[46].mxu0 %vm118_vm0, %v16184_v20 }
 0x235   :  { %12656 = vmatprep.mubr.msk.f32.mxu0 %vm118_vm0, %v15624_v42  ;;  %v16212_v42 = vld [vmem:[#allocation2 + $0x148] sm:$0xff] }
 0x236   :  { %12238 = vmatmul.mubr.msk.f32.gmra.mrb[30].mxu1 %vm118_vm0, %v18106_v0 }
 0x237   :  { %12240 = vmatprep.mubr.msk.f32.mxu1 %vm118_vm0, %v16202_v38 }
 0x238   :  { %12657 = vmatmul.mubr.msk.f32.gmra.mrb[48].mxu0 %vm118_vm0, %v15630_v44  ;;  %v18107_v44 = vld [vmem:[#allocation47_spill] sm:$0xff] }
 0x239   :  { %12659 = vmatprep.mubr.msk.f32.mxu0 %vm118_vm0, %v15632_v50  ;;  %v16222_v50 = vld [vmem:[#allocation2 + $0x278] sm:$0xff] }
 0x23a   :  { %12241 = vmatmul.mubr.msk.f32.gmra.mrb[32].mxu1 %vm118_vm0, %v16212_v42 }
 0x23b   :  { %12243 = vmatprep.mubr.msk.f32.mxu1 %vm118_vm0, %v18107_v44 }
 0x23c   :  { %12660 = vmatmul.mubr.msk.f32.gmra.mrb[50].mxu0 %vm118_vm0, %v15642_v55  ;;  %v18108_v55 = vld [vmem:[#allocation48_spill] sm:$0xff] }
 0x23d   :  { %12662 = vmatprep.mubr.msk.f32.mxu0 %vm118_vm0, %v15644_v58  ;;  %v18109_v58 = vld [vmem:[#allocation49_spill] sm:$0xff] }
 0x23e   :  { %12244 = vmatmul.mubr.msk.f32.gmra.mrb[34].mxu1 %vm118_vm0, %v15925_v56 }
 0x23f   :  { %12246 = vmatprep.mubr.msk.f32.mxu1 %vm118_vm0, %v18108_v55 }
 0x240   :  { %12663 = vmatmul.mubr.msk.f32.gmra.mrb[52].mxu0 %vm118_vm0, %v15650_v63  ;;  %v16240_v63 = vld [vmem:[#allocation2 + $0x190] sm:$0xff] }
 0x241   :  { %12665 = vmatprep.mubr.msk.f32.mxu0 %vm118_vm0, %v15929_v47  ;;  %v16299_v47 = vld [vmem:[#allocation2 + $0x1f0] sm:$0xff] }
 0x242   :  { %12247 = vmatmul.mubr.msk.f32.gmra.mrb[36].mxu1 %vm118_vm0, %v15939_v7 }
 0x243   :  { %12249 = vmatprep.mubr.msk.f32.mxu1 %vm118_vm0, %v18109_v58 }
 0x244   :  { %12666 = vmatmul.mubr.msk.f32.gmra.mrb[54].mxu0 %vm118_vm0, %v16222_v50 }
 0x245   :  { %12668 = vmatprep.mubr.msk.f32.mxu0 %vm118_vm0, %v15657_v24  ;;  %v16250_v24 = vld [vmem:[#allocation2 + $0x198] sm:$0xff] }
 0x246   :  { %12250 = vmatmul.mubr.msk.f32.gmra.mrb[38].mxu1 %vm118_vm0, %v18110_v53 }
 0x247   :  { %12252 = vmatprep.mubr.msk.f32.mxu1 %vm118_vm0, %v16240_v63 }
 0x248   :  { %12669 = vmatmul.mubr.msk.f32.gmra.mrb[56].mxu0 %vm118_vm0, %v15663_v36  ;;  %v3821_v36 = vld [vmem:[#allocation2 + $0x2c8] sm:$0xff] }
 0x249   :  { %12671 = vmatprep.mubr.msk.f32.mxu0 %vm118_vm0, %v15665_v54  ;;  %v16260_v54 = vld [vmem:[#allocation2 + $0x1b0] sm:$0xff] }
 0x24a   :  { %12253 = vmatmul.mubr.msk.f32.gmra.mrb[40].mxu1 %vm118_vm0, %v16250_v24 }
 0x24b   :  { %12255 = vmatprep.mubr.msk.f32.mxu1 %vm118_vm0, %v15967_v48 }
 0x24c   :  { %12672 = vmatmul.mubr.msk.f32.gmra.mrb[58].mxu0 %vm118_vm0, %v15675_v5  ;;  %v16277_v5 = vld [vmem:[#allocation5 + $0x40] sm:$0xff] }
 0x24d   :  { %12674 = vmatprep.mubr.msk.f32.mxu0 %vm118_vm0, %v15677_v45  ;;  %v16271_v45 = vld [vmem:[#allocation2 + $0x1c0] sm:$0xff] }
 0x24e   :  { %12256 = vmatmul.mubr.msk.f32.gmra.mrb[42].mxu1 %vm118_vm0, %v15973_v60 }
 0x24f   :  { %12258 = vmatprep.mubr.msk.f32.mxu1 %vm118_vm0, %v16260_v54 }
 0x250   :  { %12675 = vmatmul.mubr.msk.f32.gmra.mrb[60].mxu0 %vm118_vm0, %v15683_v25  ;;  %v16269_v25 = vld [vmem:[#allocation2 + $0x1b8] sm:$0xff] }
 0x251   :  { %12677 = vmatprep.mubr.msk.f32.mxu0 %vm118_vm0, %v15977_v15  ;;  %v16309_v15 = vld [vmem:[#allocation2 + $0x1f8] sm:$0xff] }
 0x252   :  { %12259 = vmatmul.mubr.msk.f32.gmra.mrb[44].mxu1 %vm118_vm0, %v16269_v25 }
 0x253   :  { %12261 = vmatprep.mubr.msk.f32.mxu1 %vm118_vm0, %v16271_v45 }
 0x254   :  { %12678 = vmatmul.mubr.msk.f32.gmra.mrb[62].mxu0 %vm118_vm0, %v3821_v36  ;;  %v16547_v36 = vld [vmem:[#allocation2 + $0x308] sm:$0xff] }
 0x255   :  { %12682 = vmatprep.mubr.msk.f32.mxu0 %vm118_vm0, %v16126_v28  ;;  %v16518_v28 = vld [vmem:[#allocation2 + $0x2b8] sm:$0xff] }
 0x256   :  { %12262 = vmatmul.mubr.msk.f32.gmra.mrb[46].mxu1 %vm118_vm0, %v16284_v14 }
 0x257   :  { %12264 = vmatprep.mubr.msk.f32.mxu1 %vm118_vm0, %v16287_v52 }
 0x258   :  { %12683 = vmatmul.mubr.msk.f32.vlgmr.msra.gmra.mrb[0].mxu0 %vm118_vm0, %v16136_v33 }
 0x259   :  { %12779 = vmatpush3.msra.mxu0 %v15993_v1  ;;  %12685 = vmatprep.mubr.msk.f32.mxu0 %vm118_vm0, %v18095_v35  ;;  %v16311_v1 = vld [vmem:[#allocation2 + $0x200] sm:$0xff] }
 0x25a   :  { %12876 = vmatprep.subr.mxu0 %v16277_v5  ;;  %12265 = vmatmul.mubr.msk.f32.gmra.mrb[48].mxu1 %vm118_vm0, %v16297_v17 }
 0x25b   :  { %12267 = vmatprep.mubr.msk.f32.mxu1 %vm118_vm0, %v16299_v47 }
 0x25c   :  { %12686 = vmatmul.mubr.msk.f32.gmra.mrb[2].mxu0 %vm118_vm0, %v18096_v41 }
 0x25d   :  { %12688 = vmatprep.mubr.msk.f32.mxu0 %vm118_vm0, %v18097_v46 }
 0x25e   :  { %12268 = vmatmul.mubr.msk.f32.gmra.mrb[50].mxu1 %vm118_vm0, %v16309_v15 }
 0x25f   :  { %12270 = vmatprep.mubr.msk.f32.mxu1 %vm118_vm0, %v16311_v1 }
 0x260   :  { %12689 = vmatmul.mubr.msk.f32.gmra.mrb[4].mxu0 %vm118_vm0, %v18098_v4 }
 0x261   :  { %12691 = vmatprep.mubr.msk.f32.mxu0 %vm118_vm0, %v18099_v8 }
 0x262   :  { %12271 = vmatmul.mubr.msk.f32.gmra.mrb[52].mxu1 %vm118_vm0, %v16321_v32 }
 0x263   :  { %12273 = vmatprep.mubr.msk.f32.mxu1 %vm118_vm0, %v16323_v34 }
 0x264   :  { %12692 = vmatmul.mubr.msk.f32.gmra.mrb[6].mxu0 %vm118_vm0, %v18100_v12 }
 0x265   :  { %12694 = vmatprep.mubr.msk.f32.mxu0 %vm118_vm0, %v16164_v9  ;;  %v16525_v9 = vld [vmem:[#allocation2 + $0x2e0] sm:$0xff] }
 0x266   :  { %12274 = vmatmul.mubr.msk.f32.gmra.mrb[54].mxu1 %vm118_vm0, %v16333_v37 }
 0x267   :  { %12276 = vmatprep.mubr.msk.f32.mxu1 %vm118_vm0, %v16335_v40 }
 0x268   :  { %12695 = vmatmul.mubr.msk.f32.gmra.mrb[8].mxu0 %vm118_vm0, %v16174_v16 }
 0x269   :  { %12697 = vmatprep.mubr.msk.f32.mxu0 %vm118_vm0, %v18101_v19 }
 0x26a   :  { %12277 = vmatmul.mubr.msk.f32.gmra.mrb[56].mxu1 %vm118_vm0, %v16345_v43 }
 0x26b   :  { %12279 = vmatprep.mubr.msk.f32.mxu1 %vm118_vm0, %v16347_v49 }
 0x26c   :  { %12698 = vmatmul.mubr.msk.f32.gmra.mrb[10].mxu0 %vm118_vm0, %v18102_v23 }
 0x26d   :  { %12700 = vmatprep.mubr.msk.f32.mxu0 %vm118_vm0, %v18103_v27 }
 0x26e   :  { %12280 = vmatmul.mubr.msk.f32.gmra.mrb[58].mxu1 %vm118_vm0, %v16357_v51 }
 0x26f   :  { %12282 = vmatprep.mubr.msk.f32.mxu1 %vm118_vm0, %v16359_v57 }
 0x270   :  { %12701 = vmatmul.mubr.msk.f32.gmra.mrb[12].mxu0 %vm118_vm0, %v18104_v30 }
 0x271   :  { %12703 = vmatprep.mubr.msk.f32.mxu0 %vm118_vm0, %v18105_v31 }
 0x272   :  { %12283 = vmatmul.mubr.msk.f32.gmra.mrb[60].mxu1 %vm118_vm0, %v16369_v59 }
 0x273   :  { %12285 = vmatprep.mubr.msk.f32.mxu1 %vm118_vm0, %v16371_v61 }
 0x274   :  { %12704 = vmatmul.mubr.msk.f32.gmra.mrb[14].mxu0 %vm118_vm0, %v18106_v0 }
 0x275   :  { %12706 = vmatprep.mubr.msk.f32.mxu0 %vm118_vm0, %v16202_v38  ;;  %v16533_v38 = vld [vmem:[#allocation2 + $0x2f0] sm:$0xff] }
 0x276   :  { %12286 = vmatmul.mubr.msk.f32.gmra.mrb[62].mxu1 %vm118_vm0, %v16381_v62 }
 0x277   :  { %12353 = vmatprep.mubr.msk.f32.mxu1 %vm118_vm0, %v16260_v54 }
 0x278   :  { %12707 = vmatmul.mubr.msk.f32.gmra.mrb[16].mxu0 %vm118_vm0, %v16212_v42 }
 0x279   :  { %12709 = vmatprep.mubr.msk.f32.mxu0 %vm118_vm0, %v18107_v44 }
 0x27a   :  { %12354 = vmatmul.mubr.msk.f32.vlgmr.msra.gmra.mrb[42].mxu1 %vm118_vm0, %v16269_v25 }
 0x27b   :  { %12356 = vmatprep.mubr.msk.f32.mxu1 %vm118_vm0, %v16271_v45 }
 0x27c   :  { %12710 = vmatmul.mubr.msk.f32.gmra.mrb[18].mxu0 %vm118_vm0, %v15925_v56 }
 0x27d   :  { %12712 = vmatprep.mubr.msk.f32.mxu0 %vm118_vm0, %v18108_v55 }
 0x27e   :  { %12357 = vmatmul.mubr.msk.f32.gmra.mrb[44].mxu1 %vm118_vm0, %v16284_v14 }
 0x27f   :  { %12359 = vmatprep.mubr.msk.f32.mxu1 %vm118_vm0, %v16403_v2 }
 0x280   :  { %12713 = vmatmul.mubr.msk.f32.gmra.mrb[20].mxu0 %vm118_vm0, %v15939_v7 }
 0x281   :  { %12715 = vmatprep.mubr.msk.f32.mxu0 %vm118_vm0, %v18109_v58 }
 0x282   :  { %12360 = vmatmul.mubr.msk.f32.gmra.mrb[46].mxu1 %vm118_vm0, %v16146_v39  ;;  %v16523_v39 = vld [vmem:[#allocation2 + $0x2d8] sm:$0xff] }
 0x283   :  { %12362 = vmatprep.mubr.msk.f32.mxu1 %vm118_vm0, %v16299_v47 }
 0x284   :  { %12716 = vmatmul.mubr.msk.f32.gmra.mrb[22].mxu0 %vm118_vm0, %v18110_v53 }
 0x285   :  { %12718 = vmatprep.mubr.msk.f32.mxu0 %vm118_vm0, %v16240_v63  ;;  %v16541_v63 = vld [vmem:[#allocation2 + $0x300] sm:$0xff] }
 0x286   :  { %12363 = vmatmul.mubr.msk.f32.gmra.mrb[48].mxu1 %vm118_vm0, %v16309_v15 }
 0x287   :  { %12365 = vmatprep.mubr.msk.f32.mxu1 %vm118_vm0, %v16311_v1 }
 0x288   :  { %12719 = vmatmul.mubr.msk.f32.gmra.mrb[24].mxu0 %vm118_vm0, %v16250_v24 }
 0x289   :  { %12721 = vmatprep.mubr.msk.f32.mxu0 %vm118_vm0, %v15967_v48 }
 0x28a   :  { %12366 = vmatmul.mubr.msk.f32.gmra.mrb[50].mxu1 %vm118_vm0, %v16321_v32 }
 0x28b   :  { %12368 = vmatprep.mubr.msk.f32.mxu1 %vm118_vm0, %v16323_v34 }
 0x28c   :  { %12722 = vmatmul.mubr.msk.f32.gmra.mrb[26].mxu0 %vm118_vm0, %v15973_v60 }
 0x28d   :  { %12724 = vmatprep.mubr.msk.f32.mxu0 %vm118_vm0, %v16260_v54 }
 0x28e   :  { %12369 = vmatmul.mubr.msk.f32.gmra.mrb[52].mxu1 %vm118_vm0, %v16333_v37 }
 0x28f   :  { %12371 = vmatprep.mubr.msk.f32.mxu1 %vm118_vm0, %v16437_v3 }
 0x290   :  { %12725 = vmatmul.mubr.msk.f32.gmra.mrb[28].mxu0 %vm118_vm0, %v16269_v25 }
 0x291   :  { %12727 = vmatprep.mubr.msk.f32.mxu0 %vm118_vm0, %v16271_v45 }
 0x292   :  { %12372 = vmatmul.mubr.msk.f32.gmra.mrb[54].mxu1 %vm118_vm0, %v16184_v20  ;;  %v16531_v20 = vld [vmem:[#allocation2 + $0x2e8] sm:$0xff] }
 0x293   :  { %12374 = vmatprep.mubr.msk.f32.mxu1 %vm118_vm0, %v16347_v49 }
 0x294   :  { %12728 = vmatmul.mubr.msk.f32.gmra.mrb[30].mxu0 %vm118_vm0, %v16284_v14 }
 0x295   :  { %12730 = vmatprep.mubr.msk.f32.mxu0 %vm118_vm0, %v16287_v52 }
 0x296   :  { %12375 = vmatmul.mubr.msk.f32.gmra.mrb[56].mxu1 %vm118_vm0, %v16357_v51 }
 0x297   :  { %12377 = vmatprep.mubr.msk.f32.mxu1 %vm118_vm0, %v16359_v57 }
 0x298   :  { %12731 = vmatmul.mubr.msk.f32.gmra.mrb[32].mxu0 %vm118_vm0, %v16297_v17 }
 0x299   :  { %12733 = vmatprep.mubr.msk.f32.mxu0 %vm118_vm0, %v16299_v47 }
 0x29a   :  { %12378 = vmatmul.mubr.msk.f32.gmra.mrb[58].mxu1 %vm118_vm0, %v16369_v59 }
 0x29b   :  { %12380 = vmatprep.mubr.msk.f32.mxu1 %vm118_vm0, %v16371_v61 }
 0x29c   :  { %12734 = vmatmul.mubr.msk.f32.gmra.mrb[34].mxu0 %vm118_vm0, %v16309_v15 }
 0x29d   :  { %12736 = vmatprep.mubr.msk.f32.mxu0 %vm118_vm0, %v16311_v1 }
 0x29e   :  { %12381 = vmatmul.mubr.msk.f32.gmra.mrb[60].mxu1 %vm118_vm0, %v16381_v62 }
 0x29f   :  { %12383 = vmatprep.mubr.msk.f32.mxu1 %vm118_vm0, %v16471_v6 }
 0x2a0   :  { %12737 = vmatmul.mubr.msk.f32.gmra.mrb[36].mxu0 %vm118_vm0, %v16321_v32 }
 0x2a1   :  { %12739 = vmatprep.mubr.msk.f32.mxu0 %vm118_vm0, %v16323_v34 }
 0x2a2   :  { %12384 = vmatmul.mubr.msk.f32.gmra.mrb[62].mxu1 %vm118_vm0, %v16222_v50  ;;  %v16539_v50 = vld [vmem:[#allocation2 + $0x2f8] sm:$0xff] }
 0x2a4   :  { %12740 = vmatmul.mubr.msk.f32.gmra.mrb[38].mxu0 %vm118_vm0, %v16333_v37 }
 0x2a5   :  { %12742 = vmatprep.mubr.msk.f32.mxu0 %vm118_vm0, %v16335_v40 }
 0x2a8   :  { %12743 = vmatmul.mubr.msk.f32.gmra.mrb[40].mxu0 %vm118_vm0, %v16345_v43 }
 0x2a9   :  { %12745 = vmatprep.mubr.msk.f32.mxu0 %vm118_vm0, %v16347_v49 }
 0x2ac   :  { %12746 = vmatmul.mubr.msk.f32.gmra.mrb[42].mxu0 %vm118_vm0, %v16357_v51 }
 0x2ad   :  { %12748 = vmatprep.mubr.msk.f32.mxu0 %vm118_vm0, %v16359_v57 }
 0x2b0   :  { %12749 = vmatmul.mubr.msk.f32.gmra.mrb[44].mxu0 %vm118_vm0, %v16369_v59 }
 0x2b1   :  { %12751 = vmatprep.mubr.msk.f32.mxu0 %vm118_vm0, %v16371_v61 }
 0x2b4   :  { %12752 = vmatmul.mubr.msk.f32.gmra.mrb[46].mxu0 %vm118_vm0, %v16381_v62 }
 0x2b5   :  { %12754 = vmatprep.mubr.msk.f32.mxu0 %vm118_vm0, %v4514_v10 }
 0x2b8   :  { %12755 = vmatmul.mubr.msk.f32.gmra.mrb[48].mxu0 %vm118_vm0, %v16494_v11 }
 0x2b9   :  { %12757 = vmatprep.mubr.msk.f32.mxu0 %vm118_vm0, %v16496_v13 }
 0x2bc   :  { %12758 = vmatmul.mubr.msk.f32.gmra.mrb[50].mxu0 %vm118_vm0, %v16502_v18 }
 0x2bd   :  { %12760 = vmatprep.mubr.msk.f32.mxu0 %vm118_vm0, %v16504_v21 }
 0x2c0   :  { %12761 = vmatmul.mubr.msk.f32.gmra.mrb[52].mxu0 %vm118_vm0, %v16510_v22 }
 0x2c1   :  { %12763 = vmatprep.mubr.msk.f32.mxu0 %vm118_vm0, %v16512_v26 }
 0x2c4   :  { %12764 = vmatmul.mubr.msk.f32.gmra.mrb[54].mxu0 %vm118_vm0, %v16518_v28 }
 0x2c5   :  { %12766 = vmatprep.mubr.msk.f32.mxu0 %vm118_vm0, %v4522_v29 }
 0x2c8   :  { %12767 = vmatmul.mubr.msk.f32.gmra.mrb[56].mxu0 %vm118_vm0, %v16523_v39 }
 0x2c9   :  { %12769 = vmatprep.mubr.msk.f32.mxu0 %vm118_vm0, %v16525_v9 }
 0x2cc   :  { %12770 = vmatmul.mubr.msk.f32.gmra.mrb[58].mxu0 %vm118_vm0, %v16531_v20 }
 0x2cd   :  { %12772 = vmatprep.mubr.msk.f32.mxu0 %vm118_vm0, %v16533_v38 }
 0x2d0   :  { %12773 = vmatmul.mubr.msk.f32.gmra.mrb[60].mxu0 %vm118_vm0, %v16539_v50 }
 0x2d1   :  { %12775 = vmatprep.mubr.msk.f32.mxu0 %vm118_vm0, %v16541_v63 }
 0x2d4   :  { %12776 = vmatmul.mubr.msk.f32.gmra.mrb[62].mxu0 %vm118_vm0, %v16547_v36 }
 0x2d5   :  { %12780 = vmatprep.mubr.msk.f32.mxu0 %vm118_vm0, %v16136_v33  ;;  %v18111_v33 = vld [vmem:[#allocation39_spill] sm:$0xff] }
 0x2d8   :  { %12781 = vmatmul.mubr.msk.f32.vlgmr.msra.gmra.mrb[0].mxu0 %vm118_vm0, %v18095_v35  ;;  %v18112_v35 = vld [vmem:[#allocation46_spill] sm:$0xff] }
 0x2d9   :  { %12877 = vmatpush3.msra.mxu0 %v16277_v5  ;;  %12783 = vmatprep.mubr.msk.f32.mxu0 %vm118_vm0, %v18096_v41  ;;  %v16592_v41 = vpop.f32.mrb[0].mxu1 }
 0x2dc   :  { %12784 = vmatmul.mubr.msk.f32.gmra.mrb[2].mxu0 %vm118_vm0, %v18097_v46  ;;  %v16596_v46 = vpop.f32.mrb[1].mxu1 }
 0x2dd   :  { %12786 = vmatprep.mubr.msk.f32.mxu0 %vm118_vm0, %v18098_v4  ;;  %v16600_v4 = vpop.f32.mrb[2].mxu1 }
 0x2e0   :  { %12787 = vmatmul.mubr.msk.f32.gmra.mrb[4].mxu0 %vm118_vm0, %v18099_v8  ;;  %v16604_v8 = vpop.f32.mrb[3].mxu1 }
 0x2e1   :  { %12789 = vmatprep.mubr.msk.f32.mxu0 %vm118_vm0, %v18100_v12  ;;  %v16608_v12 = vpop.f32.mrb[4].mxu1 }
 0x2e4   :  { %12790 = vmatmul.mubr.msk.f32.gmra.mrb[6].mxu0 %vm118_vm0, %v18111_v33 }
 0x2e5   :  { %12792 = vmatprep.mubr.msk.f32.mxu0 %vm118_vm0, %v16174_v16 }
 0x2e8   :  { %12793 = vmatmul.mubr.msk.f32.gmra.mrb[8].mxu0 %vm118_vm0, %v18101_v19 }
 0x2e9   :  { %12795 = vmatprep.mubr.msk.f32.mxu0 %vm118_vm0, %v18102_v23 }
 0x2ec   :  { %12796 = vmatmul.mubr.msk.f32.gmra.mrb[10].mxu0 %vm118_vm0, %v18103_v27 }
 0x2ed   :  { %12798 = vmatprep.mubr.msk.f32.mxu0 %vm118_vm0, %v18104_v30 }
 0x2f0   :  { %12799 = vmatmul.mubr.msk.f32.gmra.mrb[12].mxu0 %vm118_vm0, %v18105_v31 }
 0x2f1   :  { %12801 = vmatprep.mubr.msk.f32.mxu0 %vm118_vm0, %v18106_v0 }
 0x2f4   :  { %12802 = vmatmul.mubr.msk.f32.gmra.mrb[14].mxu0 %vm118_vm0, %v18112_v35 }
 0x2f5   :  { %12804 = vmatprep.mubr.msk.f32.mxu0 %vm118_vm0, %v16212_v42 }
 0x2f8   :  { %12805 = vmatmul.mubr.msk.f32.gmra.mrb[16].mxu0 %vm118_vm0, %v18107_v44 }
 0x2f9   :  { %12807 = vmatprep.mubr.msk.f32.mxu0 %vm118_vm0, %v15925_v56  ;;  %v18113_v56 = vld [vmem:[#allocation51_spill] sm:$0xff] }
 0x2fc   :  { %12808 = vmatmul.mubr.msk.f32.gmra.mrb[18].mxu0 %vm118_vm0, %v18108_v55 }
 0x2fd   :  { %12810 = vmatprep.mubr.msk.f32.mxu0 %vm118_vm0, %v15939_v7  ;;  %v16612_v7 = vpop.f32.mrb[5].mxu1 }
 0x2fe   :  { %v16616_v16 = vpop.f32.mrb[6].mxu1 }
 0x2ff   :  { %v16620_v19 = vpop.f32.mrb[7].mxu1 }
 0x300   :  { %12811 = vmatmul.mubr.msk.f32.gmra.mrb[20].mxu0 %vm118_vm0, %v18109_v58  ;;  %v16624_v23 = vpop.f32.mrb[8].mxu1 }
 0x301   :  { %12813 = vmatprep.mubr.msk.f32.mxu0 %vm118_vm0, %v18110_v53  ;;  %v16628_v27 = vpop.f32.mrb[9].mxu1 }
 0x304   :  { %12814 = vmatmul.mubr.msk.f32.gmra.mrb[22].mxu0 %vm118_vm0, %v18113_v56 }
 0x305   :  { %12816 = vmatprep.mubr.msk.f32.mxu0 %vm118_vm0, %v16250_v24 }
 0x308   :  { %12817 = vmatmul.mubr.msk.f32.gmra.mrb[24].mxu0 %vm118_vm0, %v15967_v48  ;;  %v16632_v48 = vpop.f32.mrb[10].mxu1 }
 0x309   :  { %12819 = vmatprep.mubr.msk.f32.mxu0 %vm118_vm0, %v15973_v60  ;;  %v16636_v60 = vpop.f32.mrb[11].mxu1 }
 0x30a   :  { %v16640_v30 = vpop.f32.mrb[12].mxu1 }
 0x30b   :  { %v16644_v31 = vpop.f32.mrb[13].mxu1 }
 0x30c   :  { %12820 = vmatmul.mubr.msk.f32.gmra.mrb[26].mxu0 %vm118_vm0, %v16260_v54  ;;  %v16648_v0 = vpop.f32.mrb[14].mxu1 }
 0x30d   :  { %12822 = vmatprep.mubr.msk.f32.mxu0 %vm118_vm0, %v16269_v25  ;;  %v16652_v42 = vpop.f32.mrb[15].mxu1 }
 0x30e   :  { %v16656_v44 = vpop.f32.mrb[16].mxu1 }
 0x30f   :  { %v16660_v55 = vpop.f32.mrb[17].mxu1 }
 0x310   :  { %12823 = vmatmul.mubr.msk.f32.gmra.mrb[28].mxu0 %vm118_vm0, %v16271_v45  ;;  %v16664_v58 = vpop.f32.mrb[18].mxu1 }
 0x311   :  { %12825 = vmatprep.mubr.msk.f32.mxu0 %vm118_vm0, %v16284_v14  ;;  %v16668_v53 = vpop.f32.mrb[19].mxu1 }
 0x312   :  { %v16672_v24 = vpop.f32.mrb[20].mxu1 }
 0x313   :  { %18114 = vst [vmem:[#allocation16_spill] sm:$0xff] %v16672_v24  ;;  %v16676_v5 = vpop.f32.mrb[21].mxu1 }
 0x314   :  { %12826 = vmatmul.mubr.msk.f32.gmra.mrb[30].mxu0 %vm118_vm0, %v16403_v2  ;;  %18115 = vst [vmem:[#allocation17_spill] sm:$0xff] %v16676_v5  ;;  %v16680_v52 = vpop.f32.mrb[22].mxu1  ;;  %v5888_v5 = vld [vmem:[#allocation2 + $0xe0] sm:$0xff] }
 0x315   :  { %12828 = vmatprep.mubr.msk.f32.mxu0 %vm118_vm0, %v16297_v17  ;;  %18116 = vst [vmem:[#allocation18_spill] sm:$0xff] %v16680_v52  ;;  %v16684_v17 = vpop.f32.mrb[23].mxu1  ;;  %v5886_v52 = vld [vmem:[#allocation2 + $0xd0] sm:$0xff] }
 0x316   :  { %18117 = vst [vmem:[#allocation19_spill] sm:$0xff] %v16684_v17  ;;  %v16688_v40 = vpop.f32.mrb[24].mxu1  ;;  %v5885_v17 = vld [vmem:[#allocation2 + $0xc8] sm:$0xff] }
 0x317   :  { %18118 = vst [vmem:[#allocation23_spill] sm:$0xff] %v16688_v40 }
 0x318   :  { %12829 = vmatmul.mubr.msk.f32.gmra.mrb[32].mxu0 %vm118_vm0, %v16299_v47 }
 0x319   :  { %12831 = vmatprep.mubr.msk.f32.mxu0 %vm118_vm0, %v16309_v15 }
 0x31c   :  { %12832 = vmatmul.mubr.msk.f32.gmra.mrb[34].mxu0 %vm118_vm0, %v16311_v1 }
 0x31d   :  { %12834 = vmatprep.mubr.msk.f32.mxu0 %vm118_vm0, %v16321_v32 }
 0x320   :  { %12835 = vmatmul.mubr.msk.f32.gmra.mrb[36].mxu0 %vm118_vm0, %v16323_v34 }
 0x321   :  { %12837 = vmatprep.mubr.msk.f32.mxu0 %vm118_vm0, %v16333_v37 }
 0x324   :  { %12838 = vmatmul.mubr.msk.f32.gmra.mrb[38].mxu0 %vm118_vm0, %v16437_v3 }
 0x325   :  { %12840 = vmatprep.mubr.msk.f32.mxu0 %vm118_vm0, %v16345_v43  ;;  %v16692_v43 = vpop.f32.mrb[25].mxu1 }
 0x326   :  { %18119 = vst [vmem:[#allocation24_spill] sm:$0xff] %v16692_v43  ;;  %v16696_v10 = vpop.f32.mrb[26].mxu1 }
 0x327   :  { %18120 = vst [vmem:[#allocation20_spill] sm:$0xff] %v16696_v10  ;;  %v16700_v29 = vpop.f32.mrb[27].mxu1 }
 0x328   :  { %12841 = vmatmul.mubr.msk.f32.gmra.mrb[40].mxu0 %vm118_vm0, %v16347_v49  ;;  %18121 = vst [vmem:[#allocation25_spill] sm:$0xff] %v16700_v29  ;;  %v16704_v33 = vpop.f32.mrb[28].mxu1 }
 0x329   :  { %12843 = vmatprep.mubr.msk.f32.mxu0 %vm118_vm0, %v16357_v51  ;;  %18122 = vst [vmem:[#allocation26_spill] sm:$0xff] %v16704_v33  ;;  %v16708_v35 = vpop.f32.mrb[29].mxu1 }
 0x32a   :  { %18123 = vst [vmem:[#allocation27_spill] sm:$0xff] %v16708_v35  ;;  %v16712_v56 = vpop.f32.mrb[30].mxu1 }
 0x32b   :  { %18124 = vst [vmem:[#allocation28_spill] sm:$0xff] %v16712_v56  ;;  %v16716_v10 = vpop.f32.mrb[31].mxu1  ;;  %v16732_v56 = vld [vmem:[#allocation2 + $0x2c0] sm:$0xff] }
 0x32c   :  { %12844 = vmatmul.mubr.msk.f32.gmra.mrb[42].mxu0 %vm118_vm0, %v16359_v57  ;;  %18125 = vst [vmem:[#allocation29_spill] sm:$0xff] %v16716_v10  ;;  %v16720_v29 = vpop.f32.mrb[32].mxu1 }
 0x32d   :  { %12846 = vmatprep.mubr.msk.f32.mxu0 %vm118_vm0, %v16369_v59  ;;  %18126 = vst [vmem:[#allocation21_spill] sm:$0xff] %v16720_v29 }
 0x330   :  { %12847 = vmatmul.mubr.msk.f32.gmra.mrb[44].mxu0 %vm118_vm0, %v16371_v61 }
 0x331   :  { %12849 = vmatprep.mubr.msk.f32.mxu0 %vm118_vm0, %v16381_v62 }
 0x334   :  { %12850 = vmatmul.mubr.msk.f32.gmra.mrb[46].mxu0 %vm118_vm0, %v16471_v6 }
 0x335   :  { %12852 = vmatprep.mubr.msk.f32.mxu0 %vm118_vm0, %v16494_v11  ;;  %v16724_v11 = vpop.f32.mrb[33].mxu1 }
 0x336   :  { %18127 = vst [vmem:[#allocation30_spill] sm:$0xff] %v16724_v11  ;;  %v16728_v35 = vpop.f32.mrb[34].mxu1 }
 0x337   :  { %18128 = vst [vmem:[#allocation22_spill] sm:$0xff] %v16728_v35  ;;  %v16734_v10 = vpop.f32.mrb[35].mxu1 }
 0x338   :  { %12853 = vmatmul.mubr.msk.f32.gmra.mrb[48].mxu0 %vm118_vm0, %v16496_v13  ;;  %18129 = vst [vmem:[#allocation31_spill] sm:$0xff] %v16734_v10  ;;  %v16738_v29 = vpop.f32.mrb[36].mxu1 }
 0x339   :  { %12855 = vmatprep.mubr.msk.f32.mxu0 %vm118_vm0, %v16502_v18  ;;  %18130 = vst [vmem:[#allocation32_spill] sm:$0xff] %v16738_v29  ;;  %v16742_v11 = vpop.f32.mrb[37].mxu1 }
 0x33a   :  { %18131 = vst [vmem:[#allocation33_spill] sm:$0xff] %v16742_v11  ;;  %v16746_v35 = vpop.f32.mrb[38].mxu1  ;;  %v5882_v11 = vld [vmem:[#allocation2 + $0xb0] sm:$0xff] }
 0x33b   :  { %18132 = vst [vmem:[#allocation34_spill] sm:$0xff] %v16746_v35  ;;  %v16750_v33 = vpop.f32.mrb[39].mxu1  ;;  %v16764_v35 = vld [vmem:[#allocation2 + $0x310] sm:$0xff] }
 0x33c   :  { %12856 = vmatmul.mubr.msk.f32.gmra.mrb[50].mxu0 %vm118_vm0, %v16504_v21  ;;  %18133 = vst [vmem:[#allocation35_spill] sm:$0xff] %v16750_v33  ;;  %v16754_v10 = vpop.f32.mrb[40].mxu1 }
 0x33d   :  { %12858 = vmatprep.mubr.msk.f32.mxu0 %vm118_vm0, %v16510_v22  ;;  %18134 = vst [vmem:[#allocation36_spill] sm:$0xff] %v16754_v10  ;;  %v5883_v10 = vld [vmem:[#allocation2 + $0xb8] sm:$0xff] }
 0x340   :  { %12859 = vmatmul.mubr.msk.f32.gmra.mrb[52].mxu0 %vm118_vm0, %v16512_v26 }
 0x341   :  { %12861 = vmatprep.mubr.msk.f32.mxu0 %vm118_vm0, %v16518_v28 }
 0x344   :  { %12862 = vmatmul.mubr.msk.f32.gmra.mrb[54].mxu0 %vm118_vm0, %v16732_v56 }
 0x345   :  { %12864 = vmatprep.mubr.msk.f32.mxu0 %vm118_vm0, %v16523_v39  ;;  %v16758_v39 = vpop.f32.mrb[41].mxu1 }
 0x346   :  { %18135 = vst [vmem:[#allocation37_spill] sm:$0xff] %v16758_v39  ;;  %v5884_v39 = vld [vmem:[#allocation2 + $0xc0] sm:$0xff] }
 0x348   :  { %12865 = vmatmul.mubr.msk.f32.gmra.mrb[56].mxu0 %vm118_vm0, %v16525_v9 }
 0x349   :  { %12867 = vmatprep.mubr.msk.f32.mxu0 %vm118_vm0, %v16531_v20 }
 0x34c   :  { %12868 = vmatmul.mubr.msk.f32.gmra.mrb[58].mxu0 %vm118_vm0, %v16533_v38 }
 0x34d   :  { %12870 = vmatprep.mubr.msk.f32.mxu0 %vm118_vm0, %v16539_v50  ;;  %v16766_v33 = vpop.f32.mrb[42].mxu1 }
 0x34e   :  { %18136 = vst [vmem:[#allocation38_spill] sm:$0xff] %v16766_v33  ;;  %v16768_v29 = vpop.f32.mrb[43].mxu1 }
 0x34f   :  { %18137 = vst [vmem:[#allocation40_spill] sm:$0xff] %v16768_v29 }
 0x350   :  { %12871 = vmatmul.mubr.msk.f32.gmra.mrb[60].mxu0 %vm118_vm0, %v16541_v63 }
 0x351   :  { %12873 = vmatprep.mubr.msk.f32.mxu0 %vm118_vm0, %v16547_v36  ;;  %v16773_v43 = vpop.f32.mrb[44].mxu1 }
 0x352   :  { %18138 = vst [vmem:[#allocation41_spill] sm:$0xff] %v16773_v43  ;;  %v16775_v40 = vpop.f32.mrb[45].mxu1 }
 0x353   :  { %18139 = vst [vmem:[#allocation42_spill] sm:$0xff] %v16775_v40 }
 0x354   :  { %12874 = vmatmul.mubr.msk.f32.gmra.mrb[62].mxu0 %vm118_vm0, %v16764_v35 }
 0x355   :  { %12878 = vmatprep.mubr.msk.f32.mxu0 %vm118_vm0, %v5882_v11  ;;  %v16779_v33 = vpop.f32.mrb[46].mxu1  ;;  %v5887_v11 = vld [vmem:[#allocation2 + $0xd8] sm:$0xff] }
 0x356   :  { %18140 = vst [vmem:[#allocation43_spill] sm:$0xff] %v16779_v33  ;;  %v16781_v29 = vpop.f32.mrb[47].mxu1 }
 0x357   :  { %18141 = vst [vmem:[#allocation44_spill] sm:$0xff] %v16781_v29 }
 0x358   :  { %12879 = vmatmul.mubr.msk.f32.vlgmr.msra.gmra.mrb[0].mxu0 %vm118_vm0, %v5883_v10  ;;  %v5889_v10 = vld [vmem:[#allocation2 + $0xe8] sm:$0xff] }
 0x359   :  { %12881 = vmatprep.mubr.msk.f32.mxu0 %vm118_vm0, %v5884_v39  ;;  %v16785_v24 = vpop.f32.mrb[48].mxu1  ;;  %v5890_v39 = vld [vmem:[#allocation2 + $0x100] sm:$0xff] }
 0x35a   :  { %18142 = vst [vmem:[#allocation45_spill] sm:$0xff] %v16785_v24  ;;  %v16787_v43 = vpop.f32.mrb[49].mxu1 }
 0x35b   :  { %18143 = vst [vmem:[#allocation47_spill] sm:$0xff] %v16787_v43 }
 0x35c   :  { %12882 = vmatmul.mubr.msk.f32.gmra.mrb[2].mxu0 %vm118_vm0, %v5885_v17  ;;  %v5892_v17 = vld [vmem:[#allocation2 + $0x110] sm:$0xff] }
 0x35d   :  { %12884 = vmatprep.mubr.msk.f32.mxu0 %vm118_vm0, %v5886_v52  ;;  %v16791_v40 = vpop.f32.mrb[50].mxu1  ;;  %v5891_v52 = vld [vmem:[#allocation2 + $0x108] sm:$0xff] }
 0x35e   :  { %18144 = vst [vmem:[#allocation48_spill] sm:$0xff] %v16791_v40  ;;  %v16793_v33 = vpop.f32.mrb[51].mxu1 }
 0x35f   :  { %18145 = vst [vmem:[#allocation49_spill] sm:$0xff] %v16793_v33 }
 0x360   :  { %12885 = vmatmul.mubr.msk.f32.gmra.mrb[4].mxu0 %vm118_vm0, %v5887_v11  ;;  %v5894_v11 = vld [vmem:[#allocation2 + $0x120] sm:$0xff] }
 0x361   :  { %12887 = vmatprep.mubr.msk.f32.mxu0 %vm118_vm0, %v5888_v5  ;;  %v16797_v29 = vpop.f32.mrb[52].mxu1  ;;  %v5893_v5 = vld [vmem:[#allocation2 + $0x118] sm:$0xff] }
 0x362   :  { %18146 = vst [vmem:[#allocation50_spill] sm:$0xff] %v16797_v29  ;;  %v16799_v24 = vpop.f32.mrb[53].mxu1 }
 0x363   :  { %18147 = vst [vmem:[#allocation39_spill] sm:$0xff] %v16799_v24 }
 0x364   :  { %12888 = vmatmul.mubr.msk.f32.gmra.mrb[6].mxu0 %vm118_vm0, %v5889_v10  ;;  %v5895_v10 = vld [vmem:[#allocation2 + $0x128] sm:$0xff] }
 0x365   :  { %12890 = vmatprep.mubr.msk.f32.mxu0 %vm118_vm0, %v5890_v39  ;;  %v16803_v43 = vpop.f32.mrb[54].mxu1  ;;  %v5896_v39 = vld [vmem:[#allocation2 + $0x130] sm:$0xff] }
 0x366   :  { %18148 = vst [vmem:[#allocation46_spill] sm:$0xff] %v16803_v43  ;;  %v16805_v40 = vpop.f32.mrb[55].mxu1 }
 0x367   :  { %18149 = vst [vmem:[#allocation51_spill] sm:$0xff] %v16805_v40 }
 0x368   :  { %12891 = vmatmul.mubr.msk.f32.gmra.mrb[8].mxu0 %vm118_vm0, %v5891_v52  ;;  %v5897_v52 = vld [vmem:[#allocation2 + $0x138] sm:$0xff] }
 0x369   :  { %12893 = vmatprep.mubr.msk.f32.mxu0 %vm118_vm0, %v5892_v17  ;;  %v16809_v33 = vpop.f32.mrb[56].mxu1  ;;  %v5898_v17 = vld [vmem:[#allocation2 + $0x150] sm:$0xff] }
 0x36a   :  { %18150 = vst [vmem:[#allocation52_spill] sm:$0xff] %v16809_v33  ;;  %v16811_v29 = vpop.f32.mrb[57].mxu1 }
 0x36b   :  { %18151 = vst [vmem:[#allocation53_spill] sm:$0xff] %v16811_v29 }
 0x36c   :  { %12894 = vmatmul.mubr.msk.f32.gmra.mrb[10].mxu0 %vm118_vm0, %v5893_v5  ;;  %v5899_v5 = vld [vmem:[#allocation2 + $0x158] sm:$0xff] }
 0x36d   :  { %12896 = vmatprep.mubr.msk.f32.mxu0 %vm118_vm0, %v5894_v11  ;;  %v16815_v24 = vpop.f32.mrb[58].mxu1  ;;  %v5900_v11 = vld [vmem:[#allocation2 + $0x160] sm:$0xff] }
 0x36e   :  { %18152 = vst [vmem:[#allocation54_spill] sm:$0xff] %v16815_v24  ;;  %v16817_v43 = vpop.f32.mrb[59].mxu1 }
 0x370   :  { %12897 = vmatmul.mubr.msk.f32.gmra.mrb[12].mxu0 %vm118_vm0, %v5895_v10  ;;  %v5901_v10 = vld [vmem:[#allocation2 + $0x168] sm:$0xff] }
 0x371   :  { %12899 = vmatprep.mubr.msk.f32.mxu0 %vm118_vm0, %v5896_v39  ;;  %v16821_v40 = vpop.f32.mrb[60].mxu1  ;;  %v5902_v39 = vld [vmem:[#allocation2 + $0x170] sm:$0xff] }
 0x372   :  { %v16823_v33 = vpop.f32.mrb[61].mxu1 }
 0x373   :  { %18153 = vst [vmem:[#allocation55_spill] sm:$0xff] %v16823_v33  ;;  %v5905_v33 = vld [vmem:[#allocation2 + $0x188] sm:$0xff] }
 0x374   :  { %12900 = vmatmul.mubr.msk.f32.gmra.mrb[14].mxu0 %vm118_vm0, %v5897_v52  ;;  %v5903_v52 = vld [vmem:[#allocation2 + $0x178] sm:$0xff] }
 0x375   :  { %12902 = vmatprep.mubr.msk.f32.mxu0 %vm118_vm0, %v5898_v17  ;;  %v16827_v29 = vpop.f32.mrb[62].mxu1  ;;  %v5904_v17 = vld [vmem:[#allocation2 + $0x180] sm:$0xff] }
 0x376   :  { %v16829_v24 = vpop.f32.mrb[63].mxu1 }
 0x378   :  { %12903 = vmatmul.mubr.msk.f32.gmra.mrb[16].mxu0 %vm118_vm0, %v5899_v5  ;;  %v5906_v5 = vld [vmem:[#allocation2 + $0x1a0] sm:$0xff] }
 0x379   :  { %12905 = vmatprep.mubr.msk.f32.mxu0 %vm118_vm0, %v5900_v11  ;;  %v5907_v11 = vld [vmem:[#allocation2 + $0x1a8] sm:$0xff] }
 0x37c   :  { %12906 = vmatmul.mubr.msk.f32.gmra.mrb[18].mxu0 %vm118_vm0, %v5901_v10 }
 0x37d   :  { %12908 = vmatprep.mubr.msk.f32.mxu0 %vm118_vm0, %v5902_v39 }
 0x380   :  { %12909 = vmatmul.mubr.msk.f32.gmra.mrb[20].mxu0 %vm118_vm0, %v5903_v52 }
 0x381   :  { %12911 = vmatprep.mubr.msk.f32.mxu0 %vm118_vm0, %v5904_v17 }
 0x384   :  { %12912 = vmatmul.mubr.msk.f32.gmra.mrb[22].mxu0 %vm118_vm0, %v5905_v33  ;;  %v5913_v33 = vld [vmem:[#allocation2 + $0x1d8] sm:$0xff] }
 0x385   :  { %12914 = vmatprep.mubr.msk.f32.mxu0 %vm118_vm0, %v5906_v5 }
 0x388   :  { %12915 = vmatmul.mubr.msk.f32.gmra.mrb[24].mxu0 %vm118_vm0, %v5907_v11 }
 0x389   :  { %12917 = vmatprep.mubr.msk.f32.mxu0 %vm118_vm0, %v16260_v54  ;;  %v5921_v54 = vld [vmem:[#allocation2 + $0x228] sm:$0xff] }
 0x38c   :  { %12918 = vmatmul.mubr.msk.f32.gmra.mrb[26].mxu0 %vm118_vm0, %v16269_v25  ;;  %v5929_v25 = vld [vmem:[#allocation2 + $0x278] sm:$0xff] }
 0x38d   :  { %12920 = vmatprep.mubr.msk.f32.mxu0 %vm118_vm0, %v16271_v45  ;;  %v10869_v45 = vld [vmem:[%s17975_s3 + $0x20] sm:$0xff] }
 0x390   :  { %12921 = vmatmul.mubr.msk.f32.gmra.mrb[28].mxu0 %vm118_vm0, %v16284_v14  ;;  %v10870_v14 = vld [vmem:[%s17975_s3 + $0x28] sm:$0xff] }
 0x391   :  { %12923 = vmatprep.mubr.msk.f32.mxu0 %vm118_vm0, %v16403_v2  ;;  %v6779_v2 = vld [vmem:[%s17975_s3 + $0x8] sm:$0xff] }
 0x394   :  { %12924 = vmatmul.mubr.msk.f32.gmra.mrb[30].mxu0 %vm118_vm0, %v5913_v33 }
 0x395   :  { %12926 = vmatprep.mubr.msk.f32.mxu0 %vm118_vm0, %v16299_v47  ;;  %v13600_v47 = vpack.c.bf16 %v10870_v14, %v10869_v45 }
 0x397   :  { %13601 = vmatprep.subr.bf16.mxu1 %v13600_v47 }
 0x398   :  { %12927 = vmatmul.mubr.msk.f32.gmra.mrb[32].mxu0 %vm118_vm0, %v16309_v15  ;;  %v18154_v15 = vmov 0.0   ;;  %13603 = vmatpush3.bf16.msra.mxu1 %v13600_v47 }
 0x399   :  { %12929 = vmatprep.mubr.msk.f32.mxu0 %vm118_vm0, %v16311_v1  ;;  %6716 = vst.msk [vmem:[#allocation3 + $0x38] sm:$0xff] %vm6708_vm1, %v18154_v15  ;;  %6709 = vst.msk [vmem:[#allocation3] sm:$0xff] %vm6708_vm1, %v18154_v15  ;;  %v5937_v1 = vld [vmem:[#allocation2 + $0x2c8] sm:$0xff] }
 0x39a   :  { %6710 = vst.msk [vmem:[#allocation3 + $0x8] sm:$0xff] %vm6708_vm1, %v18154_v15  ;;  %6711 = vst.msk [vmem:[#allocation3 + $0x10] sm:$0xff] %vm6708_vm1, %v18154_v15 }
 0x39b   :  { %6712 = vst.msk [vmem:[#allocation3 + $0x18] sm:$0xff] %vm6708_vm1, %v18154_v15  ;;  %6713 = vst.msk [vmem:[#allocation3 + $0x20] sm:$0xff] %vm6708_vm1, %v18154_v15 }
 0x39c   :  { %12930 = vmatmul.mubr.msk.f32.gmra.mrb[34].mxu0 %vm118_vm0, %v16321_v32  ;;  %6714 = vst.msk [vmem:[#allocation3 + $0x28] sm:$0xff] %vm6708_vm1, %v18154_v15  ;;  %6715 = vst.msk [vmem:[#allocation3 + $0x30] sm:$0xff] %vm6708_vm1, %v18154_v15  ;;  %v10871_v32 = vld [vmem:[%s17975_s3 + $0x30] sm:$0xff] }
 0x39d   :  { %12932 = vmatprep.mubr.msk.f32.mxu0 %vm118_vm0, %v16323_v34  ;;  %6717 = vst.msk [vmem:[#allocation3 + $0x40] sm:$0xff] %vm6708_vm1, %v18154_v15  ;;  %6718 = vst.msk [vmem:[#allocation3 + $0x48] sm:$0xff] %vm6708_vm1, %v18154_v15  ;;  %v10872_v34 = vld [vmem:[%s17975_s3 + $0x38] sm:$0xff] }
 0x39e   :  { %6719 = vst.msk [vmem:[#allocation3 + $0x50] sm:$0xff] %vm6708_vm1, %v18154_v15  ;;  %6720 = vst.msk [vmem:[#allocation3 + $0x58] sm:$0xff] %vm6708_vm1, %v18154_v15 }
 0x39f   :  { %6721 = vst.msk [vmem:[#allocation3 + $0x60] sm:$0xff] %vm6708_vm1, %v18154_v15  ;;  %6722 = vst.msk [vmem:[#allocation3 + $0x68] sm:$0xff] %vm6708_vm1, %v18154_v15 }
 0x3a0   :  { %12933 = vmatmul.mubr.msk.f32.gmra.mrb[36].mxu0 %vm118_vm0, %v16333_v37  ;;  %6723 = vst.msk [vmem:[#allocation3 + $0x70] sm:$0xff] %vm6708_vm1, %v18154_v15  ;;  %6724 = vst.msk [vmem:[#allocation3 + $0x78] sm:$0xff] %vm6708_vm1, %v18154_v15  ;;  %v13604_v37 = vpack.c.bf16 %v10872_v34, %v10871_v32 }
 0x3a1   :  { %12935 = vmatprep.mubr.msk.f32.mxu0 %vm118_vm0, %v16437_v3  ;;  %6725 = vst.msk [vmem:[#allocation3 + $0x80] sm:$0xff] %vm6708_vm1, %v18154_v15  ;;  %6726 = vst.msk [vmem:[#allocation3 + $0x88] sm:$0xff] %vm6708_vm1, %v18154_v15 }
 0x3a2   :  { %6727 = vst.msk [vmem:[#allocation3 + $0x90] sm:$0xff] %vm6708_vm1, %v18154_v15  ;;  %6728 = vst.msk [vmem:[#allocation3 + $0x98] sm:$0xff] %vm6708_vm1, %v18154_v15  ;;  %13605 = vmatprep.subr.bf16.mxu1 %v13604_v37 }
 0x3a3   :  { %6729 = vst.msk [vmem:[#allocation3 + $0xa0] sm:$0xff] %vm6708_vm1, %v18154_v15  ;;  %6730 = vst.msk [vmem:[#allocation3 + $0xa8] sm:$0xff] %vm6708_vm1, %v18154_v15  ;;  %13607 = vmatpush3.bf16.msra.mxu1 %v13604_v37 }
 0x3a4   :  { %12936 = vmatmul.mubr.msk.f32.gmra.mrb[38].mxu0 %vm118_vm0, %v5921_v54  ;;  %6731 = vst.msk [vmem:[#allocation3 + $0xb0] sm:$0xff] %vm6708_vm1, %v18154_v15  ;;  %6732 = vst.msk [vmem:[#allocation3 + $0xb8] sm:$0xff] %vm6708_vm1, %v18154_v15 }
 0x3a5   :  { %12938 = vmatprep.mubr.msk.f32.mxu0 %vm118_vm0, %v16347_v49  ;;  %6733 = vst.msk [vmem:[#allocation3 + $0xc0] sm:$0xff] %vm6708_vm1, %v18154_v15  ;;  %6734 = vst.msk [vmem:[#allocation3 + $0xc8] sm:$0xff] %vm6708_vm1, %v18154_v15  ;;  %v16980_v49 = vld [vmem:[#allocation3 + $0x8] sm:$0xff] }
 0x3a6   :  { %6735 = vst.msk [vmem:[#allocation3 + $0xd0] sm:$0xff] %vm6708_vm1, %v18154_v15  ;;  %6736 = vst.msk [vmem:[#allocation3 + $0xd8] sm:$0xff] %vm6708_vm1, %v18154_v15  ;;  %12982 = vmatprep.mubr.msk.f32.mxu1 %vm6708_vm1, %v16980_v49 }
 0x3a7   :  { %6737 = vst.msk [vmem:[#allocation3 + $0xe0] sm:$0xff] %vm6708_vm1, %v18154_v15  ;;  %6738 = vst.msk [vmem:[#allocation3 + $0xe8] sm:$0xff] %vm6708_vm1, %v18154_v15 }
 0x3a8   :  { %12939 = vmatmul.mubr.msk.f32.gmra.mrb[40].mxu0 %vm118_vm0, %v16357_v51  ;;  %6739 = vst.msk [vmem:[#allocation3 + $0xf0] sm:$0xff] %vm6708_vm1, %v18154_v15  ;;  %6740 = vst.msk [vmem:[#allocation3 + $0xf8] sm:$0xff] %vm6708_vm1, %v18154_v15  ;;  %v16984_v51 = vld [vmem:[#allocation3 + $0x10] sm:$0xff] }
 0x3a9   :  { %12941 = vmatprep.mubr.msk.f32.mxu0 %vm118_vm0, %v16359_v57  ;;  %6741 = vst.msk [vmem:[#allocation3 + $0x100] sm:$0xff] %vm6708_vm1, %v18154_v15  ;;  %6742 = vst.msk [vmem:[#allocation3 + $0x108] sm:$0xff] %vm6708_vm1, %v18154_v15  ;;  %12983 = vmatmul.mubr.msk.f32.vlgmr.msra.gmra.mrb[64].mxu1 %vm6708_vm1, %v16984_v51  ;;  %v16992_v57 = vld [vmem:[#allocation3 + $0x18] sm:$0xff] }
 0x3aa   :  { %6743 = vst.msk [vmem:[#allocation3 + $0x110] sm:$0xff] %vm6708_vm1, %v18154_v15  ;;  %6744 = vst.msk [vmem:[#allocation3 + $0x118] sm:$0xff] %vm6708_vm1, %v18154_v15  ;;  %12985 = vmatprep.mubr.msk.f32.mxu1 %vm6708_vm1, %v16992_v57 }
 0x3ab   :  { %8847 = vst.msk [vmem:[#allocation4 + $0x28] sm:$0xff] %vm8841_vm2, %v18154_v15  ;;  %8842 = vst.msk [vmem:[#allocation4] sm:$0xff] %vm8841_vm2, %v18154_v15 }
 0x3ac   :  { %12942 = vmatmul.mubr.msk.f32.gmra.mrb[42].mxu0 %vm118_vm0, %v16369_v59  ;;  %v16996_v59 = vld [vmem:[#allocation3 + $0x20] sm:$0xff]  ;;  %8843 = vst.msk [vmem:[#allocation4 + $0x8] sm:$0xff] %vm8841_vm2, %v18154_v15  ;;  %8844 = vst.msk [vmem:[#allocation4 + $0x10] sm:$0xff] %vm8841_vm2, %v18154_v15 }
 0x3ad   :  { %12944 = vmatprep.mubr.msk.f32.mxu0 %vm118_vm0, %v16371_v61  ;;  %12986 = vmatmul.mubr.msk.f32.gmra.mrb[66].mxu1 %vm6708_vm1, %v16996_v59  ;;  %v5945_v61 = vld [vmem:[#allocation2 + $0x318] sm:$0xff]  ;;  %8845 = vst.msk [vmem:[#allocation4 + $0x18] sm:$0xff] %vm8841_vm2, %v18154_v15  ;;  %8846 = vst.msk [vmem:[#allocation4 + $0x20] sm:$0xff] %vm8841_vm2, %v18154_v15 }
 0x3ae   :  { %8848 = vst.msk [vmem:[#allocation4 + $0x30] sm:$0xff] %vm8841_vm2, %v18154_v15  ;;  %8849 = vst.msk [vmem:[#allocation4 + $0x38] sm:$0xff] %vm8841_vm2, %v18154_v15 }
 0x3af   :  { %8850 = vst.msk [vmem:[#allocation4 + $0x40] sm:$0xff] %vm8841_vm2, %v18154_v15  ;;  %8851 = vst.msk [vmem:[#allocation4 + $0x48] sm:$0xff] %vm8841_vm2, %v18154_v15 }
 0x3b0   :  { %12945 = vmatmul.mubr.msk.f32.gmra.mrb[44].mxu0 %vm118_vm0, %v16381_v62  ;;  %v6778_v62 = vld [vmem:[%s17975_s3] sm:$0xff]  ;;  %8852 = vst.msk [vmem:[#allocation4 + $0x50] sm:$0xff] %vm8841_vm2, %v18154_v15  ;;  %8853 = vst.msk [vmem:[#allocation4 + $0x58] sm:$0xff] %vm8841_vm2, %v18154_v15 }
 0x3b1   :  { %12947 = vmatprep.mubr.msk.f32.mxu0 %vm118_vm0, %v16471_v6  ;;  %v13608_v3 = vpack.c.bf16 %v6779_v2, %v6778_v62  ;;  %v6780_v6 = vld [vmem:[%s17975_s3 + $0x10] sm:$0xff]  ;;  %8854 = vst.msk [vmem:[#allocation4 + $0x60] sm:$0xff] %vm8841_vm2, %v18154_v15  ;;  %8855 = vst.msk [vmem:[#allocation4 + $0x68] sm:$0xff] %vm8841_vm2, %v18154_v15 }
 0x3b2   :  { %8856 = vst.msk [vmem:[#allocation4 + $0x70] sm:$0xff] %vm8841_vm2, %v18154_v15  ;;  %8857 = vst.msk [vmem:[#allocation4 + $0x78] sm:$0xff] %vm8841_vm2, %v18154_v15 }
 0x3b3   :  { %13609 = vmatprep.subr.bf16.mxu1 %v13608_v3 }
 0x3b4   :  { %12948 = vmatmul.mubr.msk.f32.gmra.mrb[46].mxu0 %vm118_vm0, %v5929_v25  ;;  %13611 = vmatpush3.bf16.msra.mxu1 %v13608_v3 }
 0x3b5   :  { %12950 = vmatprep.mubr.msk.f32.mxu0 %vm118_vm0, %v16496_v13  ;;  %v6781_v13 = vld [vmem:[%s17975_s3 + $0x18] sm:$0xff] }
 0x3b8   :  { %12951 = vmatmul.mubr.msk.f32.gmra.mrb[48].mxu0 %vm118_vm0, %v16502_v18  ;;  %v13612_v18 = vpack.c.bf16 %v6781_v13, %v6780_v6 }
 0x3b9   :  { %12953 = vmatprep.mubr.msk.f32.mxu0 %vm118_vm0, %v16504_v21  ;;  %v10905_v21 = vld [vmem:[%s17975_s3 + $0x40] sm:$0xff] }
 0x3ba   :  { %13613 = vmatprep.subr.bf16.mxu1 %v13612_v18 }
 0x3bb   :  { %13615 = vmatpush3.bf16.msra.mxu1 %v13612_v18 }
 0x3bc   :  { %12954 = vmatmul.mubr.msk.f32.gmra.mrb[50].mxu0 %vm118_vm0, %v16510_v22  ;;  %v10906_v22 = vld [vmem:[%s17975_s3 + $0x48] sm:$0xff] }
 0x3bd   :  { %12956 = vmatprep.mubr.msk.f32.mxu0 %vm118_vm0, %v16512_v26  ;;  %v17027_v26 = vpack.c.bf16 %v10906_v22, %v10905_v21 }
 0x3bf   :  { %13617 = vmatprep.subr.bf16.mxu1 %v17027_v26 }
 0x3c0   :  { %12957 = vmatmul.mubr.msk.f32.gmra.mrb[52].mxu0 %vm118_vm0, %v16518_v28 }
 0x3c1   :  { %12959 = vmatprep.mubr.msk.f32.mxu0 %vm118_vm0, %v16732_v56 }
 0x3c4   :  { %12960 = vmatmul.mubr.msk.f32.gmra.mrb[54].mxu0 %vm118_vm0, %v5937_v1 }
 0x3c5   :  { %12962 = vmatprep.mubr.msk.f32.mxu0 %vm118_vm0, %v16525_v9 }
 0x3c8   :  { %12963 = vmatmul.mubr.msk.f32.gmra.mrb[56].mxu0 %vm118_vm0, %v16531_v20 }
 0x3c9   :  { %12965 = vmatprep.mubr.msk.f32.mxu0 %vm118_vm0, %v16533_v38 }
 0x3cc   :  { %12966 = vmatmul.mubr.msk.f32.gmra.mrb[58].mxu0 %vm118_vm0, %v16539_v50 }
 0x3cd   :  { %12968 = vmatprep.mubr.msk.f32.mxu0 %vm118_vm0, %v16541_v63 }
 0x3d0   :  { %12969 = vmatmul.mubr.msk.f32.gmra.mrb[60].mxu0 %vm118_vm0, %v16547_v36 }
 0x3d1   :  { %12971 = vmatprep.mubr.msk.f32.mxu0 %vm118_vm0, %v16764_v35 }
 0x3d4   :  { %12972 = vmatmul.mubr.msk.f32.gmra.mrb[62].mxu0 %vm118_vm0, %v5945_v61 }
 0x42b   :  { %v12880_v28 = vpop.f32.mrb[0].mxu0 }
 0x42c   :  { %v13914_v9 = vadd.f32 %v12880_v28, %v16592_v41  ;;  %v6206_v20 = vpop.f32.mrb[1].mxu0 }
 0x42d   :  { %v13915_v38 = vadd.f32 %v6206_v20, %v16596_v46  ;;  %v17041_v46 = vld [vmem:[%s17974_s2] ss:$0 sm:$0xff] }
 0x42e   :  { %v6597_v54 = vadd.f32 %v13914_v9, %v17041_v46 }
 0x42f   :  { %v12883_v50 = vpop.f32.mrb[2].mxu0 }
 0x430   :  { %v13916_v63 = vadd.f32 %v12883_v50, %v16600_v4  ;;  %v6216_v36 = vpop.f32.mrb[3].mxu0 }
 0x431   :  { %v13917_v35 = vadd.f32 %v6216_v36, %v16604_v8 }
 0x433   :  { %v12886_v56 = vpop.f32.mrb[4].mxu0  ;;  %v6598_v34 = vadd.f32 %v13917_v35, %v17041_v46 }
 0x434   :  { %v13918_v10 = vadd.f32 %v12886_v56, %v16608_v12  ;;  %v6226_v39 = vpop.f32.mrb[5].mxu0 }
 0x435   :  { %v13919_v52 = vadd.f32 %v6226_v39, %v16612_v7 }
 0x437   :  { %v12889_v17 = vpop.f32.mrb[6].mxu0  ;;  %v6600_v21 = vadd.f32 %v13919_v52, %v17041_v46 }
 0x438   :  { %v13920_v5 = vadd.f32 %v12889_v17, %v16616_v16  ;;  %v6236_v11 = vpop.f32.mrb[7].mxu0  ;;  %v6596_v16 = vadd.f32 %v13915_v38, %v17041_v46 }
 0x439   :  { %v13921_v41 = vadd.f32 %v6236_v11, %v16620_v19 }
 0x43b   :  { %v12892_v4 = vpop.f32.mrb[8].mxu0  ;;  %v6602_v35 = vadd.f32 %v13921_v41, %v17041_v46 }
 0x43c   :  { %v13922_v8 = vadd.f32 %v12892_v4, %v16624_v23  ;;  %v6246_v33 = vpop.f32.mrb[9].mxu0  ;;  %v6599_v23 = vadd.f32 %v13916_v63, %v17041_v46 }
 0x43d   :  { %v13923_v12 = vadd.f32 %v6246_v33, %v16628_v27 }
 0x43e   :  { %v6605_v7 = vadd.f32 %v13922_v8, %v17041_v46 }
 0x43f   :  { %v6604_v25 = vadd.f32 %v13923_v12, %v17041_v46  ;;  %v12895_v19 = vpop.f32.mrb[10].mxu0 }
 0x440   :  { %v6661_v45 = vmax.f32 %v6597_v54, %v6605_v7  ;;  %v13924_v14 = vadd.f32 %v12895_v19, %v16632_v48  ;;  %v6256_v47 = vpop.f32.mrb[11].mxu0  ;;  %v18155_v7 = vld [vmem:[#allocation16_spill] sm:$0xff]  ;;  %v18156_v19 = vld [vmem:[#allocation17_spill] sm:$0xff] }
 0x441   :  { %v6660_v1 = vmax.f32 %v6596_v16, %v6604_v25  ;;  %v13925_v32 = vadd.f32 %v6256_v47, %v16636_v60  ;;  %v6601_v60 = vadd.f32 %v13918_v10, %v17041_v46 }
 0x442   :  { %v6607_v27 = vadd.f32 %v13924_v14, %v17041_v46  ;;  %v18157_v14 = vld [vmem:[#allocation18_spill] sm:$0xff] }
 0x443   :  { %v6692_v37 = vmax.f32 %v6660_v1, %v6661_v45  ;;  %v6606_v61 = vadd.f32 %v13925_v32, %v17041_v46  ;;  %v12898_v62 = vpop.f32.mrb[12].mxu0 }
 0x444   :  { %v6663_v2 = vmax.f32 %v6599_v23, %v6607_v27  ;;  %v13926_v3 = vadd.f32 %v12898_v62, %v16640_v30  ;;  %v6266_v6 = vpop.f32.mrb[13].mxu0  ;;  %v18160_v62 = vld [vmem:[#allocation24_spill] sm:$0xff] }
 0x445   :  { %6746 = vst.msk [vmem:[#allocation3 + $0x38] sm:$0xff] %vm6708_vm1, %v6692_v37  ;;  %v6662_v48 = vmax.f32 %v6598_v34, %v6606_v61  ;;  %v13927_v13 = vadd.f32 %v6266_v6, %v16644_v31  ;;  %v6603_v31 = vadd.f32 %v13920_v5, %v17041_v46  ;;  %v18159_v34 = vld [vmem:[#allocation23_spill] sm:$0xff] }
 0x446   :  { %v6609_v18 = vadd.f32 %v13926_v3, %v17041_v46 }
 0x447   :  { %v6693_v22 = vmax.f32 %v6662_v48, %v6663_v2  ;;  %v6608_v28 = vadd.f32 %v13927_v13, %v17041_v46  ;;  %v12901_v9 = vpop.f32.mrb[14].mxu0 }
 0x448   :  { %v6665_v20 = vmax.f32 %v6601_v60, %v6609_v18  ;;  %v13928_v38 = vadd.f32 %v12901_v9, %v16648_v0  ;;  %v6276_v30 = vpop.f32.mrb[15].mxu0 }
 0x449   :  { %6747 = vst.msk [vmem:[#allocation3 + $0x40] sm:$0xff] %vm6708_vm1, %v6693_v22  ;;  %v6664_v50 = vmax.f32 %v6600_v21, %v6608_v28  ;;  %v13929_v63 = vadd.f32 %v6276_v30, %v16652_v42  ;;  %v18161_v21 = vld [vmem:[#allocation20_spill] sm:$0xff] }
 0x44a   :  { %v6611_v36 = vadd.f32 %v13928_v38, %v17041_v46 }
 0x44b   :  { %v6694_v56 = vmax.f32 %v6664_v50, %v6665_v20  ;;  %v6610_v10 = vadd.f32 %v13929_v63, %v17041_v46  ;;  %v12904_v39 = vpop.f32.mrb[16].mxu0  ;;  %v18162_v20 = vld [vmem:[#allocation25_spill] sm:$0xff] }
 0x44c   :  { %v6667_v52 = vmax.f32 %v6603_v31, %v6611_v36  ;;  %v13930_v17 = vadd.f32 %v12904_v39, %v16656_v44  ;;  %v6286_v0 = vpop.f32.mrb[17].mxu0  ;;  %v17070_v11 = vld [vmem:[#allocation3 + $0x38] sm:$0xff] }
 0x44d   :  { %6748 = vst.msk [vmem:[#allocation3 + $0x48] sm:$0xff] %vm6708_vm1, %v6694_v56  ;;  %v6666_v4 = vmax.f32 %v6602_v35, %v6610_v10  ;;  %v13931_v42 = vadd.f32 %v6286_v0, %v16660_v55  ;;  %12988 = vmatprep.mubr.msk.f32.mxu1 %vm6708_vm1, %v17070_v11  ;;  %v18163_v10 = vld [vmem:[#allocation26_spill] sm:$0xff]  ;;  %v18164_v0 = vld [vmem:[#allocation27_spill] sm:$0xff] }
 0x44e   :  { %v6613_v3 = vadd.f32 %v13930_v17, %v17041_v46 }
 0x44f   :  { %v6695_v5 = vmax.f32 %v6666_v4, %v6667_v52  ;;  %v12907_v41 = vpop.f32.mrb[18].mxu0  ;;  %v6612_v48 = vadd.f32 %v13931_v42, %v17041_v46 }
 0x450   :  { %v13932_v8 = vadd.f32 %v12907_v41, %v16664_v58  ;;  %v6296_v33 = vpop.f32.mrb[19].mxu0  ;;  %v17077_v12 = vld [vmem:[#allocation3 + $0x40] sm:$0xff] }
 0x451   :  { %6749 = vst.msk [vmem:[#allocation3 + $0x50] sm:$0xff] %vm6708_vm1, %v6695_v5  ;;  %v13933_v44 = vadd.f32 %v6296_v33, %v16668_v53  ;;  %12989 = vmatmul.mubr.msk.f32.gmra.mrb[68].mxu1 %vm6708_vm1, %v17077_v12  ;;  %v18158_v53 = vld [vmem:[#allocation19_spill] sm:$0xff] }
 0x452   :  { %v6615_v30 = vadd.f32 %v13932_v8, %v17041_v46 }
 0x453   :  { %v12910_v54 = vpop.f32.mrb[20].mxu0  ;;  %v6614_v63 = vadd.f32 %v13933_v44, %v17041_v46 }
 0x454   :  { %v13934_v55 = vadd.f32 %v12910_v54, %v18155_v7  ;;  %v6306_v16 = vpop.f32.mrb[21].mxu0  ;;  %v17084_v25 = vld [vmem:[#allocation3 + $0x48] sm:$0xff] }
 0x455   :  { %v13935_v45 = vadd.f32 %v6306_v16, %v18156_v19  ;;  %12991 = vmatprep.mubr.msk.f32.mxu1 %vm6708_vm1, %v17084_v25  ;;  %v18165_v7 = vld [vmem:[#allocation28_spill] sm:$0xff] }
 0x456   :  { %v6617_v42 = vadd.f32 %v13934_v55, %v17041_v46 }
 0x457   :  { %v12913_v58 = vpop.f32.mrb[22].mxu0  ;;  %v6616_v41 = vadd.f32 %v13935_v45, %v17041_v46 }
 0x458   :  { %v13936_v47 = vadd.f32 %v12913_v58, %v18157_v14  ;;  %v6316_v1 = vpop.f32.mrb[23].mxu0  ;;  %v17090_v32 = vld [vmem:[#allocation3 + $0x50] sm:$0xff] }
 0x459   :  { %v13937_v23 = vadd.f32 %v6316_v1, %v18158_v53  ;;  %12992 = vmatmul.mubr.msk.f32.gmra.mrb[70].mxu1 %vm6708_vm1, %v17090_v32  ;;  %v18166_v14 = vld [vmem:[#allocation29_spill] sm:$0xff] }
 0x45a   :  { %v6619_v53 = vadd.f32 %v13936_v47, %v17041_v46 }
 0x45b   :  { %v12916_v27 = vpop.f32.mrb[24].mxu0 }
 0x45c   :  { %v13938_v37 = vadd.f32 %v12916_v27, %v18159_v34  ;;  %v6326_v61 = vpop.f32.mrb[25].mxu0  ;;  %v6618_v27 = vadd.f32 %v13937_v23, %v17041_v46 }
 0x45d   :  { %v13939_v2 = vadd.f32 %v6326_v61, %v18160_v62  ;;  %v18167_v62 = vld [vmem:[#allocation21_spill] sm:$0xff] }
 0x45e   :  { %v6621_v6 = vadd.f32 %v13938_v37, %v17041_v46 }
 0x45f   :  { %v6620_v13 = vadd.f32 %v13939_v2, %v17041_v46  ;;  %v12919_v60 = vpop.f32.mrb[26].mxu0 }
 0x460   :  { %v6669_v18 = vmax.f32 %v6613_v3, %v6621_v6  ;;  %v13940_v22 = vadd.f32 %v12919_v60, %v18161_v21  ;;  %v6336_v28 = vpop.f32.mrb[27].mxu0 }
 0x461   :  { %v6668_v9 = vmax.f32 %v6612_v48, %v6620_v13  ;;  %v13941_v38 = vadd.f32 %v6336_v28, %v18162_v20  ;;  %v18168_v13 = vld [vmem:[#allocation30_spill] sm:$0xff] }
 0x462   :  { %v6623_v50 = vadd.f32 %v13940_v22, %v17041_v46 }
 0x463   :  { %v6696_v31 = vmax.f32 %v6668_v9, %v6669_v18  ;;  %v6622_v36 = vadd.f32 %v13941_v38, %v17041_v46  ;;  %v12922_v35 = vpop.f32.mrb[28].mxu0  ;;  %v18169_v18 = vld [vmem:[#allocation22_spill] sm:$0xff]  ;;  %v18170_v9 = vld [vmem:[#allocation31_spill] sm:$0xff] }
 0x464   :  { %v6671_v56 = vmax.f32 %v6615_v30, %v6623_v50  ;;  %v13942_v39 = vadd.f32 %v12922_v35, %v18163_v10  ;;  %v6346_v52 = vpop.f32.mrb[29].mxu0  ;;  %v18171_v30 = vld [vmem:[#allocation32_spill] sm:$0xff]  ;;  %v18173_v10 = vld [vmem:[#allocation34_spill] sm:$0xff] }
 0x465   :  { %6750 = vst.msk [vmem:[#allocation3 + $0x68] sm:$0xff] %vm6708_vm1, %v6696_v31  ;;  %v6670_v17 = vmax.f32 %v6614_v63, %v6622_v36  ;;  %v13943_v4 = vadd.f32 %v6346_v52, %v18164_v0  ;;  %v18172_v36 = vld [vmem:[#allocation33_spill] sm:$0xff]  ;;  %v18174_v0 = vld [vmem:[#allocation35_spill] sm:$0xff] }
 0x466   :  { %v6625_v5 = vadd.f32 %v13942_v39, %v17041_v46 }
 0x467   :  { %v6697_v8 = vmax.f32 %v6670_v17, %v6671_v56  ;;  %v6624_v33 = vadd.f32 %v13943_v4, %v17041_v46  ;;  %v12925_v44 = vpop.f32.mrb[30].mxu0 }
 0x468   :  { %v6673_v54 = vmax.f32 %v6617_v42, %v6625_v5  ;;  %v13944_v16 = vadd.f32 %v12925_v44, %v18165_v7  ;;  %v6356_v19 = vpop.f32.mrb[31].mxu0  ;;  %v18175_v5 = vld [vmem:[#allocation36_spill] sm:$0xff] }
 0x469   :  { %6751 = vst.msk [vmem:[#allocation3 + $0x70] sm:$0xff] %vm6708_vm1, %v6697_v8  ;;  %v6672_v58 = vmax.f32 %v6616_v41, %v6624_v33  ;;  %v13945_v1 = vadd.f32 %v6356_v19, %v18166_v14  ;;  %v18176_v33 = vld [vmem:[#allocation37_spill] sm:$0xff] }
 0x46a   :  { %v6627_v55 = vadd.f32 %v13944_v16, %v17041_v46 }
 0x46b   :  { %v6698_v45 = vmax.f32 %v6672_v58, %v6673_v54  ;;  %v6626_v34 = vadd.f32 %v13945_v1, %v17041_v46  ;;  %v12928_v37 = vpop.f32.mrb[32].mxu0  ;;  %v18177_v1 = vld [vmem:[#allocation38_spill] sm:$0xff] }
 0x46c   :  { %v6675_v61 = vmax.f32 %v6619_v53, %v6627_v55  ;;  %v13946_v2 = vadd.f32 %v12928_v37, %v18167_v62  ;;  %v6366_v3 = vpop.f32.mrb[33].mxu0  ;;  %v17122_v6 = vld [vmem:[#allocation3 + $0x68] sm:$0xff] }
 0x46d   :  { %6752 = vst.msk [vmem:[#allocation3 + $0x78] sm:$0xff] %vm6708_vm1, %v6698_v45  ;;  %v6674_v48 = vmax.f32 %v6618_v27, %v6626_v34  ;;  %v13947_v60 = vadd.f32 %v6366_v3, %v18168_v13  ;;  %12994 = vmatprep.mubr.msk.f32.mxu1 %vm6708_vm1, %v17122_v6  ;;  %v18178_v45 = vld [vmem:[#allocation40_spill] sm:$0xff] }
 0x46e   :  { %v6629_v54 = vadd.f32 %v13946_v2, %v17041_v46 }
 0x46f   :  { %v6699_v47 = vmax.f32 %v6674_v48, %v6675_v61  ;;  %v12931_v23 = vpop.f32.mrb[34].mxu0  ;;  %v6628_v16 = vadd.f32 %v13947_v60, %v17041_v46  ;;  %v18179_v60 = vld [vmem:[#allocation41_spill] sm:$0xff] }
 0x470   :  { %v13948_v21 = vadd.f32 %v12931_v23, %v18169_v18  ;;  %v6376_v22 = vpop.f32.mrb[35].mxu0  ;;  %v17129_v28 = vld [vmem:[#allocation3 + $0x70] sm:$0xff] }
 0x471   :  { %6753 = vst.msk [vmem:[#allocation3 + $0x80] sm:$0xff] %vm6708_vm1, %v6699_v47  ;;  %v13949_v20 = vadd.f32 %v6376_v22, %v18170_v9  ;;  %12995 = vmatmul.mubr.msk.f32.gmra.mrb[72].mxu1 %vm6708_vm1, %v17129_v28  ;;  %v18180_v22 = vld [vmem:[#allocation42_spill] sm:$0xff] }
 0x472   :  { %v6631_v37 = vadd.f32 %v13948_v21, %v17041_v46 }
 0x473   :  { %v12934_v38 = vpop.f32.mrb[36].mxu0  ;;  %v6630_v62 = vadd.f32 %v13949_v20, %v17041_v46 }
 0x474   :  { %v13950_v50 = vadd.f32 %v12934_v38, %v18171_v30  ;;  %v6386_v63 = vpop.f32.mrb[37].mxu0  ;;  %v17136_v31 = vld [vmem:[#allocation3 + $0x78] sm:$0xff] }
 0x475   :  { %v13951_v35 = vadd.f32 %v6386_v63, %v18172_v36  ;;  %12997 = vmatprep.mubr.msk.f32.mxu1 %vm6708_vm1, %v17136_v31 }
 0x476   :  { %v6633_v38 = vadd.f32 %v13950_v50, %v17041_v46 }
 0x477   :  { %v12937_v56 = vpop.f32.mrb[38].mxu0  ;;  %v6632_v30 = vadd.f32 %v13951_v35, %v17041_v46 }
 0x478   :  { %v13952_v39 = vadd.f32 %v12937_v56, %v18173_v10  ;;  %v6396_v52 = vpop.f32.mrb[39].mxu0  ;;  %v17142_v17 = vld [vmem:[#allocation3 + $0x80] sm:$0xff] }
 0x479   :  { %v13953_v4 = vadd.f32 %v6396_v52, %v18174_v0  ;;  %12998 = vmatmul.mubr.msk.f32.gmra.mrb[74].mxu1 %vm6708_vm1, %v17142_v17  ;;  %v18181_v10 = vld [vmem:[#allocation43_spill] sm:$0xff] }
 0x47b   :  { %v12940_v42 = vpop.f32.mrb[40].mxu0 }
 0x47c   :  { %v13954_v41 = vadd.f32 %v12940_v42, %v18175_v5  ;;  %v6406_v8 = vpop.f32.mrb[41].mxu0  ;;  %v18182_v5 = vld [vmem:[#allocation44_spill] sm:$0xff] }
 0x47d   :  { %v13955_v44 = vadd.f32 %v6406_v8, %v18176_v33  ;;  %v6635_v8 = vadd.f32 %v13952_v39, %v17041_v46  ;;  %v6634_v33 = vadd.f32 %v13953_v4, %v17041_v46 }
 0x47e   :  { %v6637_v7 = vadd.f32 %v13954_v41, %v17041_v46 }
 0x47f   :  { %v6636_v19 = vadd.f32 %v13955_v44, %v17041_v46  ;;  %v12943_v58 = vpop.f32.mrb[42].mxu0 }
 0x480   :  { %v6677_v14 = vmax.f32 %v6629_v54, %v6637_v7  ;;  %v13956_v53 = vadd.f32 %v12943_v58, %v18177_v1  ;;  %v6416_v55 = vpop.f32.mrb[43].mxu0 }
 0x481   :  { %v6676_v27 = vmax.f32 %v6628_v16, %v6636_v19  ;;  %v13957_v34 = vadd.f32 %v6416_v55, %v18178_v45  ;;  %v18183_v16 = vld [vmem:[#allocation45_spill] sm:$0xff] }
 0x482   :  { %v6639_v61 = vadd.f32 %v13956_v53, %v17041_v46  ;;  %v18184_v53 = vld [vmem:[#allocation47_spill] sm:$0xff] }
 0x483   :  { %v6700_v2 = vmax.f32 %v6676_v27, %v6677_v14  ;;  %v6638_v3 = vadd.f32 %v13957_v34, %v17041_v46  ;;  %v12946_v48 = vpop.f32.mrb[44].mxu0  ;;  %v18185_v27 = vld [vmem:[#allocation48_spill] sm:$0xff] }
 0x484   :  { %v6679_v13 = vmax.f32 %v6631_v37, %v6639_v61  ;;  %v13958_v47 = vadd.f32 %v12946_v48, %v18179_v60  ;;  %v6426_v23 = vpop.f32.mrb[45].mxu0  ;;  %v18186_v61 = vld [vmem:[#allocation49_spill] sm:$0xff] }
 0x485   :  { %6754 = vst.msk [vmem:[#allocation3 + $0x98] sm:$0xff] %vm6708_vm1, %v6700_v2  ;;  %v6678_v18 = vmax.f32 %v6630_v62, %v6638_v3  ;;  %v13959_v9 = vadd.f32 %v6426_v23, %v18180_v22  ;;  %v18187_v3 = vld [vmem:[#allocation50_spill] sm:$0xff]  ;;  %v6762_v22 = vld [vmem:[#allocation3] sm:$0xff] }
 0x486   :  { %v6641_v21 = vadd.f32 %v13958_v47, %v17041_v46  ;;  %v18188_v47 = vld [vmem:[#allocation39_spill] sm:$0xff] }
 0x487   :  { %v6701_v20 = vmax.f32 %v6678_v18, %v6679_v13  ;;  %v6640_v63 = vadd.f32 %v13959_v9, %v17041_v46  ;;  %v12949_v36 = vpop.f32.mrb[46].mxu0  ;;  %v18189_v9 = vld [vmem:[#allocation46_spill] sm:$0xff] }
 0x488   :  { %v6681_v56 = vmax.f32 %v6633_v38, %v6641_v21  ;;  %v13960_v52 = vadd.f32 %v12949_v36, %v18181_v10  ;;  %v6436_v0 = vpop.f32.mrb[47].mxu0  ;;  %v18190_v36 = vld [vmem:[#allocation51_spill] sm:$0xff] }
 0x489   :  { %6755 = vst.msk [vmem:[#allocation3 + $0xa0] sm:$0xff] %vm6708_vm1, %v6701_v20  ;;  %v6680_v42 = vmax.f32 %v6632_v30, %v6640_v63  ;;  %v13961_v41 = vadd.f32 %v6436_v0, %v18182_v5  ;;  %v10907_v20 = vld [vmem:[%s17975_s3 + $0x50] sm:$0xff]  ;;  %v10908_v63 = vld [vmem:[%s17975_s3 + $0x58] sm:$0xff]  ;;  %v18191_v0 = vld [vmem:[#allocation52_spill] sm:$0xff] }
 0x48a   :  { %v6643_v50 = vadd.f32 %v13960_v52, %v17041_v46  ;;  %v13620_v52 = vpack.c.bf16 %v10908_v63, %v10907_v20 }
 0x48b   :  { %v6702_v35 = vmax.f32 %v6680_v42, %v6681_v56  ;;  %v6642_v44 = vadd.f32 %v13961_v41, %v17041_v46  ;;  %v12952_v54 = vpop.f32.mrb[48].mxu0  ;;  %v10925_v41 = vld [vmem:[%s17975_s3 + $0x60] sm:$0xff] }
 0x48c   :  { %v6683_v7 = vmax.f32 %v6635_v8, %v6643_v50  ;;  %v13962_v19 = vadd.f32 %v12952_v54, %v18183_v16  ;;  %v6446_v58 = vpop.f32.mrb[49].mxu0  ;;  %v17174_v14 = vld [vmem:[#allocation3 + $0x98] sm:$0xff]  ;;  %v10926_v8 = vld [vmem:[%s17975_s3 + $0x68] sm:$0xff]  ;;  %v18192_v50 = vld [vmem:[#allocation53_spill] sm:$0xff] }
 0x48d   :  { %6756 = vst.msk [vmem:[#allocation3 + $0xa8] sm:$0xff] %vm6708_vm1, %v6702_v35  ;;  %v6682_v1 = vmax.f32 %v6634_v33, %v6642_v44  ;;  %v13963_v55 = vadd.f32 %v6446_v58, %v18184_v53  ;;  %13000 = vmatprep.mubr.msk.f32.mxu1 %vm6708_vm1, %v17174_v14  ;;  %v17225_v58 = vld [vmem:[#allocation3 + $0x30] sm:$0xff]  ;;  %v18193_v53 = vld [vmem:[#allocation54_spill] sm:$0xff] }
 0x48e   :  { %v6645_v35 = vadd.f32 %v13962_v19, %v17041_v46 }
 0x48f   :  { %v6703_v39 = vmax.f32 %v6682_v1, %v6683_v7  ;;  %v12955_v4 = vpop.f32.mrb[50].mxu0  ;;  %v6644_v54 = vadd.f32 %v13963_v55, %v17041_v46  ;;  %v17227_v1 = vpack.c.bf16 %v10926_v8, %v10925_v41 }
 0x490   :  { %v13964_v45 = vadd.f32 %v12955_v4, %v18185_v27  ;;  %v6456_v34 = vpop.f32.mrb[51].mxu0  ;;  %v17181_v37 = vld [vmem:[#allocation3 + $0xa0] sm:$0xff] }
 0x491   :  { %6757 = vst.msk [vmem:[#allocation3 + $0xb0] sm:$0xff] %vm6708_vm1, %v6703_v39  ;;  %v13965_v62 = vadd.f32 %v6456_v34, %v18186_v61  ;;  %13001 = vmatmul.mubr.msk.f32.gmra.mrb[76].mxu1 %vm6708_vm1, %v17181_v37 }
 0x492   :  { %v6647_v55 = vadd.f32 %v13964_v45, %v17041_v46 }
 0x493   :  { %v12958_v2 = vpop.f32.mrb[52].mxu0  ;;  %v6646_v34 = vadd.f32 %v13965_v62, %v17041_v46 }
 0x494   :  { %v13966_v48 = vadd.f32 %v12958_v2, %v18187_v3  ;;  %v6466_v13 = vpop.f32.mrb[53].mxu0  ;;  %v17188_v60 = vld [vmem:[#allocation3 + $0xa8] sm:$0xff] }
 0x495   :  { %v13967_v23 = vadd.f32 %v6466_v13, %v18188_v47  ;;  %13003 = vmatprep.mubr.msk.f32.mxu1 %vm6708_vm1, %v17188_v60 }
 0x496   :  { %v6649_v62 = vadd.f32 %v13966_v48, %v17041_v46 }
 0x497   :  { %v12961_v18 = vpop.f32.mrb[54].mxu0 }
 0x498   :  { %v17194_v38 = vadd.f32 %v12961_v18, %v18189_v9  ;;  %v6476_v21 = vpop.f32.mrb[55].mxu0  ;;  %v17196_v30 = vld [vmem:[#allocation3 + $0xb0] sm:$0xff]  ;;  %v18194_v18 = vld [vmem:[#allocation55_spill] sm:$0xff] }
 0x499   :  { %v13969_v56 = vadd.f32 %v6476_v21, %v18190_v36  ;;  %13004 = vmatmul.mubr.msk.f32.gmra.mrb[78].mxu1 %vm6708_vm1, %v17196_v30  ;;  %v6648_v21 = vadd.f32 %v13967_v23, %v17041_v46  ;;  %v17251_v36 = vld [vmem:[#allocation3 + $0x60] sm:$0xff] }
 0x49a   :  { %13014 = vmatprep.mubr.msk.f32.mxu1 %vm6708_vm1, %v6762_v22  ;;  %v6651_v23 = vadd.f32 %v17194_v38, %v17041_v46 }
 0x49b   :  { %v12964_v10 = vpop.f32.mrb[56].mxu0  ;;  %v6650_v41 = vadd.f32 %v13969_v56, %v17041_v46  ;;  %v10928_v56 = vld [vmem:[%s17975_s3 + $0x78] sm:$0xff] }
 0x49c   :  { %v13970_v42 = vadd.f32 %v12964_v10, %v18191_v0  ;;  %v6486_v5 = vpop.f32.mrb[57].mxu0 }
 0x49d   :  { %v13971_v33 = vadd.f32 %v6486_v5, %v18192_v50  ;;  %13015 = vmatmul.mubr.msk.f32.vlgmr.msra.gmra.mrb[64].mxu1 %vm6708_vm1, %v16980_v49 }
 0x49e   :  { %v6653_v44 = vadd.f32 %v13970_v42, %v17041_v46  ;;  %13619 = vmatpush3.bf16.msra.mxu1 %v17027_v26  ;;  %13017 = vmatprep.mubr.msk.f32.mxu1 %vm6708_vm1, %v16984_v51 }
 0x49f   :  { %v6652_v7 = vadd.f32 %v13971_v33, %v17041_v46  ;;  %v12967_v16 = vpop.f32.mrb[58].mxu0  ;;  %13621 = vmatprep.subr.bf16.mxu1 %v13620_v52  ;;  %v17270_v33 = vld [vmem:[#allocation3 + $0x90] sm:$0xff] }
 0x4a0   :  { %v6685_v49 = vmax.f32 %v6645_v35, %v6653_v44  ;;  %v13972_v19 = vadd.f32 %v12967_v16, %v18193_v53  ;;  %v6496_v39 = vpop.f32.mrb[59].mxu0  ;;  %v10945_v44 = vld [vmem:[%s17975_s3 + $0x80] sm:$0xff]  ;;  %v17329_v16 = vld [vmem:[#allocation3 + $0xb8] sm:$0xff] }
 0x4a1   :  { %v6684_v4 = vmax.f32 %v6644_v54, %v6652_v7  ;;  %v13973_v26 = vadd.f32 %v6496_v39, %v16817_v43  ;;  %13018 = vmatmul.mubr.msk.f32.gmra.mrb[66].mxu1 %vm6708_vm1, %v16992_v57  ;;  %v10946_v54 = vld [vmem:[%s17975_s3 + $0x88] sm:$0xff] }
 0x4a2   :  { %v6655_v27 = vadd.f32 %v13972_v19, %v17041_v46  ;;  %13020 = vmatprep.mubr.msk.f32.mxu1 %vm6708_vm1, %v17225_v58  ;;  %13623 = vmatpush3.bf16.msra.mxu1 %v13620_v52  ;;  %v7194_v7 = vld [vmem:[#allocation3 + $0x28] sm:$0xff]  ;;  %v10965_v19 = vld [vmem:[%s17975_s3 + $0xa0] sm:$0xff] }
 0x4a3   :  { %v6704_v61 = vmax.f32 %v6684_v4, %v6685_v49  ;;  %v6654_v2 = vadd.f32 %v13973_v26, %v17041_v46  ;;  %v12970_v3 = vpop.f32.mrb[60].mxu0  ;;  %13625 = vmatprep.subr.bf16.mxu1 %v17227_v1  ;;  %v10948_v49 = vld [vmem:[%s17975_s3 + $0x98] sm:$0xff]  ;;  %v10966_v39 = vld [vmem:[%s17975_s3 + $0xa8] sm:$0xff] }
 0x4a4   :  { %v6687_v43 = vmax.f32 %v6647_v55, %v6655_v27  ;;  %v13974_v13 = vadd.f32 %v12970_v3, %v16821_v40  ;;  %v6506_v47 = vpop.f32.mrb[61].mxu0  ;;  %v13640_v4 = vpack.c.bf16 %v10966_v39, %v10965_v19  ;;  %v10985_v3 = vld [vmem:[%s17975_s3 + $0xc0] sm:$0xff]  ;;  %v11063_v19 = vld [vmem:[%s17977_s5 + $0x88] sm:$0xff] }
 0x4a5   :  { %6758 = vst.msk [vmem:[#allocation3 + $0xc8] sm:$0xff] %vm6708_vm1, %v6704_v61  ;;  %v6686_v45 = vmax.f32 %v6646_v34, %v6654_v2  ;;  %v13975_v22 = vadd.f32 %v6506_v47, %v18194_v18  ;;  %13021 = vmatmul.mubr.msk.f32.gmra.mrb[68].mxu1 %vm6708_vm1, %v17070_v11  ;;  %v10967_v34 = vld [vmem:[%s17975_s3 + $0xb0] sm:$0xff]  ;;  %v10968_v61 = vld [vmem:[%s17975_s3 + $0xb8] sm:$0xff] }
 0x4a6   :  { %v6657_v9 = vadd.f32 %v13974_v13, %v17041_v46  ;;  %13023 = vmatprep.mubr.msk.f32.mxu1 %vm6708_vm1, %v17077_v12  ;;  %v13644_v2 = vpack.c.bf16 %v10968_v61, %v10967_v34  ;;  %v10987_v47 = vld [vmem:[%s17975_s3 + $0xd0] sm:$0xff] }
 0x4a7   :  { %v6705_v20 = vmax.f32 %v6686_v45, %v6687_v43  ;;  %v6656_v40 = vadd.f32 %v13975_v22, %v17041_v46  ;;  %v12973_v63 = vpop.f32.mrb[62].mxu0  ;;  %v10986_v43 = vld [vmem:[%s17975_s3 + $0xc8] sm:$0xff]  ;;  %v10988_v45 = vld [vmem:[%s17975_s3 + $0xd8] sm:$0xff]  ;;  %v11005_v22 = vld [vmem:[%s17975_s3 + $0xe0] sm:$0xff] }
 0x4a8   :  { %v6689_v10 = vmax.f32 %v6649_v62, %v6657_v9  ;;  %v13976_v52 = vadd.f32 %v12973_v63, %v16827_v29  ;;  %v6516_v0 = vpop.f32.mrb[63].mxu0  ;;  %v13648_v13 = vpack.c.bf16 %v10986_v43, %v10985_v3  ;;  %v13652_v18 = vpack.c.bf16 %v10988_v45, %v10987_v47  ;;  %v11006_v62 = vld [vmem:[%s17975_s3 + $0xe8] sm:$0xff] }
 0x4a9   :  { %6759 = vst.msk [vmem:[#allocation3 + $0xd0] sm:$0xff] %vm6708_vm1, %v6705_v20  ;;  %v6688_v48 = vmax.f32 %v6648_v21, %v6656_v40  ;;  %v13977_v42 = vadd.f32 %v6516_v0, %v16829_v24  ;;  %13024 = vmatmul.mubr.msk.f32.gmra.mrb[70].mxu1 %vm6708_vm1, %v17084_v25  ;;  %v13656_v9 = vpack.c.bf16 %v11006_v62, %v11005_v22  ;;  %v11025_v20 = vld [vmem:[%s17975_s3 + $0x100] sm:$0xff]  ;;  %v11026_v40 = vld [vmem:[%s17975_s3 + $0x108] sm:$0xff] }
 0x4aa   :  { %v6659_v5 = vadd.f32 %v13976_v52, %v17041_v46  ;;  %13026 = vmatprep.mubr.msk.f32.mxu1 %vm6708_vm1, %v17251_v36  ;;  %v13664_v63 = vpack.c.bf16 %v11026_v40, %v11025_v20  ;;  %v8128_v52 = vld [vmem:[#allocation3 + $0x100] sm:$0xff]  ;;  %v8129_v0 = vld [vmem:[#allocation3 + $0x108] sm:$0xff] }
 0x4ab   :  { %v6706_v29 = vmax.f32 %v6688_v48, %v6689_v10  ;;  %v6658_v8 = vadd.f32 %v13977_v42, %v17041_v46  ;;  %v10927_v46 = vld [vmem:[%s17975_s3 + $0x70] sm:$0xff]  ;;  %v8127_v10 = vld [vmem:[#allocation3 + $0xf8] sm:$0xff] }
 0x4ac   :  { %v6691_v50 = vmax.f32 %v6651_v23, %v6659_v5  ;;  %v13628_v35 = vpack.c.bf16 %v10928_v56, %v10927_v46  ;;  %v17373_v26 = vld [vmem:[#allocation3 + $0xc8] sm:$0xff]  ;;  %v11027_v48 = vld [vmem:[%s17975_s3 + $0x110] sm:$0xff]  ;;  %v11028_v42 = vld [vmem:[%s17975_s3 + $0x118] sm:$0xff] }
 0x4ad   :  { %6760 = vst.msk [vmem:[#allocation3 + $0xd8] sm:$0xff] %vm6708_vm1, %v6706_v29  ;;  %v6690_v24 = vmax.f32 %v6650_v41, %v6658_v8  ;;  %13027 = vmatmul.mubr.msk.f32.gmra.mrb[72].mxu1 %vm6708_vm1, %v17122_v6  ;;  %v13668_v23 = vpack.c.bf16 %v11028_v42, %v11027_v48  ;;  %v11046_v5 = vld [vmem:[%s17977_s5 + $0x40] sm:$0xff]  ;;  %v11047_v41 = vld [vmem:[%s17977_s5 + $0x48] sm:$0xff]  ;;  %v11049_v8 = vld [vmem:[%s17977_s5 + $0x58] sm:$0xff] }
 0x4ae   :  { %13029 = vmatprep.mubr.msk.f32.mxu1 %vm6708_vm1, %v17129_v28  ;;  %v13672_v29 = vpack.c.bf16 %v11047_v41, %v11046_v5  ;;  %v17641_v56 = vld [vmem:[#allocation4 + $0x8] sm:$0xff] }
 0x4af   :  { %v6707_v38 = vmax.f32 %v6690_v24, %v6691_v50 }
 0x4b0   :  { %v17377_v55 = vld [vmem:[#allocation3 + $0xd0] sm:$0xff] }
 0x4b1   :  { %6761 = vst.msk [vmem:[#allocation3 + $0xe0] sm:$0xff] %vm6708_vm1, %v6707_v38  ;;  %13030 = vmatmul.mubr.msk.f32.gmra.mrb[74].mxu1 %vm6708_vm1, %v17136_v31  ;;  %v8867_v38 = vld [vmem:[%s17977_s5] sm:$0xff] }
 0x4b2   :  { %13032 = vmatprep.mubr.msk.f32.mxu1 %vm6708_vm1, %v17270_v33 }
 0x4b4   :  { %v17381_v27 = vld [vmem:[#allocation3 + $0xd8] sm:$0xff] }
 0x4b5   :  { %13033 = vmatmul.mubr.msk.f32.gmra.mrb[76].mxu1 %vm6708_vm1, %v17174_v14 }
 0x4b6   :  { %13035 = vmatprep.mubr.msk.f32.mxu1 %vm6708_vm1, %v17181_v37 }
 0x4b9   :  { %13036 = vmatmul.mubr.msk.f32.gmra.mrb[78].mxu1 %vm6708_vm1, %v17188_v60 }
 0x4ba   :  { %13046 = vmatprep.mubr.msk.f32.mxu1 %vm6708_vm1, %v16984_v51  ;;  %v13632_v51 = vpack.c.bf16 %v10946_v54, %v10945_v44  ;;  %v8869_v44 = vld [vmem:[%s17977_s5 + $0x10] sm:$0xff]  ;;  %v8870_v54 = vld [vmem:[%s17977_s5 + $0x18] sm:$0xff] }
 0x4bd   :  { %13047 = vmatmul.mubr.msk.f32.vlgmr.msra.gmra.mrb[64].mxu1 %vm6708_vm1, %v16992_v57  ;;  %v17309_v57 = vld [vmem:[#allocation3 + $0x58] sm:$0xff] }
 0x4be   :  { %13627 = vmatpush3.bf16.msra.mxu1 %v17227_v1  ;;  %13049 = vmatprep.mubr.msk.f32.mxu1 %vm6708_vm1, %v16996_v59  ;;  %v17319_v59 = vld [vmem:[#allocation3 + $0x88] sm:$0xff]  ;;  %v10947_v1 = vld [vmem:[%s17975_s3 + $0x90] sm:$0xff] }
 0x4bf   :  { %13629 = vmatprep.subr.bf16.mxu1 %v13628_v35  ;;  %v13636_v53 = vpack.c.bf16 %v10948_v49, %v10947_v1  ;;  %v8874_v1 = vld [vmem:[%s17977_s5 + $0x38] sm:$0xff] }
 0x4c1   :  { %13050 = vmatmul.mubr.msk.f32.gmra.mrb[66].mxu1 %vm6708_vm1, %v7194_v7  ;;  %v13692_v7 = vpack.c.bf16 %v8870_v54, %v8869_v44  ;;  %v11066_v54 = vld [vmem:[%s17977_s5 + $0xa0] sm:$0xff] }
 0x4c2   :  { %13052 = vmatprep.mubr.msk.f32.mxu1 %vm6708_vm1, %v17077_v12  ;;  %13631 = vmatpush3.bf16.msra.mxu1 %v13628_v35  ;;  %v17645_v35 = vld [vmem:[#allocation4 + $0x10] sm:$0xff] }
 0x4c3   :  { %13633 = vmatprep.subr.bf16.mxu1 %v13632_v51 }
 0x4c5   :  { %13053 = vmatmul.mubr.msk.f32.gmra.mrb[68].mxu1 %vm6708_vm1, %v17084_v25 }
 0x4c6   :  { %13055 = vmatprep.mubr.msk.f32.mxu1 %vm6708_vm1, %v17090_v32 }
 0x4c9   :  { %13056 = vmatmul.mubr.msk.f32.gmra.mrb[70].mxu1 %vm6708_vm1, %v17309_v57 }
 0x4ca   :  { %13058 = vmatprep.mubr.msk.f32.mxu1 %vm6708_vm1, %v17129_v28 }
 0x4cd   :  { %13059 = vmatmul.mubr.msk.f32.gmra.mrb[72].mxu1 %vm6708_vm1, %v17136_v31 }
 0x4ce   :  { %13061 = vmatprep.mubr.msk.f32.mxu1 %vm6708_vm1, %v17142_v17 }
 0x4d1   :  { %13062 = vmatmul.mubr.msk.f32.gmra.mrb[74].mxu1 %vm6708_vm1, %v17319_v59 }
 0x4d2   :  { %13064 = vmatprep.mubr.msk.f32.mxu1 %vm6708_vm1, %v17181_v37 }
 0x4d5   :  { %13065 = vmatmul.mubr.msk.f32.gmra.mrb[76].mxu1 %vm6708_vm1, %v17188_v60 }
 0x4d6   :  { %13067 = vmatprep.mubr.msk.f32.mxu1 %vm6708_vm1, %v17196_v30 }
 0x4d9   :  { %13068 = vmatmul.mubr.msk.f32.gmra.mrb[78].mxu1 %vm6708_vm1, %v17329_v16 }
 0x4da   :  { %13078 = vmatprep.mubr.msk.f32.mxu1 %vm6708_vm1, %v17225_v58  ;;  %v17367_v58 = vld [vmem:[#allocation3 + $0xc0] sm:$0xff] }
 0x4dd   :  { %13079 = vmatmul.mubr.msk.f32.vlgmr.msra.gmra.mrb[64].mxu1 %vm6708_vm1, %v17070_v11 }
 0x4de   :  { %13081 = vmatprep.mubr.msk.f32.mxu1 %vm6708_vm1, %v17077_v12  ;;  %13635 = vmatpush3.bf16.msra.mxu1 %v13632_v51  ;;  %v8871_v51 = vld [vmem:[%s17977_s5 + $0x20] sm:$0xff] }
 0x4df   :  { %13637 = vmatprep.subr.bf16.mxu1 %v13636_v53 }
 0x4e1   :  { %13082 = vmatmul.mubr.msk.f32.gmra.mrb[66].mxu1 %vm6708_vm1, %v17084_v25 }
 0x4e2   :  { %13084 = vmatprep.mubr.msk.f32.mxu1 %vm6708_vm1, %v17251_v36  ;;  %13639 = vmatpush3.bf16.msra.mxu1 %v13636_v53  ;;  %v11062_v53 = vld [vmem:[%s17977_s5 + $0x80] sm:$0xff] }
 0x4e3   :  { %13641 = vmatprep.subr.bf16.mxu1 %v13640_v4  ;;  %v13704_v39 = vpack.c.bf16 %v11063_v19, %v11062_v53  ;;  %v11075_v53 = vld [vmem:[%s17977_s5 + $0xc8] sm:$0xff] }
 0x4e5   :  { %13085 = vmatmul.mubr.msk.f32.gmra.mrb[68].mxu1 %vm6708_vm1, %v17122_v6 }
 0x4e6   :  { %13087 = vmatprep.mubr.msk.f32.mxu1 %vm6708_vm1, %v17129_v28 }
 0x4e9   :  { %13088 = vmatmul.mubr.msk.f32.gmra.mrb[70].mxu1 %vm6708_vm1, %v17136_v31 }
 0x4ea   :  { %13090 = vmatprep.mubr.msk.f32.mxu1 %vm6708_vm1, %v17270_v33 }
 0x4ed   :  { %13091 = vmatmul.mubr.msk.f32.gmra.mrb[72].mxu1 %vm6708_vm1, %v17174_v14 }
 0x4ee   :  { %13093 = vmatprep.mubr.msk.f32.mxu1 %vm6708_vm1, %v17181_v37 }
 0x4f1   :  { %13094 = vmatmul.mubr.msk.f32.gmra.mrb[74].mxu1 %vm6708_vm1, %v17188_v60 }
 0x4f2   :  { %13096 = vmatprep.mubr.msk.f32.mxu1 %vm6708_vm1, %v17367_v58 }
 0x4f5   :  { %13097 = vmatmul.mubr.msk.f32.gmra.mrb[76].mxu1 %vm6708_vm1, %v17373_v26 }
 0x4f6   :  { %13099 = vmatprep.mubr.msk.f32.mxu1 %vm6708_vm1, %v17377_v55 }
 0x4f9   :  { %13100 = vmatmul.mubr.msk.f32.gmra.mrb[78].mxu1 %vm6708_vm1, %v17381_v27 }
 0x4fa   :  { %13110 = vmatprep.mubr.msk.f32.mxu1 %vm6708_vm1, %v17070_v11  ;;  %v17427_v11 = vld [vmem:[#allocation3 + $0xe0] sm:$0xff] }
 0x4fd   :  { %13111 = vmatmul.mubr.msk.f32.vlgmr.msra.gmra.mrb[64].mxu1 %vm6708_vm1, %v17077_v12 }
 0x4fe   :  { %13113 = vmatprep.mubr.msk.f32.mxu1 %vm6708_vm1, %v17084_v25  ;;  %13643 = vmatpush3.bf16.msra.mxu1 %v13640_v4 }
 0x4ff   :  { %13645 = vmatprep.subr.bf16.mxu1 %v13644_v2 }
 0x501   :  { %13114 = vmatmul.mubr.msk.f32.gmra.mrb[66].mxu1 %vm6708_vm1, %v17090_v32 }
 0x502   :  { %13116 = vmatprep.mubr.msk.f32.mxu1 %vm6708_vm1, %v17122_v6  ;;  %13647 = vmatpush3.bf16.msra.mxu1 %v13644_v2 }
 0x503   :  { %13649 = vmatprep.subr.bf16.mxu1 %v13648_v13 }
 0x505   :  { %13117 = vmatmul.mubr.msk.f32.gmra.mrb[68].mxu1 %vm6708_vm1, %v17129_v28 }
 0x506   :  { %13119 = vmatprep.mubr.msk.f32.mxu1 %vm6708_vm1, %v17136_v31 }
 0x509   :  { %13120 = vmatmul.mubr.msk.f32.gmra.mrb[70].mxu1 %vm6708_vm1, %v17142_v17 }
 0x50a   :  { %13122 = vmatprep.mubr.msk.f32.mxu1 %vm6708_vm1, %v17174_v14 }
 0x50d   :  { %13123 = vmatmul.mubr.msk.f32.gmra.mrb[72].mxu1 %vm6708_vm1, %v17181_v37 }
 0x50e   :  { %13125 = vmatprep.mubr.msk.f32.mxu1 %vm6708_vm1, %v17188_v60 }
 0x511   :  { %13126 = vmatmul.mubr.msk.f32.gmra.mrb[74].mxu1 %vm6708_vm1, %v17196_v30 }
 0x512   :  { %13128 = vmatprep.mubr.msk.f32.mxu1 %vm6708_vm1, %v17373_v26 }
 0x515   :  { %13129 = vmatmul.mubr.msk.f32.gmra.mrb[76].mxu1 %vm6708_vm1, %v17377_v55 }
 0x516   :  { %13131 = vmatprep.mubr.msk.f32.mxu1 %vm6708_vm1, %v17381_v27 }
 0x519   :  { %13132 = vmatmul.mubr.msk.f32.gmra.mrb[78].mxu1 %vm6708_vm1, %v17427_v11 }
 0x51a   :  { %13142 = vmatprep.mubr.msk.f32.mxu1 %vm6708_vm1, %v17077_v12  ;;  %v17473_v12 = vld [vmem:[#allocation3 + $0xe8] sm:$0xff] }
 0x51d   :  { %13143 = vmatmul.mubr.msk.f32.vlgmr.msra.gmra.mrb[64].mxu1 %vm6708_vm1, %v17084_v25  ;;  %v11007_v25 = vld [vmem:[%s17975_s3 + $0xf0] sm:$0xff] }
 0x51e   :  { %13145 = vmatprep.mubr.msk.f32.mxu1 %vm6708_vm1, %v17090_v32  ;;  %13651 = vmatpush3.bf16.msra.mxu1 %v13648_v13  ;;  %v11008_v32 = vld [vmem:[%s17975_s3 + $0xf8] sm:$0xff] }
 0x51f   :  { %13653 = vmatprep.subr.bf16.mxu1 %v13652_v18  ;;  %v13660_v21 = vpack.c.bf16 %v11008_v32, %v11007_v25 }
 0x521   :  { %13146 = vmatmul.mubr.msk.f32.gmra.mrb[66].mxu1 %vm6708_vm1, %v17309_v57  ;;  %v8872_v57 = vld [vmem:[%s17977_s5 + $0x28] sm:$0xff] }
 0x522   :  { %13148 = vmatprep.mubr.msk.f32.mxu1 %vm6708_vm1, %v17129_v28  ;;  %13655 = vmatpush3.bf16.msra.mxu1 %v13652_v18 }
 0x523   :  { %13657 = vmatprep.subr.bf16.mxu1 %v13656_v9 }
 0x525   :  { %13149 = vmatmul.mubr.msk.f32.gmra.mrb[68].mxu1 %vm6708_vm1, %v17136_v31 }
 0x526   :  { %13151 = vmatprep.mubr.msk.f32.mxu1 %vm6708_vm1, %v17142_v17 }
 0x529   :  { %13152 = vmatmul.mubr.msk.f32.gmra.mrb[70].mxu1 %vm6708_vm1, %v17319_v59 }
 0x52a   :  { %13154 = vmatprep.mubr.msk.f32.mxu1 %vm6708_vm1, %v17181_v37 }
 0x52d   :  { %13155 = vmatmul.mubr.msk.f32.gmra.mrb[72].mxu1 %vm6708_vm1, %v17188_v60 }
 0x52e   :  { %13157 = vmatprep.mubr.msk.f32.mxu1 %vm6708_vm1, %v17196_v30 }
 0x531   :  { %13158 = vmatmul.mubr.msk.f32.gmra.mrb[74].mxu1 %vm6708_vm1, %v17329_v16 }
 0x532   :  { %13160 = vmatprep.mubr.msk.f32.mxu1 %vm6708_vm1, %v17377_v55 }
 0x535   :  { %13161 = vmatmul.mubr.msk.f32.gmra.mrb[76].mxu1 %vm6708_vm1, %v17381_v27 }
 0x536   :  { %13163 = vmatprep.mubr.msk.f32.mxu1 %vm6708_vm1, %v17427_v11 }
 0x539   :  { %13164 = vmatmul.mubr.msk.f32.gmra.mrb[78].mxu1 %vm6708_vm1, %v17473_v12 }
 0x53a   :  { %13174 = vmatprep.mubr.msk.f32.mxu1 %vm6708_vm1, %v17251_v36  ;;  %v8126_v36 = vld [vmem:[#allocation3 + $0xf0] sm:$0xff] }
 0x53d   :  { %13175 = vmatmul.mubr.msk.f32.vlgmr.msra.gmra.mrb[64].mxu1 %vm6708_vm1, %v17122_v6 }
 0x53e   :  { %13177 = vmatprep.mubr.msk.f32.mxu1 %vm6708_vm1, %v17129_v28  ;;  %13659 = vmatpush3.bf16.msra.mxu1 %v13656_v9 }
 0x53f   :  { %13661 = vmatprep.subr.bf16.mxu1 %v13660_v21 }
 0x541   :  { %13178 = vmatmul.mubr.msk.f32.gmra.mrb[66].mxu1 %vm6708_vm1, %v17136_v31 }
 0x542   :  { %13180 = vmatprep.mubr.msk.f32.mxu1 %vm6708_vm1, %v17270_v33  ;;  %13663 = vmatpush3.bf16.msra.mxu1 %v13660_v21  ;;  %v8868_v33 = vld [vmem:[%s17977_s5 + $0x8] sm:$0xff] }
 0x543   :  { %13665 = vmatprep.subr.bf16.mxu1 %v13664_v63  ;;  %v13688_v46 = vpack.c.bf16 %v8868_v33, %v8867_v38  ;;  %v8865_v33 = vld [vmem:[#allocation4 + $0x20] sm:$0xff] }
 0x545   :  { %13181 = vmatmul.mubr.msk.f32.gmra.mrb[68].mxu1 %vm6708_vm1, %v17174_v14 }
 0x546   :  { %13183 = vmatprep.mubr.msk.f32.mxu1 %vm6708_vm1, %v17181_v37 }
 0x549   :  { %13184 = vmatmul.mubr.msk.f32.gmra.mrb[70].mxu1 %vm6708_vm1, %v17188_v60 }
 0x54a   :  { %13186 = vmatprep.mubr.msk.f32.mxu1 %vm6708_vm1, %v17367_v58 }
 0x54d   :  { %13187 = vmatmul.mubr.msk.f32.gmra.mrb[72].mxu1 %vm6708_vm1, %v17373_v26 }
 0x54e   :  { %13189 = vmatprep.mubr.msk.f32.mxu1 %vm6708_vm1, %v17377_v55 }
 0x551   :  { %13190 = vmatmul.mubr.msk.f32.gmra.mrb[74].mxu1 %vm6708_vm1, %v17381_v27 }
 0x552   :  { %13192 = vmatprep.mubr.msk.f32.mxu1 %vm6708_vm1, %v8126_v36 }
 0x555   :  { %13193 = vmatmul.mubr.msk.f32.gmra.mrb[76].mxu1 %vm6708_vm1, %v8127_v10 }
 0x556   :  { %13195 = vmatprep.mubr.msk.f32.mxu1 %vm6708_vm1, %v8128_v52 }
 0x559   :  { %13196 = vmatmul.mubr.msk.f32.gmra.mrb[78].mxu1 %vm6708_vm1, %v8129_v0 }
 0x55a   :  { %13206 = vmatprep.mubr.msk.f32.mxu1 %vm6708_vm1, %v17122_v6  ;;  %v8360_v6 = vld [vmem:[#allocation3 + $0x110] sm:$0xff] }
 0x55d   :  { %13207 = vmatmul.mubr.msk.f32.vlgmr.msra.gmra.mrb[64].mxu1 %vm6708_vm1, %v17129_v28 }
 0x55e   :  { %13209 = vmatprep.mubr.msk.f32.mxu1 %vm6708_vm1, %v17136_v31  ;;  %13667 = vmatpush3.bf16.msra.mxu1 %v13664_v63 }
 0x55f   :  { %13669 = vmatprep.subr.bf16.mxu1 %v13668_v23 }
 0x561   :  { %13210 = vmatmul.mubr.msk.f32.gmra.mrb[66].mxu1 %vm6708_vm1, %v17142_v17 }
 0x562   :  { %13212 = vmatprep.mubr.msk.f32.mxu1 %vm6708_vm1, %v17174_v14  ;;  %13671 = vmatpush3.bf16.msra.mxu1 %v13668_v23  ;;  %v11048_v14 = vld [vmem:[%s17977_s5 + $0x50] sm:$0xff] }
 0x563   :  { %13673 = vmatprep.subr.bf16.mxu1 %v13672_v29  ;;  %v13676_v50 = vpack.c.bf16 %v11049_v8, %v11048_v14  ;;  %v11064_v8 = vld [vmem:[%s17977_s5 + $0x90] sm:$0xff] }
 0x565   :  { %13213 = vmatmul.mubr.msk.f32.gmra.mrb[68].mxu1 %vm6708_vm1, %v17181_v37 }
 0x566   :  { %13215 = vmatprep.mubr.msk.f32.mxu1 %vm6708_vm1, %v17188_v60 }
 0x569   :  { %13216 = vmatmul.mubr.msk.f32.gmra.mrb[70].mxu1 %vm6708_vm1, %v17196_v30 }
 0x56a   :  { %13218 = vmatprep.mubr.msk.f32.mxu1 %vm6708_vm1, %v17373_v26 }
 0x56d   :  { %13219 = vmatmul.mubr.msk.f32.gmra.mrb[72].mxu1 %vm6708_vm1, %v17377_v55 }
 0x56e   :  { %13221 = vmatprep.mubr.msk.f32.mxu1 %vm6708_vm1, %v17381_v27 }
 0x571   :  { %13222 = vmatmul.mubr.msk.f32.gmra.mrb[74].mxu1 %vm6708_vm1, %v17427_v11 }
 0x572   :  { %13224 = vmatprep.mubr.msk.f32.mxu1 %vm6708_vm1, %v8127_v10 }
 0x575   :  { %13225 = vmatmul.mubr.msk.f32.gmra.mrb[76].mxu1 %vm6708_vm1, %v8128_v52 }
 0x576   :  { %13227 = vmatprep.mubr.msk.f32.mxu1 %vm6708_vm1, %v8129_v0 }
 0x579   :  { %13228 = vmatmul.mubr.msk.f32.gmra.mrb[78].mxu1 %vm6708_vm1, %v8360_v6 }
 0x57a   :  { %13238 = vmatprep.mubr.msk.f32.mxu1 %vm6708_vm1, %v17129_v28  ;;  %v8591_v28 = vld [vmem:[#allocation3 + $0x118] sm:$0xff] }
 0x57d   :  { %13239 = vmatmul.mubr.msk.f32.vlgmr.msra.gmra.mrb[64].mxu1 %vm6708_vm1, %v17136_v31  ;;  %v11050_v31 = vld [vmem:[%s17977_s5 + $0x60] sm:$0xff] }
 0x57e   :  { %13241 = vmatprep.mubr.msk.f32.mxu1 %vm6708_vm1, %v17142_v17  ;;  %13675 = vmatpush3.bf16.msra.mxu1 %v13672_v29  ;;  %v11051_v17 = vld [vmem:[%s17977_s5 + $0x68] sm:$0xff]  ;;  %v8863_v29 = vld [vmem:[#allocation4] sm:$0xff] }
 0x57f   :  { %13677 = vmatprep.subr.bf16.mxu1 %v13676_v50 }
 0x581   :  { %13242 = vmatmul.mubr.msk.f32.gmra.mrb[66].mxu1 %vm6708_vm1, %v17319_v59  ;;  %v13696_v59 = vpack.c.bf16 %v8872_v57, %v8871_v51 }
 0x582   :  { %13244 = vmatprep.mubr.msk.f32.mxu1 %vm6708_vm1, %v17181_v37  ;;  %13679 = vmatpush3.bf16.msra.mxu1 %v13676_v50  ;;  %v13680_v37 = vpack.c.bf16 %v11051_v17, %v11050_v31  ;;  %v11065_v50 = vld [vmem:[%s17977_s5 + $0x98] sm:$0xff] }
 0x584   :  { %13681 = vmatprep.subr.bf16.mxu1 %v13680_v37 }
 0x585   :  { %13245 = vmatmul.mubr.msk.f32.gmra.mrb[68].mxu1 %vm6708_vm1, %v17188_v60  ;;  %v11052_v60 = vld [vmem:[%s17977_s5 + $0x70] sm:$0xff] }
 0x586   :  { %13247 = vmatprep.mubr.msk.f32.mxu1 %vm6708_vm1, %v17196_v30  ;;  %13683 = vmatpush3.bf16.msra.mxu1 %v13680_v37  ;;  %v11053_v30 = vld [vmem:[%s17977_s5 + $0x78] sm:$0xff] }
 0x587   :  { %v13684_v24 = vpack.c.bf16 %v11053_v30, %v11052_v60 }
 0x589   :  { %13248 = vmatmul.mubr.msk.f32.gmra.mrb[70].mxu1 %vm6708_vm1, %v17329_v16  ;;  %13685 = vmatprep.subr.bf16.mxu1 %v13684_v24  ;;  %v8873_v16 = vld [vmem:[%s17977_s5 + $0x30] sm:$0xff] }
 0x58a   :  { %13250 = vmatprep.mubr.msk.f32.mxu1 %vm6708_vm1, %v17377_v55  ;;  %13687 = vmatpush3.bf16.msra.mxu1 %v13684_v24  ;;  %v13700_v49 = vpack.c.bf16 %v8874_v1, %v8873_v16  ;;  %v11068_v16 = vld [vmem:[%s17977_s5 + $0xb0] sm:$0xff]  ;;  %v11069_v1 = vld [vmem:[%s17977_s5 + $0xb8] sm:$0xff] }
 0x58b   :  { %13689 = vmatprep.subr.bf16.mxu1 %v13688_v46 }
 0x58d   :  { %13251 = vmatmul.mubr.msk.f32.gmra.mrb[72].mxu1 %vm6708_vm1, %v17381_v27  ;;  %v11045_v27 = vld [vmem:[%s17976_s4] ss:$0 sm:$0xff] }
 0x58e   :  { %13253 = vmatprep.mubr.msk.f32.mxu1 %vm6708_vm1, %v17427_v11 }
 0x591   :  { %13254 = vmatmul.mubr.msk.f32.gmra.mrb[74].mxu1 %vm6708_vm1, %v17473_v12 }
 0x592   :  { %13256 = vmatprep.mubr.msk.f32.mxu1 %vm6708_vm1, %v8128_v52 }
 0x595   :  { %13257 = vmatmul.mubr.msk.f32.gmra.mrb[76].mxu1 %vm6708_vm1, %v8129_v0 }
 0x596   :  { %13259 = vmatprep.mubr.msk.f32.mxu1 %vm6708_vm1, %v8360_v6 }
 0x599   :  { %13260 = vmatmul.mubr.msk.f32.gmra.mrb[78].mxu1 %vm6708_vm1, %v8591_v28 }
 0x59a   :  { %13278 = vmatprep.mubr.msk.f32.mxu1 %vm8841_vm2, %v17641_v56 }
 0x59d   :  { %13279 = vmatmul.mubr.msk.f32.vlgmr.msra.gmra.mrb[80].mxu1 %vm8841_vm2, %v17645_v35 }
 0x59e   :  { %13691 = vmatpush3.bf16.msra.mxu1 %v13688_v46  ;;  %v13708_v46 = vpack.c.bf16 %v11065_v50, %v11064_v8  ;;  %v11110_v8 = vld [vmem:[%s17977_s5 + $0x180] sm:$0xff]  ;;  %v11111_v50 = vld [vmem:[%s17977_s5 + $0x188] sm:$0xff] }
 0x59f   :  { %13693 = vmatprep.subr.bf16.mxu1 %v13692_v7 }
 0x5a2   :  { %13695 = vmatpush3.bf16.msra.mxu1 %v13692_v7  ;;  %v11067_v7 = vld [vmem:[%s17977_s5 + $0xa8] sm:$0xff] }
 0x5a3   :  { %13697 = vmatprep.subr.bf16.mxu1 %v13696_v59 }
 0x5a6   :  { %13699 = vmatpush3.bf16.msra.mxu1 %v13696_v59  ;;  %v13712_v59 = vpack.c.bf16 %v11067_v7, %v11066_v54  ;;  %v11123_v54 = vld [vmem:[%s17977_s5 + $0x1c8] sm:$0xff] }
 0x5a7   :  { %13701 = vmatprep.subr.bf16.mxu1 %v13700_v49 }
 0x5aa   :  { %13703 = vmatpush3.bf16.msra.mxu1 %v13700_v49  ;;  %v11074_v49 = vld [vmem:[%s17977_s5 + $0xc0] sm:$0xff] }
 0x5ab   :  { %13705 = vmatprep.subr.bf16.mxu1 %v13704_v39  ;;  %v13720_v19 = vpack.c.bf16 %v11075_v53, %v11074_v49  ;;  %v9546_v49 = vld [vmem:[#allocation4 + $0x68] sm:$0xff] }
 0x650   :  { %v13240_v4 = vpop.f32.mrb[64].mxu1 }
 0x651   :  { %v8711_v58 = vpop.f32.mrb[65].mxu1  ;;  %v8814_v61 = vadd.f32 %v13240_v4, %v11045_v27  ;;  %v9085_v4 = vld [vmem:[#allocation4 + $0x18] sm:$0xff] }
 0x652   :  { %v8813_v43 = vadd.f32 %v11045_v27, %v8711_v58 }
 0x654   :  { %v13243_v26 = vpop.f32.mrb[66].mxu1 }
 0x655   :  { %v8721_v55 = vpop.f32.mrb[67].mxu1  ;;  %v8816_v18 = vadd.f32 %v13243_v26, %v11045_v27  ;;  %v11078_v26 = vld [vmem:[%s17977_s5 + $0xe0] sm:$0xff] }
 0x656   :  { %v8815_v9 = vadd.f32 %v11045_v27, %v8721_v55  ;;  %v11079_v55 = vld [vmem:[%s17977_s5 + $0xe8] sm:$0xff] }
 0x658   :  { %v13246_v34 = vpop.f32.mrb[68].mxu1 }
 0x659   :  { %v8818_v2 = vadd.f32 %v13246_v34, %v11045_v27  ;;  %v8731_v3 = vpop.f32.mrb[69].mxu1  ;;  %v13728_v34 = vpack.c.bf16 %v11079_v55, %v11078_v26  ;;  %v11136_v55 = vld [vmem:[%s17977_s5 + $0x210] sm:$0xff] }
 0x65a   :  { %v8817_v13 = vadd.f32 %v11045_v27, %v8731_v3 }
 0x65b   :  { %v8830_v11 = vmax.f32 %v8814_v61, %v8818_v2  ;;  %v11080_v61 = vld [vmem:[%s17977_s5 + $0xf0] sm:$0xff]  ;;  %v11081_v2 = vld [vmem:[%s17977_s5 + $0xf8] sm:$0xff] }
 0x65c   :  { %v8829_v47 = vmax.f32 %v8813_v43, %v8817_v13  ;;  %v13249_v45 = vpop.f32.mrb[70].mxu1  ;;  %v13732_v3 = vpack.c.bf16 %v11081_v2, %v11080_v61  ;;  %v11086_v43 = vld [vmem:[%s17977_s5 + $0x100] sm:$0xff]  ;;  %v11087_v13 = vld [vmem:[%s17977_s5 + $0x108] sm:$0xff] }
 0x65d   :  { %v8820_v22 = vadd.f32 %v13249_v45, %v11045_v27  ;;  %v8741_v62 = vpop.f32.mrb[71].mxu1  ;;  %v11089_v45 = vld [vmem:[%s17977_s5 + $0x118] sm:$0xff]  ;;  %v11138_v61 = vld [vmem:[%s17977_s5 + $0x220] sm:$0xff]  ;;  %v11139_v2 = vld [vmem:[%s17977_s5 + $0x228] sm:$0xff] }
 0x65e   :  { %v8837_v12 = vmax.f32 %v8829_v47, %v8830_v11  ;;  %v8819_v25 = vadd.f32 %v11045_v27, %v8741_v62  ;;  %v13736_v11 = vpack.c.bf16 %v11087_v13, %v11086_v43  ;;  %v11088_v47 = vld [vmem:[%s17977_s5 + $0x110] sm:$0xff]  ;;  %v11090_v62 = vld [vmem:[%s17977_s5 + $0x120] sm:$0xff]  ;;  %v13808_v43 = vpack.c.bf16 %v11139_v2, %v11138_v61  ;;  %v10011_v2 = vld [vmem:[#allocation9 + $0x50] sm:$0xff] }
 0x65f   :  { %v8832_v32 = vmax.f32 %v8816_v18, %v8820_v22  ;;  %v17758_v18 = vld [vmem:[#allocation4 + $0x40] sm:$0xff]  ;;  %v13740_v22 = vpack.c.bf16 %v11089_v45, %v11088_v47  ;;  %v11140_v13 = vld [vmem:[%s17977_s5 + $0x230] sm:$0xff]  ;;  %v9905_v45 = vld [vmem:[#allocation7] sm:$0xff] }
 0x660   :  { %8859 = vst.msk [vmem:[#allocation4 + $0x28] sm:$0xff] %vm8841_vm2, %v8837_v12  ;;  %v8831_v21 = vmax.f32 %v8815_v9, %v8819_v25  ;;  %v13252_v20 = vpop.f32.mrb[72].mxu1  ;;  %v11091_v9 = vld [vmem:[%s17977_s5 + $0x128] sm:$0xff] }
 0x661   :  { %v8751_v40 = vpop.f32.mrb[73].mxu1  ;;  %v8822_v48 = vadd.f32 %v13252_v20, %v11045_v27  ;;  %v13744_v12 = vpack.c.bf16 %v11091_v9, %v11090_v62  ;;  %v14729_v62 = vmov 0.0|0.0   ;;  %v9907_v9 = vld [vmem:[#allocation7 + $0x10] sm:$0xff] }
 0x662   :  { %v8838_v63 = vmax.f32 %v8831_v21, %v8832_v32  ;;  %v8821_v5 = vadd.f32 %v11045_v27, %v8751_v40  ;;  %v11092_v32 = vld [vmem:[%s17977_s5 + $0x130] sm:$0xff]  ;;  %v11093_v21 = vld [vmem:[%s17977_s5 + $0x138] sm:$0xff]  ;;  %v11098_v40 = vld [vmem:[%s17977_s5 + $0x140] sm:$0xff] }
 0x663   :  { %v13748_v20 = vpack.c.bf16 %v11093_v21, %v11092_v32  ;;  %v9909_v21 = vld [vmem:[#allocation7 + $0x20] sm:$0xff] }
 0x664   :  { %8860 = vst.msk [vmem:[#allocation4 + $0x30] sm:$0xff] %vm8841_vm2, %v8838_v63  ;;  %v13255_v36 = vpop.f32.mrb[74].mxu1  ;;  %v11099_v63 = vld [vmem:[%s17977_s5 + $0x148] sm:$0xff] }
 0x665   :  { %v8761_v10 = vpop.f32.mrb[75].mxu1  ;;  %v8824_v17 = vadd.f32 %v13255_v36, %v11045_v27  ;;  %v13752_v36 = vpack.c.bf16 %v11099_v63, %v11098_v40  ;;  %v9911_v63 = vld [vmem:[#allocation7 + $0x30] sm:$0xff] }
 0x666   :  { %v8823_v30 = vadd.f32 %v11045_v27, %v8761_v10  ;;  %v11100_v10 = vld [vmem:[%s17977_s5 + $0x150] sm:$0xff] }
 0x667   :  { %v17678_v52 = vld [vmem:[#allocation4 + $0x28] sm:$0xff] }
 0x668   :  { %v13258_v0 = vpop.f32.mrb[76].mxu1  ;;  %13281 = vmatprep.mubr.msk.f32.mxu1 %vm8841_vm2, %v17678_v52 }
 0x669   :  { %v8826_v42 = vadd.f32 %v13258_v0, %v11045_v27  ;;  %v8771_v23 = vpop.f32.mrb[77].mxu1 }
 0x66a   :  { %v8825_v41 = vadd.f32 %v11045_v27, %v8771_v23 }
 0x66b   :  { %v8834_v6 = vmax.f32 %v8822_v48, %v8826_v42  ;;  %v17682_v14 = vld [vmem:[#allocation4 + $0x30] sm:$0xff]  ;;  %v11102_v48 = vld [vmem:[%s17977_s5 + $0x160] sm:$0xff]  ;;  %v11103_v42 = vld [vmem:[%s17977_s5 + $0x168] sm:$0xff] }
 0x66c   :  { %v8833_v28 = vmax.f32 %v8821_v5, %v8825_v41  ;;  %v13261_v31 = vpop.f32.mrb[78].mxu1  ;;  %13282 = vmatmul.mubr.msk.f32.gmra.mrb[82].mxu1 %vm8841_vm2, %v17682_v14  ;;  %v13760_v23 = vpack.c.bf16 %v11103_v42, %v11102_v48  ;;  %v11104_v41 = vld [vmem:[%s17977_s5 + $0x170] sm:$0xff]  ;;  %v9915_v42 = vld [vmem:[#allocation7 + $0x50] sm:$0xff] }
 0x66d   :  { %v8828_v37 = vadd.f32 %v13261_v31, %v11045_v27  ;;  %v8781_v60 = vpop.f32.mrb[79].mxu1  ;;  %13300 = vmatprep.mubr.msk.f32.mxu1 %vm8841_vm2, %v8863_v29  ;;  %v11105_v29 = vld [vmem:[%s17977_s5 + $0x178] sm:$0xff]  ;;  %v11112_v31 = vld [vmem:[%s17977_s5 + $0x190] sm:$0xff] }
 0x66e   :  { %v8839_v24 = vmax.f32 %v8833_v28, %v8834_v6  ;;  %v8827_v38 = vadd.f32 %v11045_v27, %v8781_v60  ;;  %v17735_v27 = vld [vmem:[#allocation4 + $0x38] sm:$0xff]  ;;  %v13764_v6 = vpack.c.bf16 %v11105_v29, %v11104_v41  ;;  %v13768_v28 = vpack.c.bf16 %v11111_v50, %v11110_v8  ;;  %v11115_v60 = vld [vmem:[%s17977_s5 + $0x1a8] sm:$0xff]  ;;  %v9918_v29 = vld [vmem:[#allocation7 + $0x68] sm:$0xff] }
 0x66f   :  { %v8836_v44 = vmax.f32 %v8824_v17, %v8828_v37  ;;  %v11114_v37 = vld [vmem:[%s17977_s5 + $0x1a0] sm:$0xff]  ;;  %v9917_v41 = vld [vmem:[#allocation7 + $0x60] sm:$0xff]  ;;  %v9919_v8 = vld [vmem:[#allocation7 + $0x70] sm:$0xff] }
 0x670   :  { %8861 = vst.msk [vmem:[#allocation4 + $0x48] sm:$0xff] %vm8841_vm2, %v8839_v24  ;;  %v8835_v51 = vmax.f32 %v8823_v30, %v8827_v38  ;;  %13301 = vmatmul.mubr.msk.f32.vlgmr.msra.gmra.mrb[80].mxu1 %vm8841_vm2, %v17641_v56  ;;  %v13716_v56 = vpack.c.bf16 %v11069_v1, %v11068_v16  ;;  %v17838_v30 = vld [vmem:[#allocation4 + $0x58] sm:$0xff]  ;;  %v13776_v24 = vpack.c.bf16 %v11115_v60, %v11114_v37  ;;  %v11116_v38 = vld [vmem:[%s17977_s5 + $0x1b0] sm:$0xff]  ;;  %v11126_v1 = vld [vmem:[%s17977_s5 + $0x1e0] sm:$0xff] }
 0x671   :  { %13707 = vmatpush3.bf16.msra.mxu1 %v13704_v39  ;;  %13303 = vmatprep.mubr.msk.f32.mxu1 %vm8841_vm2, %v8865_v33  ;;  %v11076_v39 = vld [vmem:[%s17977_s5 + $0xd0] sm:$0xff]  ;;  %v9920_v50 = vld [vmem:[#allocation7 + $0x78] sm:$0xff] }
 0x672   :  { %v8840_v57 = vmax.f32 %v8835_v51, %v8836_v44  ;;  %13709 = vmatprep.subr.bf16.mxu1 %v13708_v46  ;;  %v11122_v44 = vld [vmem:[%s17977_s5 + $0x1c0] sm:$0xff]  ;;  %v11124_v51 = vld [vmem:[%s17977_s5 + $0x1d0] sm:$0xff] }
 0x673   :  { %v13784_v7 = vpack.c.bf16 %v11123_v54, %v11122_v44 }
 0x674   :  { %8862 = vst.msk [vmem:[#allocation4 + $0x50] sm:$0xff] %vm8841_vm2, %v8840_v57  ;;  %13304 = vmatmul.mubr.msk.f32.gmra.mrb[82].mxu1 %vm8841_vm2, %v17678_v52  ;;  %v11125_v57 = vld [vmem:[%s17977_s5 + $0x1d8] sm:$0xff] }
 0x675   :  { %13711 = vmatpush3.bf16.msra.mxu1 %v13708_v46  ;;  %13322 = vmatprep.mubr.msk.f32.mxu1 %vm8841_vm2, %v17645_v35  ;;  %v11077_v35 = vld [vmem:[%s17977_s5 + $0xd8] sm:$0xff]  ;;  %v13788_v16 = vpack.c.bf16 %v11125_v57, %v11124_v51  ;;  %v10002_v51 = vld [vmem:[#allocation9 + $0x8] sm:$0xff] }
 0x676   :  { %13713 = vmatprep.subr.bf16.mxu1 %v13712_v59  ;;  %v13724_v58 = vpack.c.bf16 %v11077_v35, %v11076_v39  ;;  %v11129_v39 = vld [vmem:[%s17977_s5 + $0x1f8] sm:$0xff] }
 0x677   :  { %v17770_v25 = vld [vmem:[#allocation4 + $0x48] sm:$0xff] }
 0x679   :  { %13715 = vmatpush3.bf16.msra.mxu1 %v13712_v59  ;;  %v9545_v59 = vld [vmem:[#allocation4 + $0x60] sm:$0xff] }
 0x67a   :  { %13717 = vmatprep.subr.bf16.mxu1 %v13716_v56 }
 0x67b   :  { %v17804_v5 = vld [vmem:[#allocation4 + $0x50] sm:$0xff] }
 0x67d   :  { %13719 = vmatpush3.bf16.msra.mxu1 %v13716_v56  ;;  %v11127_v56 = vld [vmem:[%s17977_s5 + $0x1e8] sm:$0xff] }
 0x67e   :  { %13721 = vmatprep.subr.bf16.mxu1 %v13720_v19  ;;  %v13792_v53 = vpack.c.bf16 %v11127_v56, %v11126_v1 }
 0x680   :  { %13323 = vmatmul.mubr.msk.f32.vlgmr.msra.gmra.mrb[80].mxu1 %vm8841_vm2, %v9085_v4  ;;  %v11134_v4 = vld [vmem:[%s17977_s5 + $0x200] sm:$0xff] }
 0x681   :  { %13325 = vmatprep.mubr.msk.f32.mxu1 %vm8841_vm2, %v17682_v14  ;;  %13723 = vmatpush3.bf16.msra.mxu1 %v13720_v19  ;;  %v11128_v19 = vld [vmem:[%s17977_s5 + $0x1f0] sm:$0xff] }
 0x682   :  { %13725 = vmatprep.subr.bf16.mxu1 %v13724_v58  ;;  %v13796_v35 = vpack.c.bf16 %v11129_v39, %v11128_v19  ;;  %v10005_v39 = vld [vmem:[#allocation9 + $0x20] sm:$0xff] }
 0x684   :  { %13326 = vmatmul.mubr.msk.f32.gmra.mrb[82].mxu1 %vm8841_vm2, %v17735_v27 }
 0x685   :  { %13727 = vmatpush3.bf16.msra.mxu1 %v13724_v58  ;;  %13344 = vmatprep.mubr.msk.f32.mxu1 %vm8841_vm2, %v8865_v33  ;;  %v11117_v33 = vld [vmem:[%s17977_s5 + $0x1b8] sm:$0xff]  ;;  %v11135_v58 = vld [vmem:[%s17977_s5 + $0x208] sm:$0xff] }
 0x686   :  { %13729 = vmatprep.subr.bf16.mxu1 %v13728_v34  ;;  %v13780_v46 = vpack.c.bf16 %v11117_v33, %v11116_v38  ;;  %v13800_v26 = vpack.c.bf16 %v11135_v58, %v11134_v4  ;;  %v10007_v58 = vld [vmem:[#allocation9 + $0x30] sm:$0xff] }
 0x689   :  { %13731 = vmatpush3.bf16.msra.mxu1 %v13728_v34 }
 0x68a   :  { %13733 = vmatprep.subr.bf16.mxu1 %v13732_v3 }
 0x68d   :  { %13735 = vmatpush3.bf16.msra.mxu1 %v13732_v3  ;;  %v9661_v3 = vld [vmem:[#allocation4 + $0x70] sm:$0xff] }
 0x68e   :  { %13737 = vmatprep.subr.bf16.mxu1 %v13736_v11 }
 0x690   :  { %13345 = vmatmul.mubr.msk.f32.vlgmr.msra.gmra.mrb[80].mxu1 %vm8841_vm2, %v17678_v52 }
 0x691   :  { %13739 = vmatpush3.bf16.msra.mxu1 %v13736_v11  ;;  %13347 = vmatprep.mubr.msk.f32.mxu1 %vm8841_vm2, %v17758_v18  ;;  %v11141_v11 = vld [vmem:[%s17977_s5 + $0x238] sm:$0xff] }
 0x692   :  { %13741 = vmatprep.subr.bf16.mxu1 %v13740_v22  ;;  %v13812_v47 = vpack.c.bf16 %v11141_v11, %v11140_v13  ;;  %v10013_v13 = vld [vmem:[#allocation9 + $0x60] sm:$0xff]  ;;  %v10014_v11 = vld [vmem:[#allocation9 + $0x68] sm:$0xff] }
 0x694   :  { %13348 = vmatmul.mubr.msk.f32.gmra.mrb[82].mxu1 %vm8841_vm2, %v17770_v25 }
 0x695   :  { %13743 = vmatpush3.bf16.msra.mxu1 %v13740_v22  ;;  %13366 = vmatprep.mubr.msk.f32.mxu1 %vm8841_vm2, %v17678_v52  ;;  %v11101_v52 = vld [vmem:[%s17977_s5 + $0x158] sm:$0xff] }
 0x696   :  { %13745 = vmatprep.subr.bf16.mxu1 %v13744_v12  ;;  %v13756_v0 = vpack.c.bf16 %v11101_v52, %v11100_v10  ;;  %v9913_v52 = vld [vmem:[#allocation7 + $0x40] sm:$0xff] }
 0x699   :  { %13747 = vmatpush3.bf16.msra.mxu1 %v13744_v12  ;;  %v9908_v12 = vld [vmem:[#allocation7 + $0x18] sm:$0xff] }
 0x69a   :  { %13749 = vmatprep.subr.bf16.mxu1 %v13748_v20  ;;  %v13820_v32 = vpack.c.bf16 %v9908_v12, %v9907_v9  ;;  %v11147_v9 = vld [vmem:[%s17980_s8] ss:$0 sm:$0xff] }
 0x69d   :  { %13751 = vmatpush3.bf16.msra.mxu1 %v13748_v20  ;;  %v9910_v20 = vld [vmem:[#allocation7 + $0x28] sm:$0xff] }
 0x69e   :  { %13753 = vmatprep.subr.bf16.mxu1 %v13752_v36  ;;  %v13823_v40 = vpack.c.bf16 %v9910_v20, %v9909_v21 }
 0x6a0   :  { %13367 = vmatmul.mubr.msk.f32.vlgmr.msra.gmra.mrb[80].mxu1 %vm8841_vm2, %v17682_v14 }
 0x6a1   :  { %13369 = vmatprep.mubr.msk.f32.mxu1 %vm8841_vm2, %v17770_v25  ;;  %13755 = vmatpush3.bf16.msra.mxu1 %v13752_v36  ;;  %v9912_v36 = vld [vmem:[#allocation7 + $0x38] sm:$0xff] }
 0x6a2   :  { %13757 = vmatprep.subr.bf16.mxu1 %v13756_v0  ;;  %v13826_v10 = vpack.c.bf16 %v9912_v36, %v9911_v63  ;;  %v10099_v36 = vld [vmem:[#allocation10 + $0x10] sm:$0xff] }
 0x6a4   :  { %13370 = vmatmul.mubr.msk.f32.gmra.mrb[82].mxu1 %vm8841_vm2, %v17804_v5 }
 0x6a5   :  { %13759 = vmatpush3.bf16.msra.mxu1 %v13756_v0  ;;  %13388 = vmatprep.mubr.msk.f32.mxu1 %vm8841_vm2, %v17682_v14  ;;  %v11113_v14 = vld [vmem:[%s17977_s5 + $0x198] sm:$0xff]  ;;  %v9914_v0 = vld [vmem:[#allocation7 + $0x48] sm:$0xff] }
 0x6a6   :  { %13761 = vmatprep.subr.bf16.mxu1 %v13760_v23  ;;  %v13772_v17 = vpack.c.bf16 %v11113_v14, %v11112_v31  ;;  %v13829_v48 = vpack.c.bf16 %v9914_v0, %v9913_v52  ;;  %v11146_v31 = vld [vmem:[%s17978_s6] ss:$0 sm:$0xff] }
 0x6a9   :  { %13763 = vmatpush3.bf16.msra.mxu1 %v13760_v23  ;;  %v9916_v23 = vld [vmem:[#allocation7 + $0x58] sm:$0xff] }
 0x6aa   :  { %13765 = vmatprep.subr.bf16.mxu1 %v13764_v6 }
 0x6ad   :  { %13767 = vmatpush3.bf16.msra.mxu1 %v13764_v6  ;;  %v13835_v6 = vpack.c.bf16 %v9918_v29, %v9917_v41  ;;  %v10104_v41 = vld [vmem:[#allocation10 + $0x38] sm:$0xff] }
 0x6ae   :  { %13769 = vmatprep.subr.bf16.mxu1 %v13768_v28 }
 0x6b0   :  { %13389 = vmatmul.mubr.msk.f32.vlgmr.msra.gmra.mrb[80].mxu1 %vm8841_vm2, %v17735_v27  ;;  %v11137_v27 = vld [vmem:[%s17977_s5 + $0x218] sm:$0xff] }
 0x6b1   :  { %13391 = vmatprep.mubr.msk.f32.mxu1 %vm8841_vm2, %v17804_v5  ;;  %13771 = vmatpush3.bf16.msra.mxu1 %v13768_v28  ;;  %v13804_v34 = vpack.c.bf16 %v11137_v27, %v11136_v55  ;;  %v13838_v28 = vpack.c.bf16 %v9920_v50, %v9919_v8  ;;  %v10009_v27 = vld [vmem:[#allocation9 + $0x40] sm:$0xff]  ;;  %v10106_v8 = vld [vmem:[#allocation10 + $0x48] sm:$0xff] }
 0x6b2   :  { %13773 = vmatprep.subr.bf16.mxu1 %v13772_v17 }
 0x6b4   :  { %13392 = vmatmul.mubr.msk.f32.gmra.mrb[82].mxu1 %vm8841_vm2, %v17838_v30 }
 0x6b5   :  { %13775 = vmatpush3.bf16.msra.mxu1 %v13772_v17  ;;  %13410 = vmatprep.mubr.msk.f32.mxu1 %vm8841_vm2, %v17758_v18  ;;  %v9906_v18 = vld [vmem:[#allocation7 + $0x8] sm:$0xff] }
 0x6b6   :  { %13777 = vmatprep.subr.bf16.mxu1 %v13776_v24  ;;  %v13817_v22 = vpack.c.bf16 %v9906_v18, %v9905_v45  ;;  %v10015_v45 = vld [vmem:[#allocation9 + $0x70] sm:$0xff]  ;;  %v10016_v18 = vld [vmem:[#allocation9 + $0x78] sm:$0xff] }
 0x6b9   :  { %13779 = vmatpush3.bf16.msra.mxu1 %v13776_v24 }
 0x6ba   :  { %13781 = vmatprep.subr.bf16.mxu1 %v13780_v46 }
 0x6bd   :  { %13783 = vmatpush3.bf16.msra.mxu1 %v13780_v46 }
 0x6be   :  { %13785 = vmatprep.subr.bf16.mxu1 %v13784_v7 }
 0x6c0   :  { %13411 = vmatmul.mubr.msk.f32.vlgmr.msra.gmra.mrb[80].mxu1 %vm8841_vm2, %v17770_v25 }
 0x6c1   :  { %13787 = vmatpush3.bf16.msra.mxu1 %v13784_v7  ;;  %13413 = vmatprep.mubr.msk.f32.mxu1 %vm8841_vm2, %v9545_v59  ;;  %v10001_v7 = vld [vmem:[#allocation9] sm:$0xff] }
 0x6c2   :  { %13789 = vmatprep.subr.bf16.mxu1 %v13788_v16  ;;  %v13841_v1 = vpack.c.bf16 %v10002_v51, %v10001_v7 }
 0x6c4   :  { %13414 = vmatmul.mubr.msk.f32.gmra.mrb[82].mxu1 %vm8841_vm2, %v9546_v49 }
 0x6c5   :  { %13791 = vmatpush3.bf16.msra.mxu1 %v13788_v16  ;;  %13432 = vmatprep.mubr.msk.f32.mxu1 %vm8841_vm2, %v17770_v25  ;;  %v9776_v25 = vld [vmem:[#allocation4 + $0x78] sm:$0xff] }
 0x6c6   :  { %13793 = vmatprep.subr.bf16.mxu1 %v13792_v53 }
 0x6c9   :  { %13795 = vmatpush3.bf16.msra.mxu1 %v13792_v53  ;;  %v10004_v53 = vld [vmem:[#allocation9 + $0x18] sm:$0xff] }
 0x6ca   :  { %13797 = vmatprep.subr.bf16.mxu1 %v13796_v35 }
 0x6cd   :  { %13799 = vmatpush3.bf16.msra.mxu1 %v13796_v35  ;;  %v10006_v35 = vld [vmem:[#allocation9 + $0x28] sm:$0xff] }
 0x6ce   :  { %13801 = vmatprep.subr.bf16.mxu1 %v13800_v26  ;;  %v13847_v4 = vpack.c.bf16 %v10006_v35, %v10005_v39  ;;  %v10197_v35 = vld [vmem:[#allocation12 + $0x30] sm:$0xff] }
 0x6d0   :  { %13433 = vmatmul.mubr.msk.f32.vlgmr.msra.gmra.mrb[80].mxu1 %vm8841_vm2, %v17804_v5 }
 0x6d1   :  { %13803 = vmatpush3.bf16.msra.mxu1 %v13800_v26  ;;  %13435 = vmatprep.mubr.msk.f32.mxu1 %vm8841_vm2, %v9546_v49  ;;  %v10003_v49 = vld [vmem:[#allocation9 + $0x10] sm:$0xff]  ;;  %v10008_v26 = vld [vmem:[#allocation9 + $0x38] sm:$0xff] }
 0x6d2   :  { %13805 = vmatprep.subr.bf16.mxu1 %v13804_v34  ;;  %v13844_v19 = vpack.c.bf16 %v10004_v53, %v10003_v49  ;;  %v13850_v55 = vpack.c.bf16 %v10008_v26, %v10007_v58  ;;  %v10195_v53 = vld [vmem:[#allocation12 + $0x20] sm:$0xff] }
 0x6d3   :  { %v10199_v26 = vld [vmem:[#allocation12 + $0x40] sm:$0xff] }
 0x6d4   :  { %13436 = vmatmul.mubr.msk.f32.gmra.mrb[82].mxu1 %vm8841_vm2, %v9661_v3 }
 0x6d5   :  { %13807 = vmatpush3.bf16.msra.mxu1 %v13804_v34  ;;  %13454 = vmatprep.mubr.msk.f32.mxu1 %vm8841_vm2, %v17804_v5  ;;  %v13832_v5 = vpack.c.bf16 %v9916_v23, %v9915_v42  ;;  %v10010_v34 = vld [vmem:[#allocation9 + $0x48] sm:$0xff] }
 0x6d6   :  { %13809 = vmatprep.subr.bf16.mxu1 %v13808_v43  ;;  %v13853_v61 = vpack.c.bf16 %v10010_v34, %v10009_v27  ;;  %v10102_v42 = vld [vmem:[#allocation10 + $0x28] sm:$0xff]  ;;  %v10202_v34 = vld [vmem:[#allocation12 + $0x58] sm:$0xff] }
 0x6d9   :  { %13811 = vmatpush3.bf16.msra.mxu1 %v13808_v43 }
 0x6da   :  { %13813 = vmatprep.subr.bf16.mxu1 %v13812_v47 }
 0x6dd   :  { %13815 = vmatpush3.bf16.msra.mxu1 %v13812_v47  ;;  %v13859_v47 = vpack.c.bf16 %v10014_v11, %v10013_v13  ;;  %v10205_v13 = vld [vmem:[#allocation12 + $0x70] sm:$0xff]  ;;  %v10206_v11 = vld [vmem:[#allocation12 + $0x78] sm:$0xff] }
 0x6de   :  { %13816 = vmatprep.subr.bf16.mxu1 %v14729_v62 }
 0x6e0   :  { %13455 = vmatmul.mubr.msk.f32.vlgmr.msra.gmra.mrb[80].mxu1 %vm8841_vm2, %v17838_v30 }
 0x6e1   :  { %13457 = vmatprep.mubr.msk.f32.mxu1 %vm8841_vm2, %v9661_v3  ;;  %13818 = vmatpush3.bf16.msra.mxu1 %v13817_v22  ;;  %v10012_v3 = vld [vmem:[#allocation9 + $0x58] sm:$0xff]  ;;  %v13862_v22 = vpack.c.bf16 %v10016_v18, %v10015_v45 }
 0x6e2   :  { %13819 = vmatprep.subr.bf16.mxu1 %v14729_v62  ;;  %v13856_v43 = vpack.c.bf16 %v10012_v3, %v10011_v2  ;;  %v10203_v2 = vld [vmem:[#allocation12 + $0x60] sm:$0xff]  ;;  %v10204_v3 = vld [vmem:[#allocation12 + $0x68] sm:$0xff]  ;;  %v11149_v45 = vld [vmem:[%s17984_s12] ss:$0 sm:$0xff] }
 0x6e4   :  { %13458 = vmatmul.mubr.msk.f32.gmra.mrb[82].mxu1 %vm8841_vm2, %v9776_v25  ;;  %v10097_v25 = vld [vmem:[#allocation10] sm:$0xff] }
 0x6e5   :  { %13821 = vmatpush3.bf16.msra.mxu1 %v13820_v32  ;;  %13492 = vmatprep.mubr.msk.f32.mxu1 %vm14730_vm3, %v18154_v15  ;;  %v10098_v32 = vld [vmem:[#allocation10 + $0x8] sm:$0xff] }
 0x6e6   :  { %13822 = vmatprep.subr.bf16.mxu1 %v14729_v62  ;;  %v13865_v63 = vpack.c.bf16 %v10098_v32, %v10097_v25  ;;  %v11150_v25 = vld [vmem:[%s17986_s14] ss:$0 sm:$0xff] }
 0x6e9   :  { %13824 = vmatpush3.bf16.msra.mxu1 %v13823_v40 }
 0x6ea   :  { %13825 = vmatprep.subr.bf16.mxu1 %v14729_v62 }
 0x6ed   :  { %13827 = vmatpush3.bf16.msra.mxu1 %v13826_v10  ;;  %v10100_v10 = vld [vmem:[#allocation10 + $0x18] sm:$0xff] }
 0x6ee   :  { %13828 = vmatprep.subr.bf16.mxu1 %v14729_v62  ;;  %v13868_v0 = vpack.c.bf16 %v10100_v10, %v10099_v36 }
 0x6f1   :  { %13830 = vmatpush3.bf16.msra.mxu1 %v13829_v48  ;;  %v10101_v48 = vld [vmem:[#allocation10 + $0x20] sm:$0xff] }
 0x6f2   :  { %13831 = vmatprep.subr.bf16.mxu1 %v14729_v62  ;;  %v13871_v23 = vpack.c.bf16 %v10102_v42, %v10101_v48 }
 0x6f5   :  { %13833 = vmatpush3.bf16.msra.mxu1 %v13832_v5  ;;  %v10103_v5 = vld [vmem:[#allocation10 + $0x30] sm:$0xff] }
 0x6f6   :  { %13834 = vmatprep.subr.bf16.mxu1 %v14729_v62  ;;  %v13874_v29 = vpack.c.bf16 %v10104_v41, %v10103_v5 }
 0x6f9   :  { %13836 = vmatpush3.bf16.msra.mxu1 %v13835_v6  ;;  %v10105_v6 = vld [vmem:[#allocation10 + $0x40] sm:$0xff] }
 0x6fa   :  { %13837 = vmatprep.subr.bf16.mxu1 %v14729_v62  ;;  %v13877_v50 = vpack.c.bf16 %v10106_v8, %v10105_v6 }
 0x6fd   :  { %13839 = vmatpush3.bf16.msra.mxu1 %v13838_v28  ;;  %v10107_v28 = vld [vmem:[#allocation10 + $0x50] sm:$0xff] }
 0x6fe   :  { %13840 = vmatprep.subr.bf16.mxu1 %v14729_v62 }
 0x7b3   :  { %v13456_v14 = vpop.f32.mrb[80].mxu1 }
 0x7b4   :  { %v9895_v17 = vadd.f32 %v13456_v14, %v11146_v31  ;;  %v9864_v37 = vpop.f32.mrb[81].mxu1 }
 0x7b5   :  { %v9894_v60 = vadd.f32 %v11146_v31, %v9864_v37  ;;  %v10110_v37 = vld [vmem:[#allocation10 + $0x68] sm:$0xff] }
 0x7b6   :  { %14596 = vtanh.f32 %v9895_v17  ;;  %v10109_v17 = vld [vmem:[#allocation10 + $0x60] sm:$0xff] }
 0x7b7   :  { %v13459_v30 = vpop.f32.mrb[82].mxu1  ;;  %14598 = vtanh.f32 %v9894_v60  ;;  %v13883_v60 = vpack.c.bf16 %v10110_v37, %v10109_v17 }
 0x7b8   :  { %v9897_v24 = vadd.f32 %v13459_v30, %v11146_v31  ;;  %v9874_v38 = vpop.f32.mrb[83].mxu1  ;;  %v10111_v30 = vld [vmem:[#allocation10 + $0x70] sm:$0xff] }
 0x7b9   :  { %v9896_v33 = vadd.f32 %v11146_v31, %v9874_v38  ;;  %v10108_v31 = vld [vmem:[#allocation10 + $0x58] sm:$0xff] }
 0x7ba   :  { %14600 = vtanh.f32 %v9897_v24  ;;  %v13880_v14 = vpack.c.bf16 %v10108_v31, %v10107_v28  ;;  %v10112_v24 = vld [vmem:[#allocation10 + $0x78] sm:$0xff] }
 0x7bb   :  { %14602 = vtanh.f32 %v9896_v33  ;;  %v13886_v38 = vpack.c.bf16 %v10112_v24, %v10111_v30  ;;  %v11148_v33 = vld [vmem:[%s17982_s10] ss:$0 sm:$0xff] }
 0x7c0   :  { %v14597_v46 = vpop.eup %14596 }
 0x7c1   :  { %v14599_v44 = vpop.eup %14598 }
 0x7c4   :  { %v14601_v54 = vpop.eup %14600 }
 0x7c5   :  { %v14603_v57 = vpop.eup %14602  ;;  %v9903_v59 = vmax.f32 %v14597_v46, %v14601_v54  ;;  %v10192_v54 = vld [vmem:[#allocation12 + $0x8] sm:$0xff] }
 0x7c6   :  { %v9902_v16 = vmax.f32 %v14599_v44, %v14603_v57  ;;  %v10191_v44 = vld [vmem:[#allocation12] sm:$0xff] }
 0x7c8   :  { %v9904_v56 = vmax.f32 %v9902_v16, %v9903_v59  ;;  %v13889_v59 = vpack.c.bf16 %v10192_v54, %v10191_v44  ;;  %v10193_v16 = vld [vmem:[#allocation12 + $0x10] sm:$0xff] }
 0x7ca   :  { %13493 = vmatmul.mubr.f32.vlgmr.msra.gmra.mrb[84].mxu1 %v9904_v56 }
 0x7cb   :  { %13842 = vmatpush3.bf16.msra.mxu1 %v13841_v1  ;;  %13527 = vmatprep.mubr.msk.f32.mxu1 %vm14730_vm3, %v18154_v15  ;;  %v10194_v1 = vld [vmem:[#allocation12 + $0x18] sm:$0xff] }
 0x7cc   :  { %13843 = vmatprep.subr.bf16.mxu1 %v14729_v62  ;;  %v13892_v49 = vpack.c.bf16 %v10194_v1, %v10193_v16 }
 0x7cf   :  { %13845 = vmatpush3.bf16.msra.mxu1 %v13844_v19  ;;  %v10196_v19 = vld [vmem:[#allocation12 + $0x28] sm:$0xff] }
 0x7d0   :  { %13846 = vmatprep.subr.bf16.mxu1 %v14729_v62  ;;  %v13895_v39 = vpack.c.bf16 %v10196_v19, %v10195_v53 }
 0x7d3   :  { %13848 = vmatpush3.bf16.msra.mxu1 %v13847_v4  ;;  %v10198_v4 = vld [vmem:[#allocation12 + $0x38] sm:$0xff] }
 0x7d4   :  { %13849 = vmatprep.subr.bf16.mxu1 %v14729_v62  ;;  %v13898_v58 = vpack.c.bf16 %v10198_v4, %v10197_v35 }
 0x7d7   :  { %13851 = vmatpush3.bf16.msra.mxu1 %v13850_v55  ;;  %v10200_v55 = vld [vmem:[#allocation12 + $0x48] sm:$0xff] }
 0x7d8   :  { %13852 = vmatprep.subr.bf16.mxu1 %v14729_v62  ;;  %v13901_v27 = vpack.c.bf16 %v10200_v55, %v10199_v26 }
 0x7db   :  { %13854 = vmatpush3.bf16.msra.mxu1 %v13853_v61 }
 0x7dc   :  { %13855 = vmatprep.subr.bf16.mxu1 %v14729_v62 }
 0x7df   :  { %13857 = vmatpush3.bf16.msra.mxu1 %v13856_v43  ;;  %v13907_v43 = vpack.c.bf16 %v10204_v3, %v10203_v2 }
 0x7e0   :  { %13858 = vmatprep.subr.bf16.mxu1 %v14729_v62 }
 0x7e3   :  { %13860 = vmatpush3.bf16.msra.mxu1 %v13859_v47  ;;  %v13910_v47 = vpack.c.bf16 %v10206_v11, %v10205_v13 }
 0x7e4   :  { %13861 = vmatprep.subr.bf16.mxu1 %v14729_v62 }
 0x7e7   :  { %13863 = vmatpush3.bf16.msra.mxu1 %v13862_v22 }
 0x7e8   :  { %13864 = vmatprep.subr.bf16.mxu1 %v14729_v62 }
 0x89d   :  { %v9994_v12 = vpop.f32.mrb[84].mxu1 }
 0x89e   :  { %v9995_v21 = vadd.f32 %v11147_v9, %v9994_v12  ;;  %v13494_v20 = vpop.f32.mrb[85].mxu1 }
 0x8a0   :  { %vm9998_vm4 = vcmp.gt.f32.partialorder %v9995_v21, 0.0  ;;  %v9999_v40 = vmul.f32 0.1, %v9995_v21 }
 0x8a2   :  { %v10000_v52 = vsel %vm9998_vm4, %v9995_v21, %v9999_v40 }
 0x8a3   :  { %13528 = vmatmul.mubr.f32.vlgmr.msra.gmra.mrb[86].mxu1 %v10000_v52 }
 0x8a4   :  { %13866 = vmatpush3.bf16.msra.mxu1 %v13865_v63  ;;  %13562 = vmatprep.mubr.msk.f32.mxu1 %vm14730_vm3, %v18154_v15 }
 0x8a5   :  { %13867 = vmatprep.subr.bf16.mxu1 %v14729_v62 }
 0x8a8   :  { %13869 = vmatpush3.bf16.msra.mxu1 %v13868_v0 }
 0x8a9   :  { %13870 = vmatprep.subr.bf16.mxu1 %v14729_v62 }
 0x8ac   :  { %13872 = vmatpush3.bf16.msra.mxu1 %v13871_v23 }
 0x8ad   :  { %13873 = vmatprep.subr.bf16.mxu1 %v14729_v62 }
 0x8b0   :  { %13875 = vmatpush3.bf16.msra.mxu1 %v13874_v29 }
 0x8b1   :  { %13876 = vmatprep.subr.bf16.mxu1 %v14729_v62 }
 0x8b4   :  { %13878 = vmatpush3.bf16.msra.mxu1 %v13877_v50 }
 0x8b5   :  { %13879 = vmatprep.subr.bf16.mxu1 %v14729_v62 }
 0x8b8   :  { %13881 = vmatpush3.bf16.msra.mxu1 %v13880_v14 }
 0x8b9   :  { %13882 = vmatprep.subr.bf16.mxu1 %v14729_v62 }
 0x8bc   :  { %13884 = vmatpush3.bf16.msra.mxu1 %v13883_v60 }
 0x8bd   :  { %13885 = vmatprep.subr.bf16.mxu1 %v14729_v62 }
 0x8c0   :  { %13887 = vmatpush3.bf16.msra.mxu1 %v13886_v38 }
 0x8c1   :  { %13888 = vmatprep.subr.bf16.mxu1 %v14729_v62 }
 0x976   :  { %v10090_v46 = vpop.f32.mrb[86].mxu1 }
 0x977   :  { %v10091_v7 = vadd.f32 %v11148_v33, %v10090_v46  ;;  %v13529_v51 = vpop.f32.mrb[87].mxu1 }
 0x979   :  { %vm10094_vm5 = vcmp.gt.f32.partialorder %v10091_v7, 0.0  ;;  %v10095_v57 = vmul.f32 0.1, %v10091_v7 }
 0x97b   :  { %v10096_v56 = vsel %vm10094_vm5, %v10091_v7, %v10095_v57 }
 0x97c   :  { %13563 = vmatmul.mubr.f32.vlgmr.msra.gmra.mrb[88].mxu1 %v10096_v56 }
 0x97d   :  { %13890 = vmatpush3.bf16.msra.mxu1 %v13889_v59  ;;  %13597 = vmatprep.mubr.msk.f32.mxu1 %vm14730_vm3, %v18154_v15  ;;  %v10201_v15 = vld [vmem:[#allocation12 + $0x50] sm:$0xff] }
 0x97e   :  { %13891 = vmatprep.subr.bf16.mxu1 %v14729_v62  ;;  %v13904_v61 = vpack.c.bf16 %v10202_v34, %v10201_v15 }
 0x981   :  { %13893 = vmatpush3.bf16.msra.mxu1 %v13892_v49 }
 0x982   :  { %13894 = vmatprep.subr.bf16.mxu1 %v14729_v62 }
 0x985   :  { %13896 = vmatpush3.bf16.msra.mxu1 %v13895_v39 }
 0x986   :  { %13897 = vmatprep.subr.bf16.mxu1 %v14729_v62 }
 0x989   :  { %13899 = vmatpush3.bf16.msra.mxu1 %v13898_v58 }
 0x98a   :  { %13900 = vmatprep.subr.bf16.mxu1 %v14729_v62 }
 0x98d   :  { %13902 = vmatpush3.bf16.msra.mxu1 %v13901_v27 }
 0x98e   :  { %13903 = vmatprep.subr.bf16.mxu1 %v14729_v62 }
 0x991   :  { %13905 = vmatpush3.bf16.msra.mxu1 %v13904_v61 }
 0x992   :  { %13906 = vmatprep.subr.bf16.mxu1 %v14729_v62 }
 0x995   :  { %13908 = vmatpush3.bf16.msra.mxu1 %v13907_v43 }
 0x996   :  { %13909 = vmatprep.subr.bf16.mxu1 %v14729_v62 }
 0x999   :  { %13911 = vmatpush3.bf16.msra.mxu1 %v13910_v47 }
 0xa4f   :  { %v10186_v18 = vpop.f32.mrb[88].mxu1 }
 0xa50   :  { %v10187_v22 = vadd.f32 %v11149_v45, %v10186_v18  ;;  %v13564_v9 = vpop.f32.mrb[89].mxu1 }
 0xa52   :  { %v10190_v12 = vmax.f32 %v10187_v22, 0.0 }
 0xa54   :  { %13598 = vmatmul.mubr.f32.vlgmr.msra.gmra.mrb[90].mxu1 %v10190_v12 }
 0xb27   :  { %v10280_v32 = vpop.f32.mrb[90].mxu1 }
 0xb28   :  { %v10281_v21 = vadd.f32 %v11150_v25, %v10280_v32  ;;  %v13599_v62 = vpop.f32.mrb[91].mxu1 }
 0xb2a   :  { %10284 = vst [vmem:[%s17987_s15] sm:$0xff] %v10281_v21 }
 0xb2b   :  { %10289 = vsyncpa [#allocation6], 1 }
 0xb2c   :  { %10290 = vsyncpa [#allocation8], 1 }
 0xb2d   :  { %10291 = vsyncpa [#allocation11], 1 }

</bundles_post_ra>
